<compile_context>
chip_gen: v6e
topology: v6e:2x2x1
jax: 0.10.0
libtpu: 0.0.40
codegen_flags: <defaults>
</compile_context>

<pallas_src>
import functools

import jax
import jax.numpy as jnp
from jax.experimental import pallas as pl
from jax.experimental.pallas import tpu as pltpu

PI = 3.14159265359
LANE = 128


def _sfun_rff_kernel(xT_ref, brffT_ref,
                     w1sT_ref, w1cT_ref, b1T_ref,
                     w2T_ref, b2T_ref,
                     w3T_ref, b3T_ref,
                     oT_ref):
    # x tile, batch along lanes: (2, tm)
    xT = xT_ref[...]
    xT = xT - jnp.floor(xT)                       # torch.remainder(x, 1)

    # Fourier projection; 2*pi is already folded into brffT (F, 2).
    # K=2 contraction done as two broadcast FMAs (outer products) on the VPU,
    # skipping MXU push/pop latency for a tiny contraction.
    brffT = brffT_ref[...]                        # (F, 2)
    projT = (brffT[:, 0:1] * xT[0:1, :]
             + brffT[:, 1:2] * xT[1:2, :])        # (F, tm), lane-dense

    sinT = jnp.sin(projT)                         # (F, tm)
    cosT = jnp.cos(projT)                         # (F, tm)

    # h1 = tanh(W1_sin^T @ sin + W1_cos^T @ cos + b1)  -- concat eliminated.
    h = jnp.tanh(
        jnp.dot(w1sT_ref[...], sinT, preferred_element_type=jnp.float32)
        + jnp.dot(w1cT_ref[...], cosT, preferred_element_type=jnp.float32)
        + b1T_ref[...])                           # (H1, tm)
    h = jnp.tanh(
        jnp.dot(w2T_ref[...], h, preferred_element_type=jnp.float32)
        + b2T_ref[...])                           # (H2, tm)
    y = jnp.tanh(
        jnp.dot(w3T_ref[...], h, preferred_element_type=jnp.float32)
        + b3T_ref[...])                           # (O, tm)
    oT_ref[...] = y.astype(oT_ref.dtype)


@functools.partial(jax.jit, static_argnames=("tm",))
def sfun_rff_forward(x, params, *, tm=2048):
    """x: (B, 2) f32. params: dict of RFF matrix + MLP weights/biases. Returns (B, O)."""
    B, D = x.shape
    assert D == 2

    # ---- one-time (per-call, tiny) parameter preparation -------------------
    brffT = (2.0 * PI * params["b_rff"]).T        # (F, 2)   2*pi folded in
    nfeat = brffT.shape[0]
    w1T = params["w1"].T                          # (H1, 2F)
    w1sT = w1T[:, :nfeat]                         # (H1, F)  multiplies sin(p)
    w1cT = w1T[:, nfeat:]                         # (H1, F)  multiplies cos(p)
    b1T = params["b1"].T                          # (H1, 1)
    w2T = params["w2"].T                          # (H2, H1)
    b2T = params["b2"].T                          # (H2, 1)
    w3T = params["w3"].T                          # (O,  H2)
    b3T = params["b3"].T                          # (O,  1)
    out_dim = w3T.shape[0]

    # ---- batch-in-lanes layout + tail padding -------------------------------
    b_pad128 = -(-B // LANE) * LANE               # B rounded up to lane width
    tm_eff = max(LANE, min(tm, b_pad128))
    tm_eff = (tm_eff // LANE) * LANE              # multiple of 128
    B_pad = -(-B // tm_eff) * tm_eff
    xT = jnp.pad(x.T, ((0, 0), (0, B_pad - B)))   # (2, B_pad)

    full = lambda a: pl.BlockSpec(a.shape, lambda i: (0, 0))

    yT = pl.pallas_call(
        _sfun_rff_kernel,
        out_shape=jax.ShapeDtypeStruct((out_dim, B_pad), jnp.float32),
        grid_spec=pltpu.PrefetchScalarGridSpec(
            num_scalar_prefetch=0,
            grid=(B_pad // tm_eff,),
            in_specs=[
                pl.BlockSpec((D, tm_eff), lambda i: (0, i)),   # x tile (batch in lanes)
                full(brffT),
                full(w1sT), full(w1cT), full(b1T),
                full(w2T), full(b2T),
                full(w3T), full(b3T),
            ],
            out_specs=pl.BlockSpec((out_dim, tm_eff), lambda i: (0, i)),
        ),
        compiler_params=pltpu.CompilerParams(
            dimension_semantics=("parallel",)),
    )(xT, brffT, w1sT, w1cT, b1T, w2T, b2T, w3T, b3T)

    # back to the module's (B, out_dim) layout; drop tail padding.
    return yT[:, :B].T


def _reference_forward(x, params):
    """Pure-JAX reference in the original (torch) op order / layout."""
    x = x - jnp.floor(x)
    proj = (2.0 * PI * x) @ params["b_rff"]
    feat = jnp.concatenate([jnp.sin(proj), jnp.cos(proj)], axis=-1)
    h = jnp.tanh(feat @ params["w1"] + params["b1"])
    h = jnp.tanh(h @ params["w2"] + params["b2"])
    return jnp.tanh(h @ params["w3"] + params["b3"])


def init_params(key, f_nfeatures=64, f_scale=10.0,
                dim_mpl_layers=(128, 32, 32, 2)):
    """Deterministic synthetic parameters matching the module's __init__ shapes."""
    ks = jax.random.split(key, 7)
    assert dim_mpl_layers[0] == 2 * f_nfeatures
    p = {}
    # Fourier.b = randn(2, nfeat) * scale  (non-trainable)
    p["b_rff"] = jax.random.normal(ks[0], (2, f_nfeatures), jnp.float32) * f_scale
    # MLP layers (nn.Linear stores (out,in); we keep (in,out) for x @ W)
    dims = dim_mpl_layers
    p["w1"] = jax.random.normal(ks[1], (dims[0], dims[1]), jnp.float32) * 0.1
    p["b1"] = jax.random.normal(ks[2], (1, dims[1]), jnp.float32) * 0.1
    p["w2"] = jax.random.normal(ks[3], (dims[1], dims[2]), jnp.float32) * 0.1
    p["b2"] = jax.random.normal(ks[4], (1, dims[2]), jnp.float32) * 0.1
    p["w3"] = jax.random.normal(ks[5], (dims[2], dims[3]), jnp.float32) * 0.1
    p["b3"] = jax.random.normal(ks[6], (1, dims[3]), jnp.float32) * 0.1
    return p


if __name__ == "__main__":
    key = jax.random.PRNGKey(0)
    k_x, k_p = jax.random.split(key)

    B = 300                                   # not a multiple of 128 -> exercises tail padding
    x = jax.random.normal(k_x, (B, 2), jnp.float32) * 2.0  # includes negatives
    params = init_params(k_p)

    y = sfun_rff_forward(x, params)           # default tm=2048, clamped to padded batch
    y = jax.block_until_ready(y)

    y_ref = _reference_forward(x, params)
    assert y.shape == (B, 2)
    # tolerance accounts for the (mathematically equivalent) 2*pi fold /
    # split-W1 reassociation feeding large-argument sin/cos in fp32.
    assert jnp.allclose(y, y_ref, atol=2e-4, rtol=2e-4), "mismatch vs reference"

    print("KERNEL_OK")
</pallas_src>

<mosaic_0001>
module attributes {stable_mosaic.version = 11 : i64} {
  func.func @_sfun_rff_kernel(%arg0: i32, %arg1: memref<2x384xf32, #tpu.memory_space<vmem>>, %arg2: memref<64x2xf32, #tpu.memory_space<vmem>>, %arg3: memref<32x64xf32, #tpu.memory_space<vmem>>, %arg4: memref<32x64xf32, #tpu.memory_space<vmem>>, %arg5: memref<32x1xf32, #tpu.memory_space<vmem>>, %arg6: memref<32x32xf32, #tpu.memory_space<vmem>>, %arg7: memref<32x1xf32, #tpu.memory_space<vmem>>, %arg8: memref<2x32xf32, #tpu.memory_space<vmem>>, %arg9: memref<2x1xf32, #tpu.memory_space<vmem>>, %arg10: memref<2x384xf32, #tpu.memory_space<vmem>>) attributes {dimension_semantics = [#tpu.dimension_semantics<parallel>], iteration_bounds = array<i64: 1>, scalar_prefetch = 0 : i64, scratch_operands = 0 : i64, tpu.core_type = #tpu.core_type<tc>, window_params = [{transform_indices = @transform_0, window_bounds = array<i64: 2, 384>}, {pipeline_mode = #tpu.pipeline_mode<synchronous>, transform_indices = @transform_1, window_bounds = array<i64: 64, 2>}, {pipeline_mode = #tpu.pipeline_mode<synchronous>, transform_indices = @transform_2, window_bounds = array<i64: 32, 64>}, {pipeline_mode = #tpu.pipeline_mode<synchronous>, transform_indices = @transform_3, window_bounds = array<i64: 32, 64>}, {pipeline_mode = #tpu.pipeline_mode<synchronous>, transform_indices = @transform_4, window_bounds = array<i64: 32, 1>}, {pipeline_mode = #tpu.pipeline_mode<synchronous>, transform_indices = @transform_5, window_bounds = array<i64: 32, 32>}, {pipeline_mode = #tpu.pipeline_mode<synchronous>, transform_indices = @transform_6, window_bounds = array<i64: 32, 1>}, {pipeline_mode = #tpu.pipeline_mode<synchronous>, transform_indices = @transform_7, window_bounds = array<i64: 2, 32>}, {pipeline_mode = #tpu.pipeline_mode<synchronous>, transform_indices = @transform_8, window_bounds = array<i64: 2, 1>}, {transform_indices = @transform_9, window_bounds = array<i64: 2, 384>}]} {
    %c0 = arith.constant 0 : index
    %c0_0 = arith.constant 0 : index
    %0 = vector.load %arg1[%c0, %c0_0] : memref<2x384xf32, #tpu.memory_space<vmem>>, vector<2x384xf32>
    %1 = math.floor %0 : vector<2x384xf32>
    %2 = arith.subf %0, %1 : vector<2x384xf32>
    %c0_1 = arith.constant 0 : index
    %c0_2 = arith.constant 0 : index
    %3 = vector.load %arg2[%c0_1, %c0_2] : memref<64x2xf32, #tpu.memory_space<vmem>>, vector<64x2xf32>
    %4 = vector.extract_strided_slice %3 {offsets = [0, 0], sizes = [64, 1], strides = [1, 1]} : vector<64x2xf32> to vector<64x1xf32>
    %5 = vector.extract_strided_slice %2 {offsets = [0, 0], sizes = [1, 384], strides = [1, 1]} : vector<2x384xf32> to vector<1x384xf32>
    %6 = vector.broadcast %4 : vector<64x1xf32> to vector<64x384xf32>
    %7 = vector.broadcast %5 : vector<1x384xf32> to vector<64x384xf32>
    %8 = arith.mulf %6, %7 : vector<64x384xf32>
    %9 = vector.extract_strided_slice %3 {offsets = [0, 1], sizes = [64, 1], strides = [1, 1]} : vector<64x2xf32> to vector<64x1xf32>
    %10 = vector.extract_strided_slice %2 {offsets = [1, 0], sizes = [1, 384], strides = [1, 1]} : vector<2x384xf32> to vector<1x384xf32>
    %11 = vector.broadcast %9 : vector<64x1xf32> to vector<64x384xf32>
    %12 = vector.broadcast %10 : vector<1x384xf32> to vector<64x384xf32>
    %13 = arith.mulf %11, %12 : vector<64x384xf32>
    %14 = arith.addf %8, %13 : vector<64x384xf32>
    %15 = math.sin %14 : vector<64x384xf32>
    %16 = math.cos %14 : vector<64x384xf32>
    %c0_3 = arith.constant 0 : index
    %c0_4 = arith.constant 0 : index
    %17 = vector.load %arg3[%c0_3, %c0_4] : memref<32x64xf32, #tpu.memory_space<vmem>>, vector<32x64xf32>
    %cst = arith.constant dense<0.000000e+00> : vector<32x384xf32>
    %18 = tpu.matmul %17, %15, %cst {dimension_numbers = #tpu.dot_dimension_numbers<[1], [0], [0], [1], [0, 0, 1, 1], [], []>} : vector<32x64xf32>, vector<64x384xf32>, vector<32x384xf32> -> vector<32x384xf32>
    %c0_5 = arith.constant 0 : index
    %c0_6 = arith.constant 0 : index
    %19 = vector.load %arg4[%c0_5, %c0_6] : memref<32x64xf32, #tpu.memory_space<vmem>>, vector<32x64xf32>
    %cst_7 = arith.constant dense<0.000000e+00> : vector<32x384xf32>
    %20 = tpu.matmul %19, %16, %cst_7 {dimension_numbers = #tpu.dot_dimension_numbers<[1], [0], [0], [1], [0, 0, 1, 1], [], []>} : vector<32x64xf32>, vector<64x384xf32>, vector<32x384xf32> -> vector<32x384xf32>
    %21 = arith.addf %18, %20 : vector<32x384xf32>
    %c0_8 = arith.constant 0 : index
    %c0_9 = arith.constant 0 : index
    %22 = vector.load %arg5[%c0_8, %c0_9] : memref<32x1xf32, #tpu.memory_space<vmem>>, vector<32x1xf32>
    %23 = vector.broadcast %22 : vector<32x1xf32> to vector<32x384xf32>
    %24 = arith.addf %21, %23 : vector<32x384xf32>
    %25 = math.tanh %24 : vector<32x384xf32>
    %c0_10 = arith.constant 0 : index
    %c0_11 = arith.constant 0 : index
    %26 = vector.load %arg6[%c0_10, %c0_11] : memref<32x32xf32, #tpu.memory_space<vmem>>, vector<32x32xf32>
    %cst_12 = arith.constant dense<0.000000e+00> : vector<32x384xf32>
    %27 = tpu.matmul %26, %25, %cst_12 {dimension_numbers = #tpu.dot_dimension_numbers<[1], [0], [0], [1], [0, 0, 1, 1], [], []>} : vector<32x32xf32>, vector<32x384xf32>, vector<32x384xf32> -> vector<32x384xf32>
    %c0_13 = arith.constant 0 : index
    %c0_14 = arith.constant 0 : index
    %28 = vector.load %arg7[%c0_13, %c0_14] : memref<32x1xf32, #tpu.memory_space<vmem>>, vector<32x1xf32>
    %29 = vector.broadcast %28 : vector<32x1xf32> to vector<32x384xf32>
    %30 = arith.addf %27, %29 : vector<32x384xf32>
    %31 = math.tanh %30 : vector<32x384xf32>
    %c0_15 = arith.constant 0 : index
    %c0_16 = arith.constant 0 : index
    %32 = vector.load %arg8[%c0_15, %c0_16] : memref<2x32xf32, #tpu.memory_space<vmem>>, vector<2x32xf32>
    %cst_17 = arith.constant dense<0.000000e+00> : vector<2x384xf32>
    %33 = tpu.matmul %32, %31, %cst_17 {dimension_numbers = #tpu.dot_dimension_numbers<[1], [0], [0], [1], [0, 0, 1, 1], [], []>} : vector<2x32xf32>, vector<32x384xf32>, vector<2x384xf32> -> vector<2x384xf32>
    %c0_18 = arith.constant 0 : index
    %c0_19 = arith.constant 0 : index
    %34 = vector.load %arg9[%c0_18, %c0_19] : memref<2x1xf32, #tpu.memory_space<vmem>>, vector<2x1xf32>
    %35 = vector.broadcast %34 : vector<2x1xf32> to vector<2x384xf32>
    %36 = arith.addf %33, %35 : vector<2x384xf32>
    %37 = math.tanh %36 : vector<2x384xf32>
    %c0_20 = arith.constant 0 : index
    %c0_21 = arith.constant 0 : index
    %38 = vector.load %arg10[%c0_20, %c0_21] : memref<2x384xf32, #tpu.memory_space<vmem>>, vector<2x384xf32>
    tpu.vector_store %arg10[%c0_20, %c0_21], %37 {strides = array<i32>} : memref<2x384xf32, #tpu.memory_space<vmem>>, vector<2x384xf32>,
    return
  }
  func.func @transform_0(%arg0: i32) -> (i32, i32) {
    %c0_i32 = arith.constant 0 : i32
    %c0_i32_0 = arith.constant 0 : i32
    return %c0_i32, %arg0 : i32, i32
  }
  func.func @transform_1(%arg0: i32) -> (i32, i32) {
    %c0_i32 = arith.constant 0 : i32
    %c0_i32_0 = arith.constant 0 : i32
    %c0_i32_1 = arith.constant 0 : i32
    return %c0_i32, %c0_i32_0 : i32, i32
  }
  func.func @transform_2(%arg0: i32) -> (i32, i32) {
    %c0_i32 = arith.constant 0 : i32
    %c0_i32_0 = arith.constant 0 : i32
    %c0_i32_1 = arith.constant 0 : i32
    return %c0_i32, %c0_i32_0 : i32, i32
  }
  func.func @transform_3(%arg0: i32) -> (i32, i32) {
    %c0_i32 = arith.constant 0 : i32
    %c0_i32_0 = arith.constant 0 : i32
    %c0_i32_1 = arith.constant 0 : i32
    return %c0_i32, %c0_i32_0 : i32, i32
  }
  func.func @transform_4(%arg0: i32) -> (i32, i32) {
    %c0_i32 = arith.constant 0 : i32
    %c0_i32_0 = arith.constant 0 : i32
    %c0_i32_1 = arith.constant 0 : i32
    return %c0_i32, %c0_i32_0 : i32, i32
  }
  func.func @transform_5(%arg0: i32) -> (i32, i32) {
    %c0_i32 = arith.constant 0 : i32
    %c0_i32_0 = arith.constant 0 : i32
    %c0_i32_1 = arith.constant 0 : i32
    return %c0_i32, %c0_i32_0 : i32, i32
  }
  func.func @transform_6(%arg0: i32) -> (i32, i32) {
    %c0_i32 = arith.constant 0 : i32
    %c0_i32_0 = arith.constant 0 : i32
    %c0_i32_1 = arith.constant 0 : i32
    return %c0_i32, %c0_i32_0 : i32, i32
  }
  func.func @transform_7(%arg0: i32) -> (i32, i32) {
    %c0_i32 = arith.constant 0 : i32
    %c0_i32_0 = arith.constant 0 : i32
    %c0_i32_1 = arith.constant 0 : i32
    return %c0_i32, %c0_i32_0 : i32, i32
  }
  func.func @transform_8(%arg0: i32) -> (i32, i32) {
    %c0_i32 = arith.constant 0 : i32
    %c0_i32_0 = arith.constant 0 : i32
    %c0_i32_1 = arith.constant 0 : i32
    return %c0_i32, %c0_i32_0 : i32, i32
  }
  func.func @transform_9(%arg0: i32) -> (i32, i32) {
    %c0_i32 = arith.constant 0 : i32
    %c0_i32_0 = arith.constant 0 : i32
    return %c0_i32, %arg0 : i32, i32
  }
}

</mosaic_0001>

<bundles_post_ra>
// kernel: sfun_rff_forward.1
= control target key start
LH: loop header
LB: loop body
LE: loop exit
PB: predicated region body
PF: predicated region fallthrough
CT: control target
= control target key end

     0   :  { %v6632_v0 = vmov 0   ;;  %v6633_v3 = vmov 1   ;;  %v84_v15 = vlaneseq  ;;  %s10409_s1 = inlined_call_operand.vmem [shape: f32[64,2], index: 1, kind: input, shape index: {}]   ;;  %s10410_s4 = inlined_call_operand.vmem [shape: f32[32,1], index: 4, kind: input, shape index: {}]   ;;  %s10411_s6 = inlined_call_operand.vmem [shape: f32[32,1], index: 6, kind: input, shape index: {}]   ;;  %s10412_s0 = inlined_call_operand.vmem [shape: f32[2,384], index: 0, kind: input, shape index: {}]   ;;  %s10413_s8 = inlined_call_operand.vmem [shape: f32[2,1], index: 8, kind: input, shape index: {}]   ;;  %s10414_s3 = inlined_call_operand.vmem [shape: f32[32,64], index: 3, kind: input, shape index: {}]   ;;  %s10415_s2 = inlined_call_operand.vmem [shape: f32[32,64], index: 2, kind: input, shape index: {}]   ;;  %s10416_s5 = inlined_call_operand.vmem [shape: f32[32,32], index: 5, kind: input, shape index: {}]   ;;  %s10417_s7 = inlined_call_operand.vmem [shape: f32[2,32], index: 7, kind: input, shape index: {}]   ;;  %s10418_s9 = inlined_call_operand.vmem [shape: f32[2,384], index: 9, kind: output, shape index: {}]  }
   0x1   :  { %6478 = vset.pattern.permute.xlu1 %v6632_v0  ;;  %6476 = vset.pattern.permute.xlu0 %v6632_v0  ;;  %v42_v1 = vld [vmem:[%s10409_s1 + $0x38] sm:$0xff]  ;;  %v41_v2 = vld [vmem:[%s10409_s1 + $0x30] sm:$0xff]  ;;  %v40_v4 = vld [vmem:[%s10409_s1 + $0x28] sm:$0xff] }
   0x2   :  { %80 = vperm.xlu0 %6476, %v42_v1   ;;  %75 = vperm.xlu1 %6478, %v41_v2   ;;  %v39_v5 = vld [vmem:[%s10409_s1 + $0x20] sm:$0xff]  ;;  %v38_v6 = vld [vmem:[%s10409_s1 + $0x18] sm:$0xff]  ;;  %v37_v7 = vld [vmem:[%s10409_s1 + $0x10] sm:$0xff]  ;;  %v6735_v17 = vshrl.u32 %v84_v15, 7 }
   0x3   :  { %v36_v8 = vld [vmem:[%s10409_s1 + $0x8] sm:$0xff]  ;;  %v35_v9 = vld [vmem:[%s10409_s1] sm:$0xff]  ;;  %v5594_v10 = vld [vmem:[%s10410_s4 + $0x18] sm:$0xff] }
   0x4   :  { %v5592_v11 = vld [vmem:[%s10410_s4 + $0x8] sm:$0xff]  ;;  %v5591_v12 = vld [vmem:[%s10410_s4] sm:$0xff]  ;;  %v5645_v13 = vld [vmem:[%s10411_s6 + $0x10] sm:$0xff]  ;;  %10635 = vst [vmem:[#allocation2_spill] sm:$0xff] %v6735_v17  ;;  %v86_v19 = vsub.s32 0, %v6735_v17  ;;  %v169_v21 = vsub.s32 1, %v6735_v17 }
   0x5   :  { %v5643_v14 = vld [vmem:[%s10411_s6] sm:$0xff]  ;;  %v94_v22 = vsub.s32 4, %v6735_v17  ;;  %v177_v23 = vsub.s32 5, %v6735_v17  ;;  %v173_v33 = vsub.s32 3, %v6735_v17  ;;  %v90_v35 = vsub.s32 2, %v6735_v17 }
   0x6   :  { %6477 = vset.pattern.permute.xlu0 %v6633_v3  ;;  %6479 = vset.pattern.permute.xlu1 %v6633_v3  ;;  %v32_v16 = vld [vmem:[%s10412_s0] sm:$0x3f]  ;;  %v10428_v17 = vmov 683565275  }
   0x7   :  { %164 = vperm.xlu0 %6477, %v42_v1   ;;  %160 = vperm.xlu1 %6479, %v41_v2   ;;  %v33_v18 = vfloor.f32 %v32_v16 }
   0x9   :  { %v34_v20 = vsub.f32 %v32_v16, %v33_v18 }
   0xb   :  { %6480 = vset.pattern.permute.xlu1 %v6632_v0  ;;  %156 = vperm.xlu0 %6477, %v40_v4   ;;  %v87_v24 = vrot.slane %v34_v20, %v86_v19  ;;  %v170_v25 = vrot.slane %v34_v20, %v169_v21  ;;  %v95_v26 = vrot.slane %v34_v20, %v94_v22 }
   0xc   :  { %70 = vperm.xlu1 %6480, %v40_v4   ;;  %v178_v27 = vrot.slane %v34_v20, %v177_v23  ;;  %v174_v41 = vrot.slane %v34_v20, %v173_v33  ;;  %v91_v44 = vrot.slane %v34_v20, %v90_v35 }
   0xd   :  { %v6741_v30 = vrot.slane %v87_v24, %v86_v19  ;;  %v6743_v31 = vrot.slane %v170_v25, %v169_v21  ;;  %v6745_v32 = vrot.slane %v95_v26, %v86_v19 }
   0xe   :  { %v6748_v34 = vrot.slane %v178_v27, %v169_v21  ;;  %v6759_v48 = vrot.slane %v174_v41, %v169_v21  ;;  %v6761_v49 = vrot.slane %v91_v44, %v86_v19 }
   0xf   :  { %152 = vperm.xlu0 %6477, %v39_v5  }
  0x10   :  { %65 = vperm.xlu1 %6480, %v39_v5  }
  0x13   :  { %148 = vperm.xlu0 %6477, %v38_v6  }
  0x14   :  { %60 = vperm.xlu1 %6480, %v38_v6  }
  0x17   :  { %144 = vperm.xlu0 %6477, %v37_v7  }
  0x18   :  { %55 = vperm.xlu1 %6480, %v37_v7  }
  0x1b   :  { %140 = vperm.xlu0 %6477, %v36_v8  }
  0x1c   :  { %50 = vperm.xlu1 %6480, %v36_v8  }
  0x1f   :  { %136 = vperm.xlu0 %6477, %v35_v9  }
  0x20   :  { %45 = vperm.xlu1 %6480, %v35_v9  }
  0x23   :  { %6481 = vset.pattern.permute.xlu0 %v6632_v0 }
  0x24   :  { %5612 = vperm.xlu1 %6480, %v5594_v10  }
  0x28   :  { %5602 = vperm.xlu1 %6480, %v5592_v11  }
  0x2c   :  { %5597 = vperm.xlu1 %6480, %v5591_v12  }
  0x30   :  { %5659 = vperm.xlu1 %6480, %v5645_v13  }
  0x34   :  { %5649 = vperm.xlu1 %6480, %v5643_v14  }
  0x7d   :  { %v76_v28 = vpop.permute.xlu1 %75  ;;  %v81_v29 = vpop.permute.xlu0 %80 }
  0x7e   :  { %v129_v38 = vmul.f32 %v6741_v30, %v76_v28  ;;  %v131_v40 = vmul.f32 %v6745_v32, %v76_v28  ;;  %v132_v18 = vmul.f32 %v6741_v30, %v81_v29  ;;  %v133_v19 = vmul.f32 %v6761_v49, %v81_v29 }
  0x7f   :  { %v130_v22 = vmul.f32 %v6761_v49, %v76_v28  ;;  %v134_v23 = vmul.f32 %v6745_v32, %v81_v29 }
  0x82   :  { %v165_v36 = vpop.permute.xlu0 %164  ;;  %v161_v37 = vpop.permute.xlu1 %160 }
  0x83   :  { %v212_v39 = vmul.f32 %v6743_v31, %v161_v37  ;;  %v214_v42 = vmul.f32 %v6748_v34, %v161_v37  ;;  %v215_v10 = vmul.f32 %v6743_v31, %v165_v36  ;;  %v216_v11 = vmul.f32 %v6759_v48, %v165_v36 }
  0x84   :  { %v217_v16 = vmul.f32 %v6748_v34, %v165_v36  ;;  %v213_v20 = vmul.f32 %v6759_v48, %v161_v37 }
  0x85   :  { %v6755_v43 = vadd.f32 %v212_v39, %v129_v38  ;;  %v6757_v45 = vadd.f32 %v214_v42, %v131_v40  ;;  %v6803_v24 = vadd.f32 %v215_v10, %v132_v18  ;;  %v6805_v25 = vadd.f32 %v216_v11, %v133_v19 }
  0x86   :  { %v157_v46 = vpop.permute.xlu0 %156  ;;  %v6811_v33 = vadd.f32 %v217_v16, %v134_v23  ;;  %v6813_v35 = vadd.f32 %v213_v20, %v130_v22 }
  0x87   :  { %10636 = vst [vmem:[#allocation3_spill] sm:$0xff] %v6755_v43  ;;  %10637 = vst [vmem:[#allocation4_spill] sm:$0xff] %v6757_v45  ;;  %v71_v47 = vpop.permute.xlu1 %70  ;;  %v209_v50 = vmul.f32 %v6743_v31, %v157_v46  ;;  %v210_v51 = vmul.f32 %v6759_v48, %v157_v46  ;;  %v211_v56 = vmul.f32 %v6748_v34, %v157_v46  ;;  %v2429_v37 = vand.u32 2139095040, %v6803_v24 }
  0x88   :  { %v126_v52 = vmul.f32 %v6741_v30, %v71_v47  ;;  %v127_v53 = vmul.f32 %v6761_v49, %v71_v47  ;;  %v128_v57 = vmul.f32 %v6745_v32, %v71_v47  ;;  %10645 = vst [vmem:[#allocation12_spill] sm:$0xff] %v6805_v25  ;;  %10648 = vst [vmem:[#allocation15_spill] sm:$0xff] %v6811_v33  ;;  %v2533_v38 = vand.u32 2139095040, %v6805_v25 }
  0x89   :  { %10649 = vst [vmem:[#allocation16_spill] sm:$0xff] %v6813_v35  ;;  %v2637_v29 = vand.u32 2139095040, %v6811_v33  ;;  %v2117_v39 = vand.u32 2139095040, %v6755_v43  ;;  %v2221_v41 = vand.u32 2139095040, %v6813_v35  ;;  %v2325_v44 = vand.u32 2139095040, %v6757_v45 }
  0x8a   :  { %v6767_v54 = vadd.f32 %v209_v50, %v126_v52  ;;  %v6769_v55 = vadd.f32 %v210_v51, %v127_v53  ;;  %v153_v58 = vpop.permute.xlu0 %152  ;;  %v6773_v60 = vadd.f32 %v211_v56, %v128_v57  ;;  %v2430_v51 = vshrl.u32 %v2429_v37, 23 }
  0x8b   :  { %v66_v59 = vpop.permute.xlu1 %65  ;;  %v206_v61 = vmul.f32 %v6743_v31, %v153_v58  ;;  %v207_v62 = vmul.f32 %v6759_v48, %v153_v58  ;;  %v208_v63 = vmul.f32 %v6748_v34, %v153_v58  ;;  %v2534_v52 = vshrl.u32 %v2533_v38, 23 }
  0x8c   :  { %10638 = vst [vmem:[#allocation5_spill] sm:$0xff] %v6767_v54  ;;  %10639 = vst [vmem:[#allocation6_spill] sm:$0xff] %v6769_v55  ;;  %v123_v0 = vmul.f32 %v6741_v30, %v66_v59  ;;  %v124_v1 = vmul.f32 %v6761_v49, %v66_v59  ;;  %v125_v2 = vmul.f32 %v6745_v32, %v66_v59  ;;  %v2638_v56 = vshrl.u32 %v2637_v29, 23 }
  0x8d   :  { %10640 = vst [vmem:[#allocation7_spill] sm:$0xff] %v6773_v60  ;;  %v2118_v57 = vshrl.u32 %v2117_v39, 23  ;;  %v1909_v11 = vand.u32 2139095040, %v6769_v55  ;;  %v2013_v29 = vand.u32 2139095040, %v6773_v60  ;;  %v10669_v60 = vmov 1326507024  }
  0x8e   :  { %v6781_v3 = vadd.f32 %v206_v61, %v123_v0  ;;  %v6783_v4 = vadd.f32 %v207_v62, %v124_v1  ;;  %v6785_v5 = vadd.f32 %v208_v63, %v125_v2  ;;  %v149_v6 = vpop.permute.xlu0 %148  ;;  %v2222_v62 = vshrl.u32 %v2221_v41, 23 }
  0x8f   :  { %v61_v7 = vpop.permute.xlu1 %60  ;;  %v203_v8 = vmul.f32 %v6743_v31, %v149_v6  ;;  %v204_v12 = vmul.f32 %v6759_v48, %v149_v6  ;;  %v205_v13 = vmul.f32 %v6748_v34, %v149_v6  ;;  %v2326_v63 = vshrl.u32 %v2325_v44, 23 }
  0x90   :  { %10641 = vst [vmem:[#allocation8_spill] sm:$0xff] %v6781_v3  ;;  %10642 = vst [vmem:[#allocation9_spill] sm:$0xff] %v6783_v4  ;;  %v120_v9 = vmul.f32 %v6741_v30, %v61_v7  ;;  %v121_v14 = vmul.f32 %v6761_v49, %v61_v7  ;;  %v122_v15 = vmul.f32 %v6745_v32, %v61_v7  ;;  %v6129_v1 = vadd.s32 4294967169, %v2430_v51 }
  0x91   :  { %10643 = vst [vmem:[#allocation10_spill] sm:$0xff] %v6785_v5  ;;  %v6133_v2 = vadd.s32 4294967169, %v2534_v52  ;;  %v6137_v7 = vadd.s32 4294967169, %v2638_v56  ;;  %v2014_v52 = vshrl.u32 %v2013_v29, 23 }
  0x92   :  { %v6799_v21 = vadd.f32 %v203_v8, %v120_v9  ;;  %v6807_v26 = vadd.f32 %v204_v12, %v121_v14  ;;  %v6809_v27 = vadd.f32 %v205_v13, %v122_v15  ;;  %v145_v36 = vpop.permute.xlu0 %144  ;;  %v6117_v8 = vadd.s32 4294967169, %v2118_v57 }
  0x93   :  { %v56_v28 = vpop.permute.xlu1 %55  ;;  %v200_v40 = vmul.f32 %v6743_v31, %v145_v36  ;;  %v201_v42 = vmul.f32 %v6759_v48, %v145_v36  ;;  %v202_v46 = vmul.f32 %v6748_v34, %v145_v36  ;;  %v1805_v9 = vand.u32 2139095040, %v6767_v54 }
  0x94   :  { %10644 = vst [vmem:[#allocation11_spill] sm:$0xff] %v6799_v21  ;;  %10646 = vst [vmem:[#allocation13_spill] sm:$0xff] %v6807_v26  ;;  %v117_v47 = vmul.f32 %v6741_v30, %v56_v28  ;;  %v118_v50 = vmul.f32 %v6761_v49, %v56_v28  ;;  %v119_v53 = vmul.f32 %v6745_v32, %v56_v28  ;;  %v6121_v14 = vadd.s32 4294967169, %v2222_v62 }
  0x95   :  { %10647 = vst [vmem:[#allocation14_spill] sm:$0xff] %v6809_v27  ;;  %v6125_v15 = vadd.s32 4294967169, %v2326_v63  ;;  %v2436_v18 = vadd.s32 1, %v6129_v1  ;;  %v2540_v19 = vadd.s32 1, %v6133_v2  ;;  %v2644_v23 = vadd.s32 1, %v6137_v7 }
  0x96   :  { %v6827_v58 = vadd.f32 %v200_v40, %v117_v47  ;;  %v6829_v59 = vadd.f32 %v201_v42, %v118_v50  ;;  %v141_v61 = vpop.permute.xlu0 %140  ;;  %v6831_v0 = vadd.f32 %v202_v46, %v119_v53  ;;  %v2124_v36 = vadd.s32 1, %v6117_v8 }
  0x97   :  { %v51_v6 = vpop.permute.xlu1 %50  ;;  %v197_v10 = vmul.f32 %v6743_v31, %v141_v61  ;;  %v198_v12 = vmul.f32 %v6759_v48, %v141_v61  ;;  %v199_v13 = vmul.f32 %v6748_v34, %v141_v61  ;;  %v1806_v37 = vshrl.u32 %v1805_v9, 23 }
  0x98   :  { %10650 = vst [vmem:[#allocation17_spill] sm:$0xff] %v6827_v58  ;;  %10651 = vst [vmem:[#allocation18_spill] sm:$0xff] %v6829_v59  ;;  %v114_v16 = vmul.f32 %v6741_v30, %v51_v6  ;;  %v115_v20 = vmul.f32 %v6761_v49, %v51_v6  ;;  %v116_v22 = vmul.f32 %v6745_v32, %v51_v6  ;;  %v1910_v28 = vshrl.u32 %v1909_v11, 23 }
  0x99   :  { %10652 = vst [vmem:[#allocation19_spill] sm:$0xff] %v6831_v0  ;;  %vm2437_vm0 = vcmp.gt.s32.totalorder %v2436_v18, 0  ;;  %v2228_v42 = vadd.s32 1, %v6121_v14  ;;  %v2332_v44 = vadd.s32 1, %v6125_v15  ;;  %vm2541_vm1 = vcmp.gt.s32.totalorder %v2540_v19, 0 }
  0x9a   :  { %v6841_v38 = vadd.f32 %v197_v10, %v114_v16  ;;  %v6844_v39 = vadd.f32 %v198_v12, %v115_v20  ;;  %v6846_v40 = vadd.f32 %v199_v13, %v116_v22  ;;  %v137_v41 = vpop.permute.xlu0 %136  ;;  %vm2645_vm2 = vcmp.gt.s32.totalorder %v2644_v23, 0 }
  0x9b   :  { %v46_v46 = vpop.permute.xlu1 %45  ;;  %vm2125_vm3 = vcmp.gt.s32.totalorder %v2124_v36, 0  ;;  %v194_v47 = vmul.f32 %v6743_v31, %v137_v41  ;;  %v6105_v50 = vadd.s32 4294967169, %v1806_v37  ;;  %v6109_v51 = vadd.s32 4294967169, %v1910_v28 }
  0x9c   :  { %10653 = vst [vmem:[#allocation20_spill] sm:$0xff] %v6841_v38  ;;  %10654 = vst [vmem:[#allocation21_spill] sm:$0xff] %v6844_v39  ;;  %v2438_v53 = vsel %vm2437_vm0, %v2436_v18, 0  ;;  %v195_v56 = vmul.f32 %v6759_v48, %v137_v41  ;;  %v196_v57 = vmul.f32 %v6748_v34, %v137_v41  ;;  %v111_v61 = vmul.f32 %v6741_v30, %v46_v46 }
  0x9d   :  { %10655 = vst [vmem:[#allocation22_spill] sm:$0xff] %v6846_v40  ;;  %v2542_v62 = vsel %vm2541_vm1, %v2540_v19, 0  ;;  %v2646_v63 = vsel %vm2645_vm2, %v2644_v23, 0  ;;  %v2126_v1 = vsel %vm2125_vm3, %v2124_v36, 0  ;;  %vm2229_vm4 = vcmp.gt.s32.totalorder %v2228_v42, 0 }
  0x9e   :  { %vm2333_vm5 = vcmp.gt.s32.totalorder %v2332_v44, 0  ;;  %v112_v2 = vmul.f32 %v6761_v49, %v46_v46  ;;  %v113_v6 = vmul.f32 %v6745_v32, %v46_v46  ;;  %v6854_v31 = vadd.f32 %v194_v47, %v111_v61 }
  0x9f   :  { %v1812_v7 = vadd.s32 1, %v6105_v50  ;;  %v1916_v8 = vadd.s32 1, %v6109_v51  ;;  %v6113_v9 = vadd.s32 4294967169, %v2014_v52  ;;  %v1493_v48 = vand.u32 2139095040, %v6781_v3 }
  0xa0   :  { %10656 = vst [vmem:[#allocation23_spill] sm:$0xff] %v6854_v31  ;;  %v1597_v34 = vand.u32 2139095040, %v6783_v4  ;;  %v6858_v10 = vadd.f32 %v195_v56, %v112_v2  ;;  %v6860_v30 = vadd.f32 %v196_v57, %v113_v6  ;;  %v6862_v11 = vshrl.u32 %v2438_v53, 5 }
  0xa1   :  { %v6864_v12 = vand.u32 31, %v2438_v53  ;;  %v2544_v49 = vand.u32 31, %v2542_v62  ;;  %v2230_v13 = vsel %vm2229_vm4, %v2228_v42, 0  ;;  %v6866_v32 = vand.u32 31, %v2646_v63 }
  0xa2   :  { %10657 = vst [vmem:[#allocation24_spill] sm:$0xff] %v6858_v10  ;;  %10658 = vst [vmem:[#allocation25_spill] sm:$0xff] %v6860_v30  ;;  %v6868_v14 = vand.u32 31, %v2126_v1  ;;  %v2334_v15 = vsel %vm2333_vm5, %v2332_v44, 0  ;;  %v1701_v16 = vand.u32 2139095040, %v6785_v5  ;;  %vm1813_vm6 = vcmp.gt.s32.totalorder %v1812_v7, 0 }
  0xa3   :  { %vm1917_vm7 = vcmp.gt.s32.totalorder %v1916_v8, 0  ;;  %v2020_v18 = vadd.s32 1, %v6113_v9  ;;  %v1494_v19 = vshrl.u32 %v1493_v48, 23  ;;  %v6872_v20 = vshrl.u32 %v2542_v62, 5 }
  0xa4   :  { %v6874_v22 = vshrl.u32 %v2646_v63, 5  ;;  %v6876_v23 = vand.u32 31, %v2230_v13  ;;  %v1598_v36 = vshrl.u32 %v1597_v34, 23  ;;  %v6879_v37 = vsub.s32 32, %v6864_v12 }
  0xa5   :  { %v2545_v28 = vsub.s32 32, %v2544_v49  ;;  %v6881_v29 = vshrl.u32 %v2126_v1, 5  ;;  %v6883_v41 = vand.u32 31, %v2334_v15  ;;  %v6886_v42 = vsub.s32 32, %v6866_v32 }
  0xa6   :  { %v1814_v44 = vsel %vm1813_vm6, %v1812_v7, 0  ;;  %v1918_v46 = vsel %vm1917_vm7, %v1916_v8, 0  ;;  %v10421_v47 = vand.u32 2147483647, %v6805_v25  ;;  %v6890_v50 = vsub.s32 32, %v6868_v14 }
  0xa7   :  { %vm2021_vm8 = vcmp.gt.s32.totalorder %v2020_v18, 0  ;;  %v6093_v51 = vadd.s32 4294967169, %v1494_v19  ;;  %v1702_v52 = vshrl.u32 %v1701_v16, 23  ;;  %v6892_v53 = vshrl.u32 %v2230_v13, 5 }
  0xa8   :  { %v6895_v56 = vsub.s32 32, %v6876_v23  ;;  %v6897_v57 = vshrl.u32 %v2334_v15, 5  ;;  %v6097_v61 = vadd.s32 4294967169, %v1598_v36  ;;  %v6900_v62 = vsub.s32 32, %v6883_v41 }
  0xa9   :  { %v6902_v63 = vshrl.u32 %v1814_v44, 5  ;;  %v6904_v1 = vand.u32 31, %v1814_v44  ;;  %v6906_v2 = vand.u32 31, %v1918_v46  ;;  %v6908_v6 = vshrl.u32 %v1918_v46, 5 }
  0xaa   :  { %v2022_v7 = vsel %vm2021_vm8, %v2020_v18, 0  ;;  %v2537_v8 = vand.u32 8388607, %v10421_v47  ;;  %v10432_v9 = vmov 2475754826   ;;  %v1500_v34 = vadd.s32 1, %v6093_v51 }
  0xab   :  { %10659 = vst [vmem:[#allocation26_spill] sm:$0xff] %v6902_v63  ;;  %10660 = vst [vmem:[#allocation27_spill] sm:$0xff] %v6904_v1  ;;  %v2548_v48 = vshrl.u32 %v10432_v9, %v2545_v28  ;;  %v6101_v13 = vadd.s32 4294967169, %v1702_v52  ;;  %v10434_v15 = vmov 2131351028   ;;  %v1604_v44 = vadd.s32 1, %v6097_v61 }
  0xac   :  { %10661 = vst [vmem:[#allocation28_spill] sm:$0xff] %v6908_v6  ;;  %v2551_v16 = vshrl.u32 %v10434_v15, %v2545_v28  ;;  %v10424_v19 = vmov 2102212464   ;;  %v2547_v46 = vshll.u32 %v10428_v17, %v2544_v49  ;;  %v2550_v18 = vshll.u32 %v10432_v9, %v2544_v49 }
  0xad   :  { %v2554_v36 = vshrl.u32 %v10424_v19, %v2545_v28  ;;  %v2553_v30 = vshll.u32 %v10434_v15, %v2544_v49  ;;  %v6919_v47 = vsub.s32 32, %v6904_v1  ;;  %v6922_v51 = vsub.s32 32, %v6906_v2 }
  0xae   :  { %v6924_v52 = vshrl.u32 %v2022_v7, 5  ;;  %v6926_v10 = vand.u32 31, %v2022_v7  ;;  %v2538_v31 = vor.u32 8388608, %v2537_v8  ;;  %v2549_v19 = vor.u32 %v2548_v48, %v2547_v46 }
  0xaf   :  { %10662 = vst [vmem:[#allocation29_spill] sm:$0xff] %v6919_v47  ;;  %v2552_v61 = vor.u32 %v2551_v16, %v2550_v18  ;;  %v2555_v40 = vor.u32 %v2554_v36, %v2553_v30  ;;  %v10664_v39 = vmov 2102212464   ;;  %v10444_v3 = vmov 920167782  }
  0xb0   :  { %10663 = vst [vmem:[#allocation30_spill] sm:$0xff] %v6924_v52  ;;  %v2556_v17 = vshll.u32 %v10664_v39, %v2544_v49  ;;  %v2557_v9 = vshrl.u32 %v10444_v3, %v2545_v28  ;;  %v2559_v15 = vshll.u32 %v10444_v3, %v2544_v49  ;;  %v10442_v38 = vmov 1326507024  }
  0xb1   :  { %v2560_v5 = vshrl.u32 %v10442_v38, %v2545_v28  ;;  %vm1501_vm9 = vcmp.gt.s32.totalorder %v1500_v34, 0  ;;  %vm1605_vm10 = vcmp.gt.s32.totalorder %v1604_v44, 0  ;;  %v10665_v4 = vmov 683565275  }
  0xb2   :  { %v2546_v63 = vshrl.u32 %v10665_v4, %v2545_v28  ;;  %vm2562_vm11 = vcmp.lt.s32.totalorder %v6872_v20, 1  ;;  %v2558_v7 = vor.u32 %v2557_v9, %v2556_v17  ;;  %vm2563_vm12 = vcmp.lt.s32.totalorder %v6872_v20, 2 }
  0xb3   :  { %v2561_v8 = vor.u32 %v2560_v5, %v2559_v15  ;;  %vm2565_vm13 = vcmp.lt.s32.totalorder %v6872_v20, 4  ;;  %vm2564_vm14 = vcmp.lt.s32.totalorder %v6872_v20, 3  ;;  %v2570_v48 = vsel %vm2562_vm11, %v2549_v19, %v2552_v61 }
  0xb4   :  { %v2567_v30 = vsel %vm2565_vm13, %v2555_v40, 2102212464  ;;  %v2574_v49 = vsel %vm2562_vm11, %v2552_v61, %v2555_v40  ;;  %v2566_v16 = vsel %vm2562_vm11, %v2546_v63, %v2549_v19  ;;  %v2571_v36 = vsel %vm2565_vm13, %v2558_v7, 920167782 }
  0xb5   :  { %v2575_v46 = vsel %vm2565_vm13, %v2561_v8, 1326507024  ;;  %v2578_v18 = vshll.u32 %v2538_v31, 8  ;;  %v2568_v38 = vsel %vm2564_vm14, %v2552_v61, %v2567_v30  ;;  %v2572_v3 = vsel %vm2564_vm14, %v2555_v40, %v2571_v36 }
  0xb6   :  { %v2576_v28 = vsel %vm2564_vm14, %v2558_v7, %v2575_v46  ;;  %v10450_v1 = vand.u32 2147483647, %v6811_v33  ;;  %v1708_v17 = vadd.s32 1, %v6101_v13  ;;  %v1181_v5 = vand.u32 2139095040, %v6799_v21 }
  0xb7   :  { %v2573_v9 = vsel %vm2563_vm12, %v2570_v48, %v2572_v3  ;;  %v2577_v15 = vsel %vm2563_vm12, %v2574_v49, %v2576_v28  ;;  %v1502_v40 = vsel %vm1501_vm9, %v1500_v34, 0  ;;  %v1606_v31 = vsel %vm1605_vm10, %v1604_v44, 0 }
  0xb8   :  { %v6943_v47 = vmul.u32.u64.low %v2578_v18, %v2577_v15  ;;  %v6944_v0 = vmul.u32.u64.high %v2578_v18, %v2577_v15, %v6943_v47  ;;  %v6946_v63 = vmul.u32.u64.low %v2578_v18, %v2573_v9  ;;  %v6947_v19 = vmul.u32.u64.high %v2578_v18, %v2573_v9, %v6946_v63 }
  0xb9   :  { %v2569_v13 = vsel %vm2563_vm12, %v2566_v16, %v2568_v38  ;;  %v2641_v3 = vand.u32 8388607, %v10450_v1  ;;  %v2651_v61 = vshll.u32 %v10665_v4, %v6866_v32  ;;  %v10666_v7 = vmov 2475754826  }
  0xba   :  { %v2652_v47 = vshrl.u32 %v10666_v7, %v6886_v42  ;;  %v2654_v8 = vshll.u32 %v10666_v7, %v6866_v32  ;;  %v10667_v30 = vmov 2131351028   ;;  %vm1709_vm15 = vcmp.gt.s32.totalorder %v1708_v17, 0 }
  0xbb   :  { %v2655_v34 = vshrl.u32 %v10667_v30, %v6886_v42  ;;  %v2657_v20 = vshll.u32 %v10667_v30, %v6866_v32  ;;  %v2658_v38 = vshrl.u32 %v10664_v39, %v6886_v42  ;;  %v2660_v44 = vshll.u32 %v10664_v39, %v6866_v32 }
  0xbc   :  { %v10668_v48 = vmov 920167782   ;;  %v1182_v16 = vshrl.u32 %v1181_v5, 23  ;;  %vm2587_vm0 = vc.u32 %v6944_v0, %v6946_v63  ;;  %v2588_v36 = vadd.s32 1, %v6947_v19 }
  0xbd   :  { %v2661_v49 = vshrl.u32 %v10668_v48, %v6886_v42  ;;  %v2653_v46 = vor.u32 %v2652_v47, %v2651_v61  ;;  %v2585_v28 = vmul.u32 %v2578_v18, %v2569_v13  ;;  %v2656_v9 = vor.u32 %v2655_v34, %v2654_v8 }
  0xbe   :  { %v2659_v15 = vor.u32 %v2658_v38, %v2657_v20  ;;  %v2589_v21 = vsel %vm2587_vm0, %v2588_v36, %v6947_v19  ;;  %v2642_v54 = vor.u32 8388608, %v2641_v3  ;;  %v2663_v52 = vshll.u32 %v10668_v48, %v6866_v32 }
  0xbf   :  { %v2662_v1 = vor.u32 %v2661_v49, %v2660_v44  ;;  %v2664_v59 = vshrl.u32 %v10669_v60, %v6886_v42  ;;  %v2590_v5 = vadd.s32 %v2589_v21, %v2585_v28  ;;  %v2650_v6 = vshrl.u32 %v10665_v4, %v6886_v42 }
  0xc0   :  { %vm2666_vm1 = vcmp.lt.s32.totalorder %v6874_v22, 1  ;;  %vm2669_vm2 = vcmp.lt.s32.totalorder %v6874_v22, 4  ;;  %vm2668_vm3 = vcmp.lt.s32.totalorder %v6874_v22, 3  ;;  %vm2667_vm4 = vcmp.lt.s32.totalorder %v6874_v22, 2 }
  0xc1   :  { %v2665_v18 = vor.u32 %v2664_v59, %v2663_v52  ;;  %v2674_v19 = vsel %vm2666_vm1, %v2653_v46, %v2656_v9  ;;  %v2675_v13 = vsel %vm2669_vm2, %v2662_v1, 920167782  ;;  %v2591_v3 = vadd.s32 536870912, %v2590_v5 }
  0xc2   :  { %v2676_v21 = vsel %vm2668_vm3, %v2659_v15, %v2675_v13  ;;  %v2678_v32 = vsel %vm2666_vm1, %v2656_v9, %v2659_v15  ;;  %v2671_v42 = vsel %vm2669_vm2, %v2659_v15, 2102212464  ;;  %v2682_v52 = vshll.u32 %v2642_v54, 8 }
  0xc3   :  { %v2677_v61 = vsel %vm2667_vm4, %v2674_v19, %v2676_v21  ;;  %v2679_v59 = vsel %vm2669_vm2, %v2665_v18, 1326507024  ;;  %v6994_v47 = vand.u32 31, %v1502_v40  ;;  %v6996_v8 = vand.u32 31, %v1606_v31 }
  0xc4   :  { %v6998_v34 = vshrl.u32 %v2591_v3, 30  ;;  %v2680_v20 = vsel %vm2668_vm3, %v2662_v1, %v2679_v59  ;;  %v2670_v38 = vsel %vm2666_vm1, %v2650_v6, %v2653_v46  ;;  %v2672_v28 = vsel %vm2668_vm3, %v2656_v9, %v2671_v42 }
  0xc5   :  { %10670 = vst [vmem:[#allocation31_spill] sm:$0xff] %v6994_v47  ;;  %v2681_v44 = vsel %vm2667_vm4, %v2678_v32, %v2680_v20  ;;  %v7006_v49 = vmul.u32.u64.low %v2682_v52, %v2677_v61  ;;  %v7007_v36 = vmul.u32.u64.high %v2682_v52, %v2677_v61, %v7006_v49  ;;  %v7017_v1 = vsub.s32 32, %v6926_v10 }
  0xc6   :  { %v2593_v54 = vshll.u32 %v6998_v34, 30  ;;  %v7013_v15 = vmul.u32.u64.low %v2682_v52, %v2681_v44  ;;  %v7014_v18 = vmul.u32.u64.high %v2682_v52, %v2681_v44, %v7013_v15  ;;  %v7019_v19 = vshrl.u32 %v1502_v40, 5 }
  0xc7   :  { %v7021_v6 = vshrl.u32 %v1606_v31, 5  ;;  %v1710_v46 = vsel %vm1709_vm15, %v1708_v17, 0  ;;  %v6081_v13 = vadd.s32 4294967169, %v1182_v16  ;;  %v10460_v32 = vand.u32 2147483647, %v6803_v24 }
  0xc8   :  { %10671 = vst [vmem:[#allocation32_spill] sm:$0xff] %v7019_v19  ;;  %v7025_v21 = vsub.s32 %v2590_v5, %v2593_v54  ;;  %v7029_v9 = vsub.s32 32, %v6994_v47  ;;  %v2673_v40 = vsel %vm2667_vm4, %v2670_v38, %v2672_v28  ;;  %v2692_v31 = vadd.s32 1, %v7007_v36 }
  0xc9   :  { %10672 = vst [vmem:[#allocation33_spill] sm:$0xff] %v7021_v6  ;;  %v7036_v61 = vsub.s32 32, %v6996_v8  ;;  %v7038_v17 = vshrl.u32 %v1710_v46, 5  ;;  %v7040_v16 = vand.u32 31, %v1710_v46  ;;  %v2586_v59 = vadd.s32 %v6946_v63, %v6944_v0 }
  0xca   :  { %10673 = vst [vmem:[#allocation34_spill] sm:$0xff] %v7029_v9  ;;  %v2596_v5 = vsub.s32 0, %v7025_v21  ;;  %vm2691_vm5 = vc.u32 %v7014_v18, %v7006_v49  ;;  %v2444_v22 = vshrl.u32 %v10666_v7, %v6879_v37  ;;  %v2447_v20 = vshrl.u32 %v10667_v30, %v6879_v37 }
  0xcb   :  { %10674 = vst [vmem:[#allocation35_spill] sm:$0xff] %v7036_v61  ;;  %10675 = vst [vmem:[#allocation36_spill] sm:$0xff] %v7038_v17  ;;  %v2689_v44 = vmul.u32 %v2682_v52, %v2673_v40  ;;  %v2433_v54 = vand.u32 8388607, %v10460_v32  ;;  %v2443_v28 = vshll.u32 %v10665_v4, %v6864_v12  ;;  %v2693_v0 = vsel %vm2691_vm5, %v2692_v31, %v7007_v36 }
  0xcc   :  { %v6134_v38 = vmin.u32 %v2596_v5, %v7025_v21  ;;  %v2446_v63 = vshll.u32 %v10666_v7, %v6864_v12  ;;  %v2449_v15 = vshll.u32 %v10667_v30, %v6864_v12  ;;  %v2450_v46 = vshrl.u32 %v10664_v39, %v6879_v37 }
  0xcd   :  { %v2694_v5 = vadd.s32 %v2693_v0, %v2689_v44  ;;  %v2452_v52 = vshll.u32 %v10664_v39, %v6864_v12  ;;  %v2453_v40 = vshrl.u32 %v10668_v48, %v6879_v37  ;;  %v2445_v32 = vor.u32 %v2444_v22, %v2443_v28 }
  0xce   :  { %v2598_v42 = vclz %v6134_v38  ;;  %v2448_v3 = vor.u32 %v2447_v20, %v2446_v63  ;;  %v2455_v36 = vshll.u32 %v10668_v48, %v6864_v12  ;;  %v2456_v31 = vshrl.u32 %v10669_v60, %v6879_v37 }
  0xcf   :  { %v2695_v47 = vadd.s32 536870912, %v2694_v5  ;;  %v2451_v9 = vor.u32 %v2450_v46, %v2449_v15  ;;  %v2454_v17 = vor.u32 %v2453_v40, %v2452_v52  ;;  %v2434_v38 = vor.u32 8388608, %v2433_v54 }
  0xd0   :  { %v6135_v19 = vadd.s32 4294967294, %v2598_v42  ;;  %v2442_v44 = vshrl.u32 %v10665_v4, %v6879_v37  ;;  %v2457_v0 = vor.u32 %v2456_v31, %v2455_v36  ;;  %vm2461_vm6 = vcmp.lt.s32.totalorder %v6862_v11, 4 }
  0xd1   :  { %v7074_v22 = vshrl.u32 %v2695_v47, 30  ;;  %vm2458_vm8 = vcmp.lt.s32.totalorder %v6862_v11, 1  ;;  %v2467_v12 = vsel %vm2461_vm6, %v2454_v17, 920167782  ;;  %vm2459_vm9 = vcmp.lt.s32.totalorder %v6862_v11, 2 }
  0xd2   :  { %vm6136_vm7 = vcmp.lt.s32.totalorder %v6135_v19, 0  ;;  %vm2460_vm10 = vcmp.lt.s32.totalorder %v6862_v11, 3  ;;  %v2466_v42 = vsel %vm2458_vm8, %v2445_v32, %v2448_v3  ;;  %v2470_v47 = vsel %vm2458_vm8, %v2448_v3, %v2451_v9 }
  0xd3   :  { %v2601_v20 = vsel %vm6136_vm7, 0, %v6135_v19  ;;  %v2697_v28 = vshll.u32 %v7074_v22, 30  ;;  %v2463_v15 = vsel %vm2461_vm6, %v2451_v9, 2102212464  ;;  %v2468_v19 = vsel %vm2460_vm10, %v2451_v9, %v2467_v12 }
  0xd4   :  { %v2602_v37 = vsub.s32 32, %v2601_v20  ;;  %v2606_v54 = vsub.s32 4294967266, %v2601_v20  ;;  %v2603_v63 = vshll.u32 %v7025_v21, %v2601_v20  ;;  %v2471_v46 = vsel %vm2461_vm6, %v2457_v0, 1326507024 }
  0xd5   :  { %v7093_v36 = vsub.s32 %v2694_v5, %v2697_v28  ;;  %v2472_v31 = vsel %vm2460_vm10, %v2454_v17, %v2471_v46  ;;  %v7097_v6 = vadd.s32 1, %v6081_v13  ;;  %v2462_v21 = vsel %vm2458_vm8, %v2442_v44, %v2445_v32 }
  0xd6   :  { %v2604_v52 = vshrl.u32 %v2586_v59, %v2602_v37  ;;  %v2607_v40 = vadd.s32 127, %v2606_v54  ;;  %v2473_v20 = vsel %vm2459_vm9, %v2470_v47, %v2472_v31  ;;  %v2474_v61 = vshll.u32 %v2434_v38, 8 }
  0xd7   :  { %v2700_v0 = vsub.s32 0, %v7093_v36  ;;  %v2464_v59 = vsel %vm2460_vm10, %v2448_v3, %v2463_v15  ;;  %v2616_v5 = vsub.s32 4, %v6998_v34  ;;  %v2469_v13 = vsel %vm2459_vm9, %v2466_v42, %v2468_v19 }
  0xd8   :  { %v2605_v9 = vor.u32 %v2604_v52, %v2603_v63  ;;  %v2608_v12 = vshll.u32 %v2607_v40, 23  ;;  %v7109_v17 = vmul.u32.u64.low %v2474_v61, %v2473_v20  ;;  %v7110_v37 = vmul.u32.u64.high %v2474_v61, %v2473_v20, %v7109_v17 }
  0xd9   :  { %v10676_v32 = vand.u32 2139095040, %v6807_v26  ;;  %v6138_v54 = vmin.u32 %v2700_v0, %v7093_v36  ;;  %v10471_v28 = vand.u32 2147483647, %v6813_v35  ;;  %v10677_v47 = vand.u32 2139095040, %v6809_v27 }
  0xda   :  { %v2609_v38 = vor.u32 4788187, %v2608_v12  ;;  %vm2532_vm11 = vcmp.lt.s32.totalorder %v6805_v25, 0  ;;  %v2612_v63 = vcvt.s32.f32 %v2605_v9  ;;  %v2465_v42 = vsel %vm2459_vm9, %v2462_v21, %v2464_v59 }
  0xdb   :  { %v7114_v44 = vshrl.u32 %v10676_v32, 23  ;;  %v7120_v3 = vshrl.u32 %v10677_v47, 23  ;;  %v2702_v19 = vclz %v6138_v54  ;;  %v7130_v40 = vsub.s32 32, %v7040_v16 }
  0xdc   :  { %v2610_v15 = vand.u32 2147483647, %v2609_v38  ;;  %v7125_v46 = vmul.u32.u64.low %v2474_v61, %v2469_v13  ;;  %v7126_v52 = vmul.u32.u64.high %v2474_v61, %v2469_v13, %v7125_v46  ;;  %v10678_v31 = vand.u32 2147483647, %v6805_v25 }
  0xdd   :  { %v2617_v11 = vsel %vm2532_vm11, %v2616_v5, %v6998_v34  ;;  %v2690_v21 = vadd.s32 %v7006_v49, %v7014_v18  ;;  %v6139_v12 = vadd.s32 4294967294, %v2702_v19  ;;  %v2481_v0 = vmul.u32 %v2474_v61, %v2465_v42 }
  0xde   :  { %vm7134_vm12 = vcmp.le.f32.partialorder %v10678_v31, 0.7853982  ;;  %v2613_v9 = vmul.f32 %v2612_v63, %v2610_v15  ;;  %v2225_v59 = vand.u32 8388607, %v10471_v28  ;;  %v2235_v13 = vshll.u32 %v10665_v4, %v6876_v23 }
  0xdf   :  { %v2236_v17 = vshrl.u32 %v10666_v7, %v6895_v56  ;;  %v2238_v32 = vshll.u32 %v10666_v7, %v6876_v23  ;;  %v2239_v34 = vshrl.u32 %v10667_v30, %v6895_v56  ;;  %vm6140_vm13 = vcmp.lt.s32.totalorder %v6139_v12, 0 }
  0xe0   :  { %v2614_v5 = vxor.u32 2147483648, %v2613_v9  ;;  %vm2483_vm14 = vc.u32 %v7110_v37, %v7125_v46  ;;  %v2484_v49 = vadd.s32 1, %v7126_v52  ;;  %v2705_v18 = vsel %vm6140_vm13, 0, %v6139_v12 }
  0xe1   :  { %v7156_v61 = vor.u32 %v2236_v17, %v2235_v13  ;;  %v7158_v38 = vor.u32 %v2239_v34, %v2238_v32  ;;  %v2241_v54 = vshll.u32 %v10667_v30, %v6876_v23  ;;  %v2706_v63 = vsub.s32 32, %v2705_v18 }
  0xe2   :  { %v2615_v47 = vsel %vm2532_vm11, %v2614_v5, %v2613_v9  ;;  %v2710_v42 = vsub.s32 4294967266, %v2705_v18  ;;  %v2242_v15 = vshrl.u32 %v10664_v39, %v6895_v56  ;;  %v2707_v31 = vshll.u32 %v7093_v36, %v2705_v18 }
  0xe3   :  { %v2618_v19 = vsel %vm7134_vm12, %v6805_v25, %v2615_v47  ;;  %v2485_v12 = vsel %vm2483_vm14, %v2484_v49, %v7126_v52  ;;  %v2244_v13 = vshll.u32 %v10664_v39, %v6876_v23  ;;  %v2708_v17 = vshrl.u32 %v2690_v21, %v2706_v63 }
  0xe4   :  { %6482 = vcosq.f32 %v2618_v19  ;;  %v2711_v32 = vadd.s32 127, %v2710_v42  ;;  %v2486_v9 = vadd.s32 %v2485_v12, %v2481_v0  ;;  %v2245_v34 = vshrl.u32 %v10668_v48, %v6895_v56 }
  0xe5   :  { %6484 = vsinq.f32 %v2618_v19  ;;  %v2247_v5 = vshll.u32 %v10668_v48, %v6876_v23  ;;  %v2248_v47 = vshrl.u32 %v10669_v60, %v6895_v56  ;;  %v7181_v36 = vsel %vm7134_vm12, 0, %v2617_v11 }
  0xe6   :  { %10681 = vst [vmem:[#allocation37_spill] sm:$0xff] %v7181_v36  ;;  %v2709_v52 = vor.u32 %v2708_v17, %v2707_v31  ;;  %v2712_v49 = vshll.u32 %v2711_v32, 23  ;;  %v2487_v18 = vadd.s32 536870912, %v2486_v9  ;;  %vm1189_vm15 = vcmp.gt.s32.totalorder %v7097_v6, 0 }
  0xe7   :  { %v2243_v21 = vor.u32 %v2242_v15, %v2241_v54  ;;  %v2246_v0 = vor.u32 %v2245_v34, %v2244_v13  ;;  %v2249_v63 = vor.u32 %v2248_v47, %v2247_v5  ;;  %vm2250_vm0 = vcmp.lt.s32.totalorder %v6892_v53, 1 }
  0xe8   :  { %v2713_v42 = vor.u32 4788187, %v2712_v49  ;;  %v2488_v19 = vshrl.u32 %v2487_v18, 30  ;;  %vm2253_vm1 = vcmp.lt.s32.totalorder %v6892_v53, 4  ;;  %v5097_v23 = vand.u32 3, %v7181_v36 }
  0xe9   :  { %v2226_v12 = vor.u32 8388608, %v2225_v59  ;;  %v2258_v20 = vsel %vm2250_vm0, %v7156_v61, %v7158_v38  ;;  %v2259_v11 = vsel %vm2253_vm1, %v2246_v0, 920167782  ;;  %v2716_v15 = vcvt.s32.f32 %v2709_v52 }
  0xea   :  { %v2714_v54 = vand.u32 2147483647, %v2713_v42  ;;  %v2489_v31 = vshll.u32 %v2488_v19, 30  ;;  %vm2252_vm2 = vcmp.lt.s32.totalorder %v6892_v53, 3  ;;  %v2720_v13 = vsub.s32 4, %v7074_v22 }
  0xeb   :  { %vm2251_vm3 = vcmp.lt.s32.totalorder %v6892_v53, 2  ;;  %v2260_v59 = vsel %vm2252_vm2, %v2243_v21, %v2259_v11  ;;  %v2263_v17 = vsel %vm2253_vm1, %v2249_v63, 1326507024  ;;  %v7203_v32 = vsel %vm1189_vm15, %v7097_v6, 0 }
  0xec   :  { %v2717_v34 = vmul.f32 %v2716_v15, %v2714_v54  ;;  %v7205_v5 = vsub.s32 %v2486_v9, %v2489_v31  ;;  %v2261_v47 = vsel %vm2251_vm3, %v2258_v20, %v2260_v59  ;;  %v10682_v52 = vand.u32 2147483647, %v6811_v33 }
  0xed   :  { %vm2636_vm5 = vcmp.lt.s32.totalorder %v6811_v33, 0  ;;  %vm2428_vm6 = vcmp.lt.s32.totalorder %v6803_v24, 0  ;;  %v2266_v18 = vshll.u32 %v2226_v12, 8  ;;  %vm2622_vm7 = vweird.f32 %v6805_v25 }
  0xee   :  { %vm7211_vm4 = vcmp.le.f32.partialorder %v10682_v52, 0.7853982  ;;  %v2718_v6 = vxor.u32 2147483648, %v2717_v34  ;;  %v2492_v9 = vsub.s32 0, %v7205_v5  ;;  %v2262_v63 = vsel %vm2250_vm0, %v7158_v38, %v2243_v21 }
  0xef   :  { %v2264_v42 = vsel %vm2252_vm2, %v2246_v0, %v2263_v17  ;;  %vm5099_vm8 = vcmp.eq.s32.totalorder %v5097_v23, 0  ;;  %v2721_v20 = vsel %vm2636_vm5, %v2720_v13, %v7074_v22  ;;  %vm5102_vm9 = vcmp.eq.s32.totalorder %v5097_v23, 2 }
  0xf0   :  { %v7225_v11 = vmul.u32.u64.low %v2266_v18, %v2261_v47  ;;  %v7226_v54 = vmul.u32.u64.high %v2266_v18, %v2261_v47, %v7225_v11  ;;  %v2719_v12 = vsel %vm2636_vm5, %v2718_v6, %v2717_v34  ;;  %v6130_v15 = vmin.u32 %v2492_v9, %v7205_v5 }
  0xf1   :  { %v2255_v31 = vsel %vm2253_vm1, %v2243_v21, 2102212464  ;;  %v7232_v59 = vpop.eup %6482  ;;  %v2722_v0 = vsel %vm7211_vm4, %v6811_v33, %v2719_v12  ;;  %v2512_v17 = vsub.s32 4, %v2488_v19  ;;  %v2234_v22 = vshrl.u32 %v10665_v4, %v6895_v56 }
  0xf2   :  { %10685 = vst [vmem:[#allocation38_spill] sm:$0xff] %v7232_v59  ;;  %v2265_v13 = vsel %vm2251_vm3, %v2262_v63, %v2264_v42  ;;  %v7241_v47 = vpop.eup %6484  ;;  %v10468_v34 = vxor.u32 2147483648, %v7232_v59  ;;  %v7246_v21 = vsel %vm7211_vm4, 0, %v2721_v20  ;;  %6486 = vcosq.f32 %v2722_v0 }
  0xf3   :  { %10686 = vst [vmem:[#allocation39_spill] sm:$0xff] %v7241_v47  ;;  %10687 = vst [vmem:[#allocation40_spill] sm:$0xff] %v7246_v21  ;;  %v2494_v52 = vclz %v6130_v15  ;;  %v10469_v6 = vxor.u32 2147483648, %v7241_v47  ;;  %6488 = vsinq.f32 %v2722_v0  ;;  %v2254_v56 = vsel %vm2250_vm0, %v2234_v22, %v7156_v61 }
  0xf4   :  { %v2256_v9 = vsel %vm2252_vm2, %v7158_v38, %v2255_v31  ;;  %v5104_v49 = vsel %vm5102_vm9, %v10468_v34, %v7241_v47  ;;  %v7259_v42 = vmul.u32.u64.low %v2266_v18, %v2265_v13  ;;  %v7260_v20 = vmul.u32.u64.high %v2266_v18, %v2265_v13, %v7259_v42 }
  0xf5   :  { %v6131_v63 = vadd.s32 4294967294, %v2494_v52  ;;  %vm5098_vm10 = vcmp.lt.s32.totalorder %v5097_v23, 2  ;;  %v5101_v12 = vsel %vm5099_vm8, %v7232_v59, %v10469_v6  ;;  %v7267_v61 = vand.u32 3, %v7246_v21 }
  0xf6   :  { %v2513_v38 = vsel %vm2428_vm6, %v2512_v17, %v2488_v19  ;;  %v5105_v15 = vsel %vm5098_vm10, %v5101_v12, %v5104_v49  ;;  %v2257_v31 = vsel %vm2251_vm3, %v2254_v56, %v2256_v9  ;;  %v2276_v0 = vadd.s32 1, %v7226_v54 }
  0xf7   :  { %vm6132_vm11 = vcmp.lt.s32.totalorder %v6131_v63, 0  ;;  %v5106_v22 = vsel %vm2622_vm7, nan, %v5105_v15  ;;  %v10688_v13 = vand.u32 2147483647, %v6803_v24  ;;  %v10470_v42 = vand.u32 2147483647, %v6757_v45 }
  0xf8   :  { %v2497_v52 = vsel %vm6132_vm11, 0, %v6131_v63  ;;  %5247 = vmatprep.subr.mxu0 %v5106_v22  ;;  %v2482_v19 = vadd.s32 %v7125_v46, %v7110_v37  ;;  %vm5205_vm13 = vcmp.eq.s32.totalorder %v7267_v61, 2  ;;  %v2273_v9 = vmul.u32 %v2266_v18, %v2257_v31 }
  0xf9   :  { %vm7278_vm12 = vcmp.le.f32.partialorder %v10688_v13, 0.7853982  ;;  %v2498_v53 = vsub.s32 32, %v2497_v52  ;;  %v2502_v17 = vsub.s32 4294967266, %v2497_v52  ;;  %vm2275_vm14 = vc.u32 %v7260_v20, %v7225_v11 }
  0xfa   :  { %v7287_v56 = vsel %vm7278_vm12, 0, %v2513_v38  ;;  %v2340_v49 = vshrl.u32 %v10666_v7, %v6900_v62  ;;  %vm5202_vm15 = vcmp.eq.s32.totalorder %v7267_v61, 0  ;;  %v2499_v63 = vshll.u32 %v7205_v5, %v2497_v52 }
  0xfb   :  { %v2500_v37 = vshrl.u32 %v2482_v19, %v2498_v53  ;;  %v2503_v46 = vadd.s32 127, %v2502_v17  ;;  %v2277_v12 = vsel %vm2275_vm14, %v2276_v0, %v7226_v54  ;;  %vm5201_vm0 = vcmp.lt.s32.totalorder %v7267_v61, 2 }
  0xfc   :  { %v7299_v38 = vadd.s32 3, %v7287_v56  ;;  %v2278_v18 = vadd.s32 %v2277_v12, %v2273_v9  ;;  %v2329_v15 = vand.u32 8388607, %v10470_v42  ;;  %v2343_v31 = vshrl.u32 %v10667_v30, %v6900_v62 }
  0xfd   :  { %vm2726_vm1 = vweird.f32 %v6811_v33  ;;  %v2501_v22 = vor.u32 %v2500_v37, %v2499_v63  ;;  %v2504_v5 = vshll.u32 %v2503_v46, 23  ;;  %v2339_v13 = vshll.u32 %v10665_v4, %v6883_v41 }
  0xfe   :  { %v2349_v54 = vshrl.u32 %v10668_v48, %v6900_v62  ;;  %v2279_v0 = vadd.s32 536870912, %v2278_v18  ;;  %v2338_v52 = vshrl.u32 %v10665_v4, %v6900_v62  ;;  %v2342_v19 = vshll.u32 %v10666_v7, %v6883_v41 }
  0xff   :  { %v2346_v53 = vshrl.u32 %v10664_v39, %v6900_v62  ;;  %v2505_v17 = vor.u32 4788187, %v2504_v5  ;;  %v2341_v9 = vor.u32 %v2340_v49, %v2339_v13  ;;  %v2348_v63 = vshll.u32 %v10664_v39, %v6883_v41  ;;  %v7320_v46 = vpop.eup %6486 }
 0x100   :  { %v2352_v37 = vshrl.u32 %v10669_v60, %v6900_v62  ;;  %10691 = vst [vmem:[#allocation41_spill] sm:$0xff] %v7320_v46  ;;  %v7322_v12 = vshrl.u32 %v2279_v0, 30  ;;  %v2344_v34 = vor.u32 %v2343_v31, %v2342_v19  ;;  %v2345_v6 = vshll.u32 %v10667_v30, %v6883_v41  ;;  %v7328_v28 = vpop.eup %6488 }
 0x101   :  { %v2351_v42 = vshll.u32 %v10668_v48, %v6883_v41  ;;  %10692 = vst [vmem:[#allocation42_spill] sm:$0xff] %v7328_v28  ;;  %v10477_v49 = vxor.u32 2147483648, %v7320_v46  ;;  %v2506_v5 = vand.u32 2147483647, %v2505_v17  ;;  %v2508_v13 = vcvt.s32.f32 %v2501_v22 }
 0x102   :  { %v2350_v25 = vor.u32 %v2349_v54, %v2348_v63  ;;  %v10478_v62 = vxor.u32 2147483648, %v7328_v28  ;;  %v2281_v59 = vshll.u32 %v7322_v12, 30  ;;  %v2330_v0 = vor.u32 8388608, %v2329_v15 }
 0x103   :  { %v2347_v47 = vor.u32 %v2346_v53, %v2345_v6  ;;  %v5207_v31 = vsel %vm5205_vm13, %v10477_v49, %v7328_v28  ;;  %v2509_v41 = vmul.f32 %v2508_v13, %v2506_v5  ;;  %v2353_v19 = vor.u32 %v2352_v37, %v2351_v42 }
 0x104   :  { %vm2354_vm2 = vcmp.lt.s32.totalorder %v6897_v57, 1  ;;  %v5204_v22 = vsel %vm5202_vm15, %v7320_v46, %v10478_v62  ;;  %v7344_v54 = vsub.s32 %v2278_v18, %v2281_v59  ;;  %vm2356_vm3 = vcmp.lt.s32.totalorder %v6897_v57, 3 }
 0x105   :  { %vm2357_vm4 = vcmp.lt.s32.totalorder %v6897_v57, 4  ;;  %v5208_v6 = vsel %vm5201_vm0, %v5204_v22, %v5207_v31  ;;  %v2510_v15 = vxor.u32 2147483648, %v2509_v41  ;;  %v2362_v42 = vsel %vm2354_vm2, %v2341_v9, %v2344_v34 }
 0x106   :  { %v2363_v53 = vsel %vm2357_vm4, %v2350_v25, 920167782  ;;  %v5209_v17 = vsel %vm2726_vm1, nan, %v5208_v6  ;;  %v2284_v63 = vsub.s32 0, %v7344_v54  ;;  %vm2355_vm5 = vcmp.lt.s32.totalorder %v6897_v57, 2 }
 0x107   :  { %v2364_v59 = vsel %vm2356_vm3, %v2347_v47, %v2363_v53  ;;  %6300 = vmatprep.subr.mxu1 %v5209_v17  ;;  %v2511_v61 = vsel %vm2428_vm6, %v2510_v15, %v2509_v41  ;;  %v2359_v18 = vsel %vm2357_vm4, %v2347_v47, 2102212464  ;;  %v2366_v37 = vsel %vm2354_vm2, %v2344_v34, %v2347_v47 }
 0x108   :  { %v2367_v5 = vsel %vm2357_vm4, %v2353_v19, 1326507024  ;;  %v2514_v13 = vsel %vm7278_vm12, %v6803_v24, %v2511_v61  ;;  %6301 = vmatpush3.msra.mxu1 %v5209_v17  ;;  %v6122_v31 = vmin.u32 %v2284_v63, %v7344_v54  ;;  %v2358_v22 = vsel %vm2354_vm2, %v2338_v52, %v2341_v9 }
 0x109   :  { %v2365_v6 = vsel %vm2355_vm5, %v2362_v42, %v2364_v59  ;;  %6490 = vcosq.f32 %v2514_v13  ;;  %v2304_v41 = vsub.s32 4, %v7322_v12  ;;  %v2368_v47 = vsel %vm2356_vm3, %v2350_v25, %v2367_v5 }
 0x10a   :  { %v2370_v19 = vshll.u32 %v2330_v0, 8  ;;  %6492 = vsinq.f32 %v2514_v13  ;;  %v2286_v15 = vclz %v6122_v31  ;;  %v2360_v23 = vsel %vm2356_vm3, %v2344_v34, %v2359_v18 }
 0x10b   :  { %v2369_v53 = vsel %vm2355_vm5, %v2366_v37, %v2368_v47  ;;  %v7385_v63 = vadd.s32 4294967169, %v7114_v44  ;;  %v7388_v25 = vand.u32 3, %v7299_v38  ;;  %v7391_v0 = vand.u32 3, %v7287_v56 }
 0x10c   :  { %v7377_v17 = vmul.u32.u64.low %v2370_v19, %v2369_v53  ;;  %v7378_v52 = vmul.u32.u64.high %v2370_v19, %v2369_v53, %v7377_v17  ;;  %v7380_v9 = vmul.u32.u64.low %v2370_v19, %v2365_v6  ;;  %v7381_v42 = vmul.u32.u64.high %v2370_v19, %v2365_v6, %v7380_v9 }
 0x10d   :  { %v6123_v34 = vadd.s32 4294967294, %v2286_v15  ;;  %v7394_v59 = vshrl.u32 %v7203_v32, 5  ;;  %v7397_v61 = vadd.s32 4294967169, %v7120_v3  ;;  %v2361_v18 = vsel %vm2355_vm5, %v2358_v22, %v2360_v23 }
 0x10e   :  { %v10479_v37 = vand.u32 2147483647, %v6755_v43  ;;  %v7403_v44 = vand.u32 31, %v7203_v32  ;;  %vm2220_vm6 = vcmp.lt.s32.totalorder %v6813_v35, 0  ;;  %v2274_v56 = vadd.s32 %v7225_v11, %v7260_v20 }
 0x10f   :  { %vm6124_vm8 = vcmp.lt.s32.totalorder %v6123_v34, 0  ;;  %v7411_v3 = vsel %vm2220_vm6, %v2304_v41, %v7322_v12  ;;  %vm2379_vm9 = vc.u32 %v7378_v52, %v7380_v9  ;;  %v2380_v57 = vadd.s32 1, %v7381_v42 }
 0x110   :  { %v2289_v38 = vsel %vm6124_vm8, 0, %v6123_v34  ;;  %vm2525_vm10 = vcmp.eq.s32.totalorder %v7388_v25, 2  ;;  %vm4999_vm11 = vcmp.eq.s32.totalorder %v7391_v0, 2  ;;  %v2377_v13 = vmul.u32 %v2370_v19, %v2361_v18 }
 0x111   :  { %v2290_v32 = vsub.s32 32, %v2289_v38  ;;  %v2294_v5 = vsub.s32 4294967266, %v2289_v38  ;;  %v2131_v11 = vshll.u32 %v10665_v4, %v6868_v14  ;;  %vm2522_vm12 = vcmp.eq.s32.totalorder %v7388_v25, 0 }
 0x112   :  { %vm4996_vm13 = vcmp.eq.s32.totalorder %v7391_v0, 0  ;;  %v2381_v20 = vsel %vm2379_vm9, %v2380_v57, %v7381_v42  ;;  %v7425_v12 = vand.u32 8388607, %v10479_v37  ;;  %v2132_v31 = vshrl.u32 %v10666_v7, %v6890_v50 }
 0x113   :  { %v2135_v22 = vshrl.u32 %v10667_v30, %v6890_v50  ;;  %vm2521_vm14 = vcmp.lt.s32.totalorder %v7388_v25, 2  ;;  %vm4995_vm15 = vcmp.lt.s32.totalorder %v7391_v0, 2  ;;  %v2291_v6 = vshll.u32 %v7344_v54, %v2289_v38 }
 0x114   :  { %v2292_v41 = vshrl.u32 %v2274_v56, %v2290_v32  ;;  %v2295_v47 = vadd.s32 127, %v2294_v5  ;;  %v2382_v19 = vadd.s32 %v2381_v20, %v2377_v13  ;;  %vm2518_vm0 = vweird.f32 %v6803_v24 }
 0x115   :  { %v2138_v15 = vshrl.u32 %v10664_v39, %v6890_v50  ;;  %v2140_v23 = vshll.u32 %v10664_v39, %v6868_v14  ;;  %v2141_v53 = vshrl.u32 %v10668_v48, %v6890_v50  ;;  %v2144_v17 = vshrl.u32 %v10669_v60, %v6890_v50 }
 0x116   :  { %v10693_v42 = vand.u32 2147483647, %v6813_v35  ;;  %v2293_v34 = vor.u32 %v2292_v41, %v2291_v6  ;;  %v2296_v18 = vshll.u32 %v2295_v47, 23  ;;  %v2383_v56 = vadd.s32 536870912, %v2382_v19  ;;  %v6491_v20 = vpop.eup %6490 }
 0x117   :  { %v2134_v38 = vshll.u32 %v10666_v7, %v6868_v14  ;;  %v2122_v57 = vor.u32 8388608, %v7425_v12  ;;  %v2137_v32 = vshll.u32 %v10667_v30, %v6868_v14  ;;  %v2142_v5 = vor.u32 %v2141_v53, %v2140_v23  ;;  %v6493_v6 = vpop.eup %6492 }
 0x118   :  { %vm7445_vm2 = vcmp.le.f32.partialorder %v10693_v42, 0.7853982  ;;  %v2143_v13 = vshll.u32 %v10668_v48, %v6868_v14  ;;  %v2297_v42 = vor.u32 4788187, %v2296_v18  ;;  %v2384_v49 = vshrl.u32 %v2383_v56, 30 }
 0x119   :  { %v2133_v62 = vor.u32 %v2132_v31, %v2131_v11  ;;  %v2136_v37 = vor.u32 %v2135_v22, %v2134_v38  ;;  %v2526_v41 = vxor.u32 2147483648, %v6491_v20  ;;  %v2300_v47 = vcvt.s32.f32 %v2293_v34 }
 0x11a   :  { %v2139_v33 = vor.u32 %v2138_v15, %v2137_v32  ;;  %v2145_v46 = vor.u32 %v2144_v17, %v2143_v13  ;;  %v2523_v28 = vxor.u32 2147483648, %v6493_v6  ;;  %v2298_v21 = vand.u32 2147483647, %v2297_v42 }
 0x11b   :  { %v2385_v12 = vshll.u32 %v2384_v49, 30  ;;  %vm2149_vm3 = vcmp.lt.s32.totalorder %v6881_v29, 4  ;;  %v2527_v23 = vsel %vm2525_vm10, %v2526_v41, %v6493_v6  ;;  %v5001_v14 = vsel %vm4999_vm11, %v2526_v41, %v6493_v6 }
 0x11c   :  { %vm2146_vm4 = vcmp.lt.s32.totalorder %v6881_v29, 1  ;;  %v2155_v11 = vsel %vm2149_vm3, %v2142_v5, 920167782  ;;  %v2524_v31 = vsel %vm2522_vm12, %v6491_v20, %v2523_v28  ;;  %v4998_v22 = vsel %vm4996_vm13, %v6491_v20, %v2523_v28 }
 0x11d   :  { %v2301_v15 = vmul.f32 %v2300_v47, %v2298_v21  ;;  %v7468_v53 = vsub.s32 %v2382_v19, %v2385_v12  ;;  %v2528_v17 = vsel %vm2521_vm14, %v2524_v31, %v2527_v23  ;;  %v5002_v34 = vsel %vm4995_vm15, %v4998_v22, %v5001_v14 }
 0x11e   :  { %vm2148_vm5 = vcmp.lt.s32.totalorder %v6881_v29, 3  ;;  %v2154_v18 = vsel %vm2146_vm4, %v2133_v62, %v2136_v37  ;;  %v7479_v56 = vsel %vm2518_vm0, nan, %v2528_v17  ;;  %v5003_v28 = vsel %vm2518_vm0, nan, %v5002_v34 }
 0x11f   :  { %10696 = vst [vmem:[#allocation43_spill] sm:$0xff] %v7479_v56  ;;  %v2302_v21 = vxor.u32 2147483648, %v2301_v15  ;;  %v2388_v19 = vsub.s32 0, %v7468_v53  ;;  %v7485_v25 = vadd.s32 1, %v7385_v63  ;;  %5248 = vmatpush1.msra.mxu0 %v5003_v28  ;;  %v7490_v0 = vsel %vm7445_vm2, 0, %v7411_v3 }
 0x120   :  { %10697 = vst [vmem:[#allocation44_spill] sm:$0xff] %v7490_v0  ;;  %v2130_v38 = vshrl.u32 %v10665_v4, %v6890_v50  ;;  %v2156_v32 = vsel %vm2148_vm5, %v2139_v33, %v2155_v11  ;;  %vm2147_vm8 = vcmp.lt.s32.totalorder %v6881_v29, 2  ;;  %v2151_v63 = vsel %vm2149_vm3, %v2139_v33, 2102212464 }
 0x121   :  { %v2303_v24 = vsel %vm2220_vm6, %v2302_v21, %v2301_v15  ;;  %v6126_v13 = vmin.u32 %v2388_v19, %v7468_v53  ;;  %v2157_v50 = vsel %vm2147_vm8, %v2154_v18, %v2156_v32  ;;  %v2158_v20 = vsel %vm2146_vm4, %v2136_v37, %v2139_v33 }
 0x122   :  { %v2306_v3 = vsel %vm7445_vm2, %v6813_v35, %v2303_v24  ;;  %v2159_v42 = vsel %vm2149_vm3, %v2145_v46, 1326507024  ;;  %v2408_v41 = vsub.s32 4, %v2384_v49  ;;  %v2162_v47 = vshll.u32 %v2122_v57, 8 }
 0x123   :  { %6494 = vcosq.f32 %v2306_v3  ;;  %v2390_v6 = vclz %v6126_v13  ;;  %v2150_v12 = vsel %vm2146_vm4, %v2130_v38, %v2133_v62  ;;  %v2152_v54 = vsel %vm2148_vm5, %v2136_v37, %v2151_v63 }
 0x124   :  { %6496 = vsinq.f32 %v2306_v3  ;;  %v2160_v23 = vsel %vm2148_vm5, %v2142_v5, %v2159_v42  ;;  %v7519_v11 = vmul.u32.u64.low %v2162_v47, %v2157_v50  ;;  %v7520_v46 = vmul.u32.u64.high %v2162_v47, %v2157_v50, %v7519_v11 }
 0x125   :  { %v6127_v14 = vadd.s32 4294967294, %v2390_v6  ;;  %v2161_v33 = vsel %vm2147_vm8, %v2158_v20, %v2160_v23  ;;  %v7524_v57 = vand.u32 3, %v7490_v0  ;;  %vm2324_vm6 = vcmp.lt.s32.totalorder %v6757_v45, 0  ;;  %v10731_v0 = vld [vmem:[#allocation33_spill] sm:$0xff] }
 0x126   :  { %v7527_v62 = vmul.u32.u64.low %v2162_v47, %v2161_v33  ;;  %v7528_v31 = vmul.u32.u64.high %v2162_v47, %v2161_v33, %v7527_v62  ;;  %v7531_v37 = vadd.s32 1, %v7397_v61  ;;  %v2409_v5 = vsel %vm2324_vm6, %v2408_v41, %v2384_v49 }
 0x127   :  { %vm6128_vm9 = vcmp.lt.s32.totalorder %v6127_v14, 0  ;;  %v2153_v22 = vsel %vm2147_vm8, %v2150_v12, %v2152_v54  ;;  %v869_v15 = vand.u32 2139095040, %v6827_v58  ;;  %v10698_v17 = vand.u32 2147483647, %v6757_v45 }
 0x128   :  { %v2393_v18 = vsel %vm6128_vm9, 0, %v6127_v14  ;;  %v10489_v28 = vand.u32 2147483647, %v6769_v55  ;;  %v2378_v61 = vadd.s32 %v7380_v9, %v7378_v52  ;;  %v2172_v49 = vadd.s32 1, %v7520_v46 }
 0x129   :  { %vm7540_vm10 = vcmp.le.f32.partialorder %v10698_v17, 0.7853982  ;;  %v2394_v21 = vsub.s32 32, %v2393_v18  ;;  %v2398_v19 = vsub.s32 4294967266, %v2393_v18  ;;  %vm4793_vm11 = vcmp.eq.s32.totalorder %v7524_v57, 2 }
 0x12a   :  { %v7551_v29 = vsel %vm7540_vm10, 0, %v2409_v5  ;;  %v2169_v38 = vmul.u32 %v2162_v47, %v2153_v22  ;;  %vm2171_vm12 = vc.u32 %v7528_v31, %v7519_v11  ;;  %vm4790_vm13 = vcmp.eq.s32.totalorder %v7524_v57, 0 }
 0x12b   :  { %10701 = vst [vmem:[#allocation45_spill] sm:$0xff] %v7551_v29  ;;  %v2395_v32 = vshll.u32 %v7468_v53, %v2393_v18  ;;  %v2396_v24 = vshrl.u32 %v2378_v61, %v2394_v21  ;;  %v2399_v52 = vadd.s32 127, %v2398_v19  ;;  %v2173_v9 = vsel %vm2171_vm12, %v2172_v49, %v7520_v46 }
 0x12c   :  { %vm4789_vm14 = vcmp.lt.s32.totalorder %v7524_v57, 2  ;;  %v2174_v13 = vadd.s32 %v2173_v9, %v2169_v38  ;;  %v7561_v63 = vand.u32 8388607, %v10489_v28  ;;  %v1922_v3 = vshrl.u32 %v10665_v4, %v6922_v51 }
 0x12d   :  { %v1930_v50 = vshrl.u32 %v10664_v39, %v6922_v51  ;;  %vm2310_vm15 = vweird.f32 %v6813_v35  ;;  %v2397_v53 = vor.u32 %v2396_v24, %v2395_v32  ;;  %v2400_v20 = vshll.u32 %v2399_v52, 23 }
 0x12e   :  { %v1923_v42 = vshll.u32 %v10665_v4, %v6906_v2  ;;  %v1933_v6 = vshrl.u32 %v10668_v48, %v6922_v51  ;;  %v2175_v41 = vadd.s32 536870912, %v2174_v13  ;;  %v1924_v47 = vshrl.u32 %v10666_v7, %v6922_v51 }
 0x12f   :  { %v1927_v12 = vshrl.u32 %v10667_v30, %v6922_v51  ;;  %v1929_v54 = vshll.u32 %v10667_v30, %v6906_v2  ;;  %v2401_v23 = vor.u32 4788187, %v2400_v20  ;;  %v1926_v14 = vshll.u32 %v10666_v7, %v6906_v2 }
 0x130   :  { %v1932_v33 = vshll.u32 %v10664_v39, %v6906_v2  ;;  %v1936_v46 = vshrl.u32 %v10669_v60, %v6922_v51  ;;  %v7584_v62 = vpop.eup %6494  ;;  %v7586_v5 = vshrl.u32 %v2175_v41, 30  ;;  %v1914_v22 = vor.u32 8388608, %v7561_v63 }
 0x131   :  { %10702 = vst [vmem:[#allocation46_spill] sm:$0xff] %v7584_v62  ;;  %v1931_v17 = vor.u32 %v1930_v50, %v1929_v54  ;;  %v1935_v18 = vshll.u32 %v10668_v48, %v6906_v2  ;;  %v7591_v61 = vpop.eup %6496  ;;  %v10486_v21 = vxor.u32 2147483648, %v7584_v62  ;;  %v2402_v19 = vand.u32 2147483647, %v2401_v23  ;;  %v10704_v50 = vld [vmem:[#allocation28_spill] sm:$0xff] }
 0x132   :  { %10703 = vst [vmem:[#allocation47_spill] sm:$0xff] %v7591_v61  ;;  %v2404_v49 = vcvt.s32.f32 %v2397_v53  ;;  %v1934_v38 = vor.u32 %v1933_v6, %v1932_v33  ;;  %v10487_v32 = vxor.u32 2147483648, %v7591_v61  ;;  %v2177_v51 = vshll.u32 %v7586_v5, 30 }
 0x133   :  { %v1925_v24 = vor.u32 %v1924_v47, %v1923_v42  ;;  %v1928_v52 = vor.u32 %v1927_v12, %v1926_v14  ;;  %v4795_v9 = vsel %vm4793_vm11, %v10486_v21, %v7591_v61  ;;  %v1937_v63 = vor.u32 %v1936_v46, %v1935_v18 }
 0x134   :  { %v2405_v2 = vmul.f32 %v2404_v49, %v2402_v19  ;;  %vm1938_vm0 = vcmp.lt.s32.totalorder %v10704_v50, 1  ;;  %v4792_v53 = vsel %vm4790_vm13, %v7584_v62, %v10487_v32  ;;  %v7607_v20 = vsub.s32 %v2174_v13, %v2177_v51 }
 0x135   :  { %vm1939_vm2 = vcmp.lt.s32.totalorder %v10704_v50, 2  ;;  %vm1941_vm3 = vcmp.lt.s32.totalorder %v10704_v50, 4  ;;  %v4796_v42 = vsel %vm4789_vm14, %v4792_v53, %v4795_v9  ;;  %vm1940_vm4 = vcmp.lt.s32.totalorder %v10704_v50, 3 }
 0x136   :  { %v2406_v6 = vxor.u32 2147483648, %v2405_v2  ;;  %v1943_v41 = vsel %vm1941_vm3, %v1931_v17, 2102212464  ;;  %v1947_v47 = vsel %vm1941_vm3, %v1934_v38, 920167782  ;;  %v4797_v12 = vsel %vm2310_vm15, nan, %v4796_v42 }
 0x137   :  { %v2180_v54 = vsub.s32 0, %v7607_v20  ;;  %v1946_v13 = vsel %vm1938_vm0, %v1925_v24, %v1928_v52  ;;  %5249 = vmatprep.subr.mxu0 %v4797_v12  ;;  %v1948_v14 = vsel %vm1940_vm4, %v1931_v17, %v1947_v47  ;;  %v1950_v57 = vsel %vm1938_vm0, %v1928_v52, %v1931_v17 }
 0x138   :  { %v2407_v23 = vsel %vm2324_vm6, %v2406_v6, %v2405_v2  ;;  %v1951_v33 = vsel %vm1941_vm3, %v1937_v63, 1326507024  ;;  %v1942_v19 = vsel %vm1938_vm0, %v1922_v3, %v1925_v24  ;;  %v1944_v49 = vsel %vm1940_vm4, %v1928_v52, %v1943_v41  ;;  %v10705_v63 = vld [vmem:[#allocation18_spill] sm:$0xff] }
 0x139   :  { %v2410_v46 = vsel %vm7540_vm10, %v6757_v45, %v2407_v23  ;;  %v6118_v18 = vmin.u32 %v2180_v54, %v7607_v20  ;;  %vm1293_vm5 = vcmp.gt.s32.totalorder %v7485_v25, 0  ;;  %v1949_v51 = vsel %vm1939_vm2, %v1946_v13, %v1948_v14 }
 0x13a   :  { %6498 = vcosq.f32 %v2410_v46  ;;  %v1952_v9 = vsel %vm1940_vm4, %v1934_v38, %v1951_v33  ;;  %v1954_v34 = vshll.u32 %v1914_v22, 8  ;;  %v973_v53 = vand.u32 2139095040, %v10705_v63  ;;  %v10706_v38 = vld [vmem:[#allocation7_spill] sm:$0xff] }
 0x13b   :  { %6500 = vsinq.f32 %v2410_v46  ;;  %v2182_v17 = vclz %v6118_v18  ;;  %v1953_v2 = vsel %vm1939_vm2, %v1950_v57, %v1952_v9  ;;  %v7636_v42 = vand.u32 3, %v7551_v29 }
 0x13c   :  { %v2200_v3 = vsub.s32 4, %v7586_v5  ;;  %v1945_v24 = vsel %vm1939_vm2, %v1942_v19, %v1944_v49  ;;  %v7641_v6 = vmul.u32.u64.low %v1954_v34, %v1953_v2  ;;  %v7642_v41 = vmul.u32.u64.high %v1954_v34, %v1953_v2, %v7641_v6 }
 0x13d   :  { %v6119_v52 = vadd.s32 4294967294, %v2182_v17  ;;  %v10488_v47 = vand.u32 2147483647, %v10706_v38  ;;  %v7646_v12 = vsub.s32 32, %v7403_v44  ;;  %v7651_v22 = vsel %vm1293_vm5, %v7485_v25, 0 }
 0x13e   :  { %v7653_v54 = vmul.u32.u64.low %v1954_v34, %v1949_v51  ;;  %v7654_v13 = vmul.u32.u64.high %v1954_v34, %v1949_v51, %v7653_v54  ;;  %v7659_v50 = vshrl.u32 %v869_v15, 23  ;;  %vm2116_vm8 = vcmp.lt.s32.totalorder %v6755_v43, 0 }
 0x13f   :  { %v2170_v23 = vadd.s32 %v7519_v11, %v7528_v31  ;;  %vm6120_vm6 = vcmp.lt.s32.totalorder %v6119_v52, 0  ;;  %v7667_v25 = vsel %vm2116_vm8, %v2200_v3, %v7586_v5  ;;  %v1961_v57 = vmul.u32 %v1954_v34, %v1945_v24 }
 0x140   :  { %v2185_v14 = vsel %vm6120_vm6, 0, %v6119_v52  ;;  %v7671_v33 = vshrl.u32 %v10665_v4, %v7017_v1  ;;  %vm4896_vm9 = vcmp.eq.s32.totalorder %v7636_v42, 2  ;;  %v2017_v18 = vand.u32 8388607, %v10488_v47 }
 0x141   :  { %v2186_v15 = vsub.s32 32, %v2185_v14  ;;  %v2190_v46 = vsub.s32 4294967266, %v2185_v14  ;;  %v2027_v11 = vshll.u32 %v10665_v4, %v6926_v10  ;;  %vm4893_vm10 = vcmp.eq.s32.totalorder %v7636_v42, 0 }
 0x142   :  { %vm1963_vm11 = vc.u32 %v7642_v41, %v7653_v54  ;;  %v1964_v31 = vadd.s32 1, %v7654_v13  ;;  %v2028_v5 = vshrl.u32 %v10666_v7, %v7017_v1  ;;  %v2031_v19 = vshrl.u32 %v10667_v30, %v7017_v1 }
 0x143   :  { %vm4892_vm12 = vcmp.lt.s32.totalorder %v7636_v42, 2  ;;  %v2187_v49 = vshll.u32 %v7607_v20, %v2185_v14  ;;  %v2188_v51 = vshrl.u32 %v2170_v23, %v2186_v15  ;;  %v2191_v9 = vadd.s32 127, %v2190_v46 }
 0x144   :  { %v2034_v17 = vshrl.u32 %v10664_v39, %v7017_v1  ;;  %vm2414_vm13 = vweird.f32 %v6757_v45  ;;  %v1965_v2 = vsel %vm1963_vm11, %v1964_v31, %v7654_v13  ;;  %v2036_v34 = vshll.u32 %v10664_v39, %v6926_v10 }
 0x145   :  { %v2037_v3 = vshrl.u32 %v10668_v48, %v7017_v1  ;;  %v2040_v24 = vshrl.u32 %v10669_v60, %v7017_v1  ;;  %v2189_v52 = vor.u32 %v2188_v51, %v2187_v49  ;;  %v2192_v20 = vshll.u32 %v2191_v9, 23 }
 0x146   :  { %v1966_v6 = vadd.s32 %v1965_v2, %v1961_v57  ;;  %v2030_v23 = vshll.u32 %v10666_v7, %v6926_v10  ;;  %vm1397_vm14 = vcmp.gt.s32.totalorder %v7531_v37, 0  ;;  %v2018_v14 = vor.u32 8388608, %v2017_v18 }
 0x147   :  { %v2033_v13 = vshll.u32 %v10667_v30, %v6926_v10  ;;  %v2038_v15 = vor.u32 %v2037_v3, %v2036_v34  ;;  %v2039_v46 = vshll.u32 %v10668_v48, %v6926_v10  ;;  %v7705_v31 = vpop.eup %6498  ;;  %v10708_v1 = vand.u32 2147483647, %v6755_v43 }
 0x148   :  { %10707 = vst [vmem:[#allocation28_spill] sm:$0xff] %v7705_v31  ;;  %v2193_v57 = vor.u32 4788187, %v2192_v20  ;;  %v1967_v51 = vadd.s32 536870912, %v1966_v6  ;;  %v2029_v9 = vor.u32 %v2028_v5, %v2027_v11  ;;  %v2032_v2 = vor.u32 %v2031_v19, %v2030_v23  ;;  %v7713_v18 = vpop.eup %6500 }
 0x149   :  { %vm7709_vm0 = vcmp.le.f32.partialorder %v10708_v1, 0.7853982  ;;  %10711 = vst [vmem:[#allocation48_spill] sm:$0xff] %v7713_v18  ;;  %v10490_v21 = vxor.u32 2147483648, %v7705_v31  ;;  %v2196_v34 = vcvt.s32.f32 %v2189_v52  ;;  %v2035_v3 = vor.u32 %v2034_v17, %v2033_v13  ;;  %v10712_v1 = vld [vmem:[#allocation30_spill] sm:$0xff] }
 0x14a   :  { %v2041_v32 = vor.u32 %v2040_v24, %v2039_v46  ;;  %v10491_v10 = vxor.u32 2147483648, %v7713_v18  ;;  %v2194_v47 = vand.u32 2147483647, %v2193_v57  ;;  %v7717_v28 = vshrl.u32 %v1967_v51, 30 }
 0x14b   :  { %vm2045_vm2 = vcmp.lt.s32.totalorder %v10712_v1, 4  ;;  %v4898_v11 = vsel %vm4896_vm9, %v10490_v21, %v7713_v18  ;;  %vm2042_vm3 = vcmp.lt.s32.totalorder %v10712_v1, 1  ;;  %vm2044_vm4 = vcmp.lt.s32.totalorder %v10712_v1, 3  ;;  %v10718_v18 = vld [vmem:[#allocation26_spill] sm:$0xff] }
 0x14c   :  { %v2051_v5 = vsel %vm2045_vm2, %v2038_v15, 920167782  ;;  %v4895_v19 = vsel %vm4893_vm10, %v7705_v31, %v10491_v10  ;;  %v2197_v17 = vmul.f32 %v2196_v34, %v2194_v47  ;;  %v1969_v24 = vshll.u32 %v7717_v28, 30 }
 0x14d   :  { %v2050_v52 = vsel %vm2042_vm3, %v2029_v9, %v2032_v2  ;;  %v4899_v20 = vsel %vm4892_vm12, %v4895_v19, %v4898_v11  ;;  %v2052_v23 = vsel %vm2044_vm4, %v2035_v3, %v2051_v5  ;;  %v2054_v13 = vsel %vm2042_vm3, %v2032_v2, %v2035_v3 }
 0x14e   :  { %v2055_v46 = vsel %vm2045_vm2, %v2041_v32, 1326507024  ;;  %v4900_v47 = vsel %vm2414_vm13, nan, %v4899_v20  ;;  %v2198_v57 = vxor.u32 2147483648, %v2197_v17  ;;  %v7747_v51 = vsub.s32 %v1966_v6, %v1969_v24 }
 0x14f   :  { %v2047_v34 = vsel %vm2045_vm2, %v2035_v3, 2102212464  ;;  %6302 = vmatprep.subr.mxu1 %v4900_v47  ;;  %vm2043_vm5 = vcmp.lt.s32.totalorder %v10712_v1, 2  ;;  %v2046_v42 = vsel %vm2042_vm3, %v7671_v33, %v2029_v9  ;;  %v2056_v11 = vsel %vm2044_vm4, %v2038_v15, %v2055_v46  ;;  %v10714_v46 = vld [vmem:[#allocation5_spill] sm:$0xff] }
 0x150   :  { %v2058_v32 = vshll.u32 %v2018_v14, 8  ;;  %v2199_v5 = vsel %vm2116_vm8, %v2198_v57, %v2197_v17  ;;  %6303 = vmatpush3.msra.mxu1 %v4900_v47  ;;  %v1972_v6 = vsub.s32 0, %v7747_v51  ;;  %v2053_v3 = vsel %vm2043_vm5, %v2050_v52, %v2052_v23 }
 0x151   :  { %v2057_v19 = vsel %vm2043_vm5, %v2054_v13, %v2056_v11  ;;  %v2202_v33 = vsel %vm7709_vm0, %v6755_v43, %v2199_v5  ;;  %v2048_v15 = vsel %vm2044_vm4, %v2032_v2, %v2047_v34  ;;  %v1398_v17 = vsel %vm1397_vm14, %v7531_v37, 0  ;;  %v10715_v11 = vld [vmem:[#allocation19_spill] sm:$0xff] }
 0x152   :  { %v7769_v14 = vmul.u32.u64.low %v2058_v32, %v2057_v19  ;;  %v7770_v9 = vmul.u32.u64.high %v2058_v32, %v2057_v19, %v7769_v14  ;;  %v7777_v24 = vshrl.u32 %v973_v53, 23  ;;  %6502 = vcosq.f32 %v2202_v33  ;;  %v10716_v19 = vld [vmem:[#allocation29_spill] sm:$0xff] }
 0x153   :  { %v6110_v52 = vmin.u32 %v1972_v6, %v7747_v51  ;;  %v7783_v20 = vsel %vm7709_vm0, 0, %v7667_v25  ;;  %6504 = vsinq.f32 %v2202_v33  ;;  %v7790_v13 = vshrl.u32 %v7651_v22, 5 }
 0x154   :  { %10713 = vst [vmem:[#allocation30_spill] sm:$0xff] %v7783_v20  ;;  %v7785_v2 = vmul.u32.u64.low %v2058_v32, %v2053_v3  ;;  %v7786_v23 = vmul.u32.u64.high %v2058_v32, %v2053_v3, %v7785_v2  ;;  %v2049_v53 = vsel %vm2043_vm5, %v2046_v42, %v2048_v15  ;;  %v10492_v47 = vand.u32 2147483647, %v10714_v46  ;;  %v10717_v15 = vld [vmem:[#allocation27_spill] sm:$0xff] }
 0x155   :  { %v1974_v37 = vclz %v6110_v52  ;;  %v7796_v57 = vand.u32 31, %v7651_v22  ;;  %v7798_v49 = vshrl.u32 %v1398_v17, 5  ;;  %v7800_v25 = vand.u32 31, %v1398_v17 }
 0x156   :  { %v7803_v34 = vadd.s32 4294967169, %v7659_v50  ;;  %v7807_v6 = vand.u32 3, %v7783_v20  ;;  %vm2067_vm8 = vc.u32 %v7770_v9, %v7785_v2  ;;  %v1962_v22 = vadd.s32 %v7653_v54, %v7642_v41 }
 0x157   :  { %v6111_v3 = vadd.s32 4294967294, %v1974_v37  ;;  %v2065_v1 = vmul.u32 %v2058_v32, %v2049_v53  ;;  %v2068_v42 = vadd.s32 1, %v7786_v23  ;;  %v1820_v33 = vshrl.u32 %v10666_v7, %v10716_v19 }
 0x158   :  { %v7818_v50 = vand.u32 8388607, %v10492_v47  ;;  %v1819_v14 = vshll.u32 %v10665_v4, %v10717_v15  ;;  %v1822_v17 = vshll.u32 %v10666_v7, %v10717_v15  ;;  %v1823_v54 = vshrl.u32 %v10667_v30, %v10716_v19 }
 0x159   :  { %vm6112_vm6 = vcmp.lt.s32.totalorder %v6111_v3, 0  ;;  %v2069_v41 = vsel %vm2067_vm8, %v2068_v42, %v7786_v23  ;;  %v1826_v32 = vshrl.u32 %v10664_v39, %v10716_v19  ;;  %vm4687_vm9 = vcmp.eq.s32.totalorder %v7807_v6, 0 }
 0x15a   :  { %v1977_v52 = vsel %vm6112_vm6, 0, %v6111_v3  ;;  %v2070_v21 = vadd.s32 %v2069_v41, %v2065_v1  ;;  %v1825_v10 = vshll.u32 %v10667_v30, %v10717_v15  ;;  %vm4686_vm10 = vcmp.lt.s32.totalorder %v7807_v6, 2 }
 0x15b   :  { %v1978_v37 = vsub.s32 32, %v1977_v52  ;;  %v1982_v53 = vsub.s32 4294967266, %v1977_v52  ;;  %v1979_v3 = vshll.u32 %v7747_v51, %v1977_v52  ;;  %v1821_v47 = vor.u32 %v1820_v33, %v1819_v14 }
 0x15c   :  { %v1828_v23 = vshll.u32 %v10664_v39, %v10717_v15  ;;  %v1829_v42 = vshrl.u32 %v10668_v48, %v10716_v19  ;;  %vm10551_vm11 = vweird.f32 %v6755_v43  ;;  %v2071_v45 = vadd.s32 536870912, %v2070_v21 }
 0x15d   :  { %v1980_v5 = vshrl.u32 %v1962_v22, %v1978_v37  ;;  %v1983_v56 = vadd.s32 127, %v1982_v53  ;;  %v1832_v1 = vshrl.u32 %v10669_v60, %v10716_v19  ;;  %v1824_v41 = vor.u32 %v1823_v54, %v1822_v17 }
 0x15e   :  { %v1827_v35 = vor.u32 %v1826_v32, %v1825_v10  ;;  %v1830_v31 = vor.u32 %v1829_v42, %v1828_v23  ;;  %v1831_v51 = vshll.u32 %v10668_v48, %v10717_v15  ;;  %vm1908_vm12 = vcmp.lt.s32.totalorder %v6769_v55, 0 }
 0x15f   :  { %v1981_v33 = vor.u32 %v1980_v5, %v1979_v3  ;;  %v1984_v14 = vshll.u32 %v1983_v56, 23  ;;  %v7844_v52 = vshrl.u32 %v2071_v45, 30  ;;  %vm1837_vm14 = vcmp.lt.s32.totalorder %v10718_v18, 4  ;;  %v7847_v22 = vpop.eup %6502 }
 0x160   :  { %10719 = vst [vmem:[#allocation19_spill] sm:$0xff] %v7847_v22  ;;  %vm4690_vm0 = vcmp.eq.s32.totalorder %v7807_v6, 2  ;;  %v1810_v37 = vor.u32 8388608, %v7818_v50  ;;  %vm1834_vm2 = vcmp.lt.s32.totalorder %v10718_v18, 1  ;;  %v1843_v10 = vsel %vm1837_vm14, %v1830_v31, 920167782  ;;  %v7854_v15 = vpop.eup %6504 }
 0x161   :  { %10720 = vst [vmem:[#allocation29_spill] sm:$0xff] %v7854_v15  ;;  %v10499_v5 = vxor.u32 2147483648, %v7847_v22  ;;  %v10721_v45 = vand.u32 2147483647, %v6769_v55  ;;  %v1985_v17 = vor.u32 4788187, %v1984_v14  ;;  %v1833_v32 = vor.u32 %v1832_v1, %v1831_v51 }
 0x162   :  { %v2073_v54 = vshll.u32 %v7844_v52, 30  ;;  %v10500_v50 = vxor.u32 2147483648, %v7854_v15  ;;  %v1988_v53 = vcvt.s32.f32 %v1981_v33  ;;  %vm1836_vm4 = vcmp.lt.s32.totalorder %v10718_v18, 3 }
 0x163   :  { %vm7859_vm3 = vcmp.le.f32.partialorder %v10721_v45, 0.7853982  ;;  %v1842_v3 = vsel %vm1834_vm2, %v1821_v47, %v1824_v41  ;;  %v4692_v23 = vsel %vm4690_vm0, %v10499_v5, %v7854_v15  ;;  %v1986_v42 = vand.u32 2147483647, %v1985_v17 }
 0x164   :  { %v7871_v45 = vsub.s32 %v2070_v21, %v2073_v54  ;;  %v1844_v14 = vsel %vm1836_vm4, %v1827_v35, %v1843_v10  ;;  %v4689_v1 = vsel %vm4687_vm9, %v7847_v22, %v10500_v50  ;;  %v1992_v51 = vsub.s32 4, %v7717_v28 }
 0x165   :  { %vm1835_vm5 = vcmp.lt.s32.totalorder %v10718_v18, 2  ;;  %v1839_v33 = vsel %vm1837_vm14, %v1827_v35, 2102212464  ;;  %v4693_v21 = vsel %vm4686_vm10, %v4689_v1, %v4692_v23  ;;  %v1989_v17 = vmul.f32 %v1988_v53, %v1986_v42 }
 0x166   :  { %v2076_v54 = vsub.s32 0, %v7871_v45  ;;  %v1846_v10 = vsel %vm1834_vm2, %v1824_v41, %v1827_v35  ;;  %v4694_v5 = vsel %vm10551_vm11, nan, %v4693_v21  ;;  %v1818_v50 = vshrl.u32 %v10665_v4, %v10716_v19  ;;  %v10725_v21 = vld [vmem:[#allocation9_spill] sm:$0xff] }
 0x167   :  { %v1845_v22 = vsel %vm1835_vm5, %v1842_v3, %v1844_v14  ;;  %v1847_v15 = vsel %vm1837_vm14, %v1833_v32, 1326507024  ;;  %5250 = vmatpush1.msra.mxu0 %v4694_v5  ;;  %v1990_v6 = vxor.u32 2147483648, %v1989_v17  ;;  %v1850_v35 = vshll.u32 %v1810_v37, 8 }
 0x168   :  { %v6114_v53 = vmin.u32 %v2076_v54, %v7871_v45  ;;  %v1848_v23 = vsel %vm1836_vm4, %v1830_v31, %v1847_v15  ;;  %v1993_v42 = vsel %vm1908_vm12, %v1992_v51, %v7717_v28  ;;  %v1838_v19 = vsel %vm1834_vm2, %v1818_v50, %v1821_v47 }
 0x169   :  { %v1840_v3 = vsel %vm1836_vm4, %v1824_v41, %v1839_v33  ;;  %v1849_v5 = vsel %vm1835_vm5, %v1846_v10, %v1848_v23  ;;  %v1991_v32 = vsel %vm1908_vm12, %v1990_v6, %v1989_v17  ;;  %v7915_v37 = vadd.s32 4294967169, %v7777_v24 }
 0x16a   :  { %v2078_v14 = vclz %v6114_v53  ;;  %v7911_v1 = vmul.u32.u64.low %v1850_v35, %v1849_v5  ;;  %v7912_v31 = vmul.u32.u64.high %v1850_v35, %v1849_v5, %v7911_v1  ;;  %v1994_v28 = vsel %vm7859_vm3, %v6769_v55, %v1991_v32 }
 0x16b   :  { %v7920_v47 = vmul.u32.u64.low %v1850_v35, %v1845_v22  ;;  %v7921_v15 = vmul.u32.u64.high %v1850_v35, %v1845_v22, %v7920_v47  ;;  %v7925_v41 = vsub.s32 32, %v7796_v57  ;;  %v7929_v50 = vsel %vm7859_vm3, 0, %v1993_v42 }
 0x16c   :  { %10724 = vst [vmem:[#allocation27_spill] sm:$0xff] %v7929_v50  ;;  %6506 = vcosq.f32 %v1994_v28  ;;  %v6115_v51 = vadd.s32 4294967294, %v2078_v14  ;;  %v7932_v24 = vsub.s32 32, %v7800_v25  ;;  %v1841_v33 = vsel %vm1835_vm5, %v1838_v19, %v1840_v3  ;;  %v10727_v14 = vld [vmem:[#allocation35_spill] sm:$0xff] }
 0x16d   :  { %6508 = vsinq.f32 %v1994_v28  ;;  %v10505_v22 = vand.u32 2147483647, %v10725_v21  ;;  %v10726_v17 = vand.u32 2139095040, %v10715_v11  ;;  %vm2012_vm8 = vcmp.lt.s32.totalorder %v10706_v38, 0 }
 0x16e   :  { %vm6116_vm6 = vcmp.lt.s32.totalorder %v6115_v51, 0  ;;  %vm1859_vm9 = vc.u32 %v7912_v31, %v7920_v47  ;;  %v7945_v56 = vand.u32 3, %v7929_v50  ;;  %v2066_v10 = vadd.s32 %v7785_v2, %v7770_v9 }
 0x16f   :  { %v7939_v54 = vshrl.u32 %v10726_v17, 23  ;;  %v2081_v18 = vsel %vm6116_vm6, 0, %v6115_v51  ;;  %v1860_v6 = vadd.s32 1, %v7921_v15  ;;  %v2096_v42 = vsub.s32 4, %v7844_v52 }
 0x170   :  { %v2082_v53 = vsub.s32 32, %v2081_v18  ;;  %v2086_v23 = vsub.s32 4294967266, %v2081_v18  ;;  %v1857_v19 = vmul.u32 %v1850_v35, %v1841_v33  ;;  %v7954_v5 = vand.u32 8388607, %v10505_v22 }
 0x171   :  { %v1861_v3 = vsel %vm1859_vm9, %v1860_v6, %v7921_v15  ;;  %v1611_v32 = vshll.u32 %v10665_v4, %v6996_v8  ;;  %v1612_v9 = vshrl.u32 %v10666_v7, %v10727_v14  ;;  %v2083_v2 = vshll.u32 %v7871_v45, %v2081_v18 }
 0x172   :  { %v2084_v1 = vshrl.u32 %v2066_v10, %v2082_v53  ;;  %v2087_v28 = vadd.s32 127, %v2086_v23  ;;  %v1862_v51 = vadd.s32 %v1861_v3, %v1857_v19  ;;  %vm4484_vm10 = vcmp.eq.s32.totalorder %v7945_v56, 2 }
 0x173   :  { %v1615_v35 = vshrl.u32 %v10667_v30, %v10727_v14  ;;  %v1618_v15 = vshrl.u32 %v10664_v39, %v10727_v14  ;;  %v1620_v33 = vshll.u32 %v10664_v39, %v6996_v8  ;;  %v1621_v17 = vshrl.u32 %v10668_v48, %v10727_v14 }
 0x174   :  { %vm4481_vm12 = vcmp.eq.s32.totalorder %v7945_v56, 0  ;;  %v2085_v45 = vor.u32 %v2084_v1, %v2083_v2  ;;  %v2088_v10 = vshll.u32 %v2087_v28, 23  ;;  %v1863_v18 = vadd.s32 536870912, %v1862_v51 }
 0x175   :  { %v1614_v6 = vshll.u32 %v10666_v7, %v6996_v8  ;;  %vm4480_vm14 = vcmp.lt.s32.totalorder %v7945_v56, 2  ;;  %v1617_v53 = vshll.u32 %v10667_v30, %v6996_v8  ;;  %v1622_v23 = vor.u32 %v1621_v17, %v1620_v33 }
 0x176   :  { %v1623_v19 = vshll.u32 %v10668_v48, %v6996_v8  ;;  %v1624_v3 = vshrl.u32 %v10669_v60, %v10727_v14  ;;  %vm10521_vm0 = vweird.f32 %v6769_v55  ;;  %v10728_v2 = vand.u32 2147483647, %v10706_v38 }
 0x177   :  { %v2089_v28 = vor.u32 4788187, %v2088_v10  ;;  %v2097_v22 = vsel %vm2012_vm8, %v2096_v42, %v7844_v52  ;;  %v7990_v33 = vshrl.u32 %v1863_v18, 30  ;;  %v1610_v8 = vshrl.u32 %v10665_v4, %v10727_v14 }
 0x178   :  { %vm7983_vm2 = vcmp.le.f32.partialorder %v10728_v2, 0.7853982  ;;  %v1613_v17 = vor.u32 %v1612_v9, %v1611_v32  ;;  %v1616_v43 = vor.u32 %v1615_v35, %v1614_v6  ;;  %v1619_v50 = vor.u32 %v1618_v15, %v1617_v53 }
 0x179   :  { %v1625_v62 = vor.u32 %v1624_v3, %v1623_v19  ;;  %v2090_v61 = vand.u32 2147483647, %v2089_v28  ;;  %v2092_v29 = vcvt.s32.f32 %v2085_v45  ;;  %v1865_v2 = vshll.u32 %v7990_v33, 30  ;;  %v7996_v10 = vpop.eup %6506 }
 0x17a   :  { %vm1629_vm3 = vcmp.lt.s32.totalorder %v10731_v0, 4  ;;  %10732 = vst [vmem:[#allocation26_spill] sm:$0xff] %v7996_v10  ;;  %v1602_v20 = vor.u32 8388608, %v7954_v5  ;;  %vm1626_vm4 = vcmp.lt.s32.totalorder %v10731_v0, 1  ;;  %vm1627_vm5 = vcmp.lt.s32.totalorder %v10731_v0, 2  ;;  %v8001_v42 = vpop.eup %6508 }
 0x17b   :  { %v1635_v52 = vsel %vm1629_vm3, %v1622_v23, 920167782  ;;  %10733 = vst [vmem:[#allocation35_spill] sm:$0xff] %v8001_v42  ;;  %v10515_v32 = vxor.u32 2147483648, %v7996_v10  ;;  %v2093_v14 = vmul.f32 %v2092_v29, %v2090_v61  ;;  %v8004_v9 = vsub.s32 %v1862_v51, %v1865_v2 }
 0x17c   :  { %v1639_v35 = vsel %vm1629_vm3, %v1625_v62, 1326507024  ;;  %v10516_v15 = vxor.u32 2147483648, %v8001_v42  ;;  %vm1628_vm6 = vcmp.lt.s32.totalorder %v10731_v0, 3  ;;  %v1630_v5 = vsel %vm1626_vm4, %v1610_v8, %v1613_v17  ;;  %v10736_v0 = vld [vmem:[#allocation20_spill] sm:$0xff] }
 0x17d   :  { %v1631_v45 = vsel %vm1629_vm3, %v1619_v50, 2102212464  ;;  %v4486_v18 = vsel %vm4484_vm10, %v10515_v32, %v8001_v42  ;;  %v2094_v6 = vxor.u32 2147483648, %v2093_v14  ;;  %v1868_v29 = vsub.s32 0, %v8004_v9 }
 0x17e   :  { %v1638_v62 = vsel %vm1626_vm4, %v1616_v43, %v1619_v50  ;;  %v4483_v61 = vsel %vm4481_vm12, %v7996_v10, %v10516_v15  ;;  %v1634_v51 = vsel %vm1626_vm4, %v1613_v17, %v1616_v43  ;;  %v1636_v53 = vsel %vm1628_vm6, %v1619_v50, %v1635_v52  ;;  %v10742_v10 = vld [vmem:[#allocation36_spill] sm:$0xff] }
 0x17f   :  { %v1640_v19 = vsel %vm1628_vm6, %v1622_v23, %v1639_v35  ;;  %v4487_v3 = vsel %vm4480_vm14, %v4483_v61, %v4486_v18  ;;  %v2095_v28 = vsel %vm2012_vm8, %v2094_v6, %v2093_v14  ;;  %v6106_v8 = vmin.u32 %v1868_v29, %v8004_v9 }
 0x180   :  { %v1632_v2 = vsel %vm1628_vm6, %v1616_v43, %v1631_v45  ;;  %v4488_v32 = vsel %vm10521_vm0, nan, %v4487_v3  ;;  %v2098_v15 = vsel %vm7983_vm2, %v10706_v38, %v2095_v28  ;;  %v8037_v50 = vsel %vm7983_vm2, 0, %v2097_v22 }
 0x181   :  { %10734 = vst [vmem:[#allocation33_spill] sm:$0xff] %v8037_v50  ;;  %v1641_v56 = vsel %vm1627_vm5, %v1638_v62, %v1640_v19  ;;  %5251 = vmatprep.subr.mxu0 %v4488_v32  ;;  %6510 = vcosq.f32 %v2098_v15  ;;  %v1870_v23 = vclz %v6106_v8  ;;  %v1637_v43 = vsel %vm1627_vm5, %v1634_v51, %v1636_v53  ;;  %v10735_v32 = vld [vmem:[#allocation10_spill] sm:$0xff] }
 0x182   :  { %v1642_v17 = vshll.u32 %v1602_v20, 8  ;;  %v8044_v52 = vadd.s32 1, %v7803_v34  ;;  %6512 = vsinq.f32 %v2098_v15  ;;  %v1888_v14 = vsub.s32 4, %v7990_v33 }
 0x183   :  { %v1633_v22 = vsel %vm1627_vm5, %v1630_v5, %v1632_v2  ;;  %v6107_v1 = vadd.s32 4294967294, %v1870_v23  ;;  %v10517_v18 = vand.u32 2147483647, %v10735_v32  ;;  %v8054_v6 = vadd.s32 1, %v7915_v37 }
 0x184   :  { %v8049_v35 = vmul.u32.u64.low %v1642_v17, %v1641_v56  ;;  %v8050_v45 = vmul.u32.u64.high %v1642_v17, %v1641_v56, %v8049_v35  ;;  %v8057_v20 = vand.u32 3, %v8037_v50  ;;  %v8064_v15 = vadd.s32 4294967169, %v7939_v54 }
 0x185   :  { %v8059_v34 = vmul.u32.u64.low %v1642_v17, %v1637_v43  ;;  %v8060_v29 = vmul.u32.u64.high %v1642_v17, %v1637_v43, %v8059_v34  ;;  %vm1804_vm8 = vcmp.lt.s32.totalorder %v10714_v46, 0  ;;  %vm6108_vm9 = vcmp.lt.s32.totalorder %v6107_v1, 0 }
 0x186   :  { %v1858_v62 = vadd.s32 %v7920_v47, %v7912_v31  ;;  %v1873_v37 = vsel %vm6108_vm9, 0, %v6107_v1  ;;  %v8073_v61 = vsel %vm1804_vm8, %v1888_v14, %v7990_v33  ;;  %v1649_v51 = vmul.u32 %v1642_v17, %v1633_v22 }
 0x187   :  { %v1874_v53 = vsub.s32 32, %v1873_v37  ;;  %v1878_v19 = vsub.s32 4294967266, %v1873_v37  ;;  %v8077_v54 = vand.u32 8388607, %v10517_v18  ;;  %v1714_v3 = vshrl.u32 %v10665_v4, %v7130_v40 }
 0x188   :  { %vm4587_vm10 = vcmp.eq.s32.totalorder %v8057_v20, 2  ;;  %vm1651_vm12 = vc.u32 %v8050_v45, %v8059_v34  ;;  %v1652_v31 = vadd.s32 1, %v8060_v29  ;;  %v1715_v47 = vshll.u32 %v10665_v4, %v7040_v16 }
 0x189   :  { %v1716_v33 = vshrl.u32 %v10666_v7, %v7130_v40  ;;  %vm4584_vm14 = vcmp.eq.s32.totalorder %v8057_v20, 0  ;;  %v1875_v28 = vshll.u32 %v8004_v9, %v1873_v37  ;;  %v1876_v8 = vshrl.u32 %v1858_v62, %v1874_v53 }
 0x18a   :  { %v1879_v2 = vadd.s32 127, %v1878_v19  ;;  %v1719_v56 = vshrl.u32 %v10667_v30, %v7130_v40  ;;  %vm4583_vm2 = vcmp.lt.s32.totalorder %v8057_v20, 2  ;;  %v1653_v23 = vsel %vm1651_vm12, %v1652_v31, %v8060_v29 }
 0x18b   :  { %v1722_v43 = vshrl.u32 %v10664_v39, %v7130_v40  ;;  %v1724_v17 = vshll.u32 %v10664_v39, %v7040_v16  ;;  %v1725_v14 = vshrl.u32 %v10668_v48, %v7130_v40  ;;  %vm877_vm3 = vcmp.gt.s32.totalorder %v8044_v52, 0 }
 0x18c   :  { %vm2102_vm4 = vweird.f32 %v10706_v38  ;;  %v1877_v9 = vor.u32 %v1876_v8, %v1875_v28  ;;  %v1880_v22 = vshll.u32 %v1879_v2, 23  ;;  %v1654_v1 = vadd.s32 %v1653_v23, %v1649_v51 }
 0x18d   :  { %v1718_v35 = vshll.u32 %v10666_v7, %v7040_v16  ;;  %vm981_vm5 = vcmp.gt.s32.totalorder %v8054_v6, 0  ;;  %v1721_v29 = vshll.u32 %v10667_v30, %v7040_v16  ;;  %v1726_v62 = vor.u32 %v1725_v14, %v1724_v17 }
 0x18e   :  { %v1727_v37 = vshll.u32 %v10668_v48, %v7040_v16  ;;  %v1728_v53 = vshrl.u32 %v10669_v60, %v7130_v40  ;;  %v10737_v19 = vand.u32 2147483647, %v10714_v46  ;;  %v1881_v51 = vor.u32 4788187, %v1880_v22  ;;  %v8118_v23 = vpop.eup %6510 }
 0x18f   :  { %v1655_v28 = vadd.s32 536870912, %v1654_v1  ;;  %v1717_v8 = vor.u32 %v1716_v33, %v1715_v47  ;;  %v1720_v2 = vor.u32 %v1719_v56, %v1718_v35  ;;  %10740 = vst [vmem:[#allocation49_spill] sm:$0xff] %v8118_v23  ;;  %v1884_v18 = vcvt.s32.f32 %v1877_v9  ;;  %v8121_v5 = vpop.eup %6512 }
 0x190   :  { %vm8114_vm6 = vcmp.le.f32.partialorder %v10737_v19, 0.7853982  ;;  %v1706_v17 = vor.u32 8388608, %v8077_v54  ;;  %v1723_v14 = vor.u32 %v1722_v43, %v1721_v29  ;;  %v1729_v16 = vor.u32 %v1728_v53, %v1727_v37  ;;  %10741 = vst [vmem:[#allocation50_spill] sm:$0xff] %v8121_v5 }
 0x191   :  { %v10522_v40 = vxor.u32 2147483648, %v8118_v23  ;;  %v1882_v55 = vand.u32 2147483647, %v1881_v51  ;;  %v8124_v19 = vshrl.u32 %v1655_v28, 30  ;;  %vm1733_vm9 = vcmp.lt.s32.totalorder %v10742_v10, 4 }
 0x192   :  { %v10523_v22 = vxor.u32 2147483648, %v8121_v5  ;;  %vm1730_vm12 = vcmp.lt.s32.totalorder %v10742_v10, 1  ;;  %vm1732_vm0 = vcmp.lt.s32.totalorder %v10742_v10, 3  ;;  %v1739_v47 = vsel %vm1733_vm9, %v1726_v62, 920167782 }
 0x193   :  { %v4589_v54 = vsel %vm4587_vm10, %v10522_v40, %v8121_v5  ;;  %v1885_v33 = vmul.f32 %v1884_v18, %v1882_v55  ;;  %v1657_v56 = vshll.u32 %v8124_v19, 30  ;;  %v1738_v43 = vsel %vm1730_vm12, %v1717_v8, %v1720_v2 }
 0x194   :  { %v4586_v9 = vsel %vm4584_vm14, %v8118_v23, %v10523_v22  ;;  %v1735_v35 = vsel %vm1733_vm9, %v1723_v14, 2102212464  ;;  %v1742_v29 = vsel %vm1730_vm12, %v1720_v2, %v1723_v14  ;;  %v1743_v37 = vsel %vm1733_vm9, %v1729_v16, 1326507024 }
 0x195   :  { %v4590_v53 = vsel %vm4583_vm2, %v4586_v9, %v4589_v54  ;;  %v1886_v55 = vxor.u32 2147483648, %v1885_v33  ;;  %v8147_v18 = vsub.s32 %v1654_v1, %v1657_v56  ;;  %v1740_v51 = vsel %vm1732_vm0, %v1723_v14, %v1739_v47 }
 0x196   :  { %v4591_v28 = vsel %vm2102_vm4, nan, %v4590_v53  ;;  %vm1731_vm10 = vcmp.lt.s32.totalorder %v10742_v10, 2  ;;  %v1734_v40 = vsel %vm1730_vm12, %v1714_v3, %v1717_v8  ;;  %v1744_v16 = vsel %vm1732_vm0, %v1726_v62, %v1743_v37 }
 0x197   :  { %6304 = vmatprep.subr.mxu1 %v4591_v28  ;;  %v1887_v20 = vsel %vm1804_vm8, %v1886_v55, %v1885_v33  ;;  %v1660_v1 = vsub.s32 0, %v8147_v18  ;;  %v1736_v14 = vsel %vm1732_vm0, %v1720_v2, %v1735_v35  ;;  %v1745_v47 = vsel %vm1731_vm10, %v1742_v29, %v1744_v16  ;;  %v10747_v55 = vld [vmem:[#allocation22_spill] sm:$0xff] }
 0x198   :  { %v878_v54 = vsel %vm877_vm3, %v8044_v52, 0  ;;  %v1890_v3 = vsel %vm8114_vm6, %v10714_v46, %v1887_v20  ;;  %6305 = vmatpush3.msra.mxu1 %v4591_v28  ;;  %v1741_v62 = vsel %vm1731_vm10, %v1738_v43, %v1740_v51  ;;  %v1746_v8 = vshll.u32 %v1706_v17, 8 }
 0x199   :  { %v982_v2 = vsel %vm981_vm5, %v8054_v6, 0  ;;  %v8179_v33 = vsel %vm8114_vm6, 0, %v8073_v61  ;;  %6514 = vcosq.f32 %v1890_v3  ;;  %v6098_v52 = vmin.u32 %v1660_v1, %v8147_v18  ;;  %v10744_v6 = vld [vmem:[#allocation8_spill] sm:$0xff]  ;;  %v10746_v61 = vld [vmem:[#allocation21_spill] sm:$0xff] }
 0x19a   :  { %10743 = vst [vmem:[#allocation36_spill] sm:$0xff] %v8179_v33  ;;  %6516 = vsinq.f32 %v1890_v3  ;;  %v1737_v56 = vsel %vm1731_vm10, %v1734_v40, %v1736_v14  ;;  %v8184_v9 = vmul.u32.u64.low %v1746_v8, %v1745_v47  ;;  %v8185_v35 = vmul.u32.u64.high %v1746_v8, %v1745_v47, %v8184_v9 }
 0x19b   :  { %v1662_v17 = vclz %v6098_v52  ;;  %v8187_v43 = vmul.u32.u64.low %v1746_v8, %v1741_v62  ;;  %v8188_v29 = vmul.u32.u64.high %v1746_v8, %v1741_v62, %v8187_v43  ;;  %v10524_v37 = vand.u32 2147483647, %v10744_v6  ;;  %v10748_v62 = vld [vmem:[#allocation34_spill] sm:$0xff] }
 0x19c   :  { %v8192_v31 = vshrl.u32 %v878_v54, 5  ;;  %v8197_v28 = vand.u32 3, %v8179_v33  ;;  %v8199_v10 = vand.u32 31, %v878_v54  ;;  %v8201_v40 = vshrl.u32 %v982_v2, 5 }
 0x19d   :  { %v8203_v16 = vand.u32 31, %v982_v2  ;;  %v6099_v20 = vadd.s32 4294967294, %v1662_v17  ;;  %v1650_v1 = vadd.s32 %v8059_v34, %v8050_v45  ;;  %v1753_v47 = vmul.u32 %v1746_v8, %v1737_v56  ;;  %v10749_v34 = vld [vmem:[#allocation31_spill] sm:$0xff] }
 0x19e   :  { %10745 = vst [vmem:[#allocation51_spill] sm:$0xff] %v8192_v31  ;;  %vm1755_vm0 = vc.u32 %v8185_v35, %v8187_v43  ;;  %v1756_v3 = vadd.s32 1, %v8188_v29  ;;  %v8213_v54 = vand.u32 8388607, %v10524_v37  ;;  %v8217_v2 = vshrl.u32 %v10665_v4, %v10748_v62 }
 0x19f   :  { %vm6100_vm8 = vcmp.lt.s32.totalorder %v6099_v20, 0  ;;  %vm4381_vm14 = vcmp.eq.s32.totalorder %v8197_v28, 2  ;;  %v1507_v8 = vshll.u32 %v10665_v4, %v10749_v34  ;;  %v1508_v52 = vshrl.u32 %v10666_v7, %v10748_v62 }
 0x1a0   :  { %v1665_v45 = vsel %vm6100_vm8, 0, %v6099_v20  ;;  %v1511_v56 = vshrl.u32 %v10667_v30, %v10748_v62  ;;  %vm4378_vm2 = vcmp.eq.s32.totalorder %v8197_v28, 0  ;;  %v1757_v22 = vsel %vm1755_vm0, %v1756_v3, %v8188_v29 }
 0x1a1   :  { %v1666_v9 = vsub.s32 32, %v1665_v45  ;;  %v1670_v17 = vsub.s32 4294967266, %v1665_v45  ;;  %v1510_v37 = vshll.u32 %v10666_v7, %v10749_v34  ;;  %vm4377_vm3 = vcmp.lt.s32.totalorder %v8197_v28, 2 }
 0x1a2   :  { %v1758_v20 = vadd.s32 %v1757_v22, %v1753_v47  ;;  %v1514_v51 = vshrl.u32 %v10664_v39, %v10748_v62  ;;  %v1516_v53 = vshll.u32 %v10664_v39, %v10749_v34  ;;  %v1517_v14 = vshrl.u32 %v10668_v48, %v10748_v62 }
 0x1a3   :  { %vm10546_vm5 = vweird.f32 %v10714_v46  ;;  %v1667_v38 = vshll.u32 %v8147_v18, %v1665_v45  ;;  %v1668_v29 = vshrl.u32 %v1650_v1, %v1666_v9  ;;  %v1671_v3 = vadd.s32 127, %v1670_v17 }
 0x1a4   :  { %v1520_v42 = vshrl.u32 %v10669_v60, %v10748_v62  ;;  %v1759_v23 = vadd.s32 536870912, %v1758_v20  ;;  %v1509_v22 = vor.u32 %v1508_v52, %v1507_v8  ;;  %v1512_v47 = vor.u32 %v1511_v56, %v1510_v37  ;;  %v10751_v8 = vld [vmem:[#allocation32_spill] sm:$0xff] }
 0x1a5   :  { %v1513_v5 = vshll.u32 %v10667_v30, %v10749_v34  ;;  %vm1596_vm6 = vcmp.lt.s32.totalorder %v10725_v21, 0  ;;  %v1669_v50 = vor.u32 %v1668_v29, %v1667_v38  ;;  %v1672_v33 = vshll.u32 %v1671_v3, 23 }
 0x1a6   :  { %v1518_v36 = vor.u32 %v1517_v14, %v1516_v53  ;;  %v1519_v31 = vshll.u32 %v10668_v48, %v10749_v34  ;;  %v8246_v18 = vpop.eup %6514  ;;  %v8248_v1 = vshrl.u32 %v1759_v23, 30  ;;  %v1498_v62 = vor.u32 8388608, %v8213_v54 }
 0x1a7   :  { %10750 = vst [vmem:[#allocation21_spill] sm:$0xff] %v8246_v18  ;;  %v1515_v45 = vor.u32 %v1514_v51, %v1513_v5  ;;  %vm1522_vm9 = vcmp.lt.s32.totalorder %v10751_v8, 1  ;;  %v8252_v37 = vpop.eup %6516  ;;  %v10536_v52 = vxor.u32 2147483648, %v8246_v18  ;;  %v1673_v56 = vor.u32 4788187, %v1672_v33 }
 0x1a8   :  { %10752 = vst [vmem:[#allocation22_spill] sm:$0xff] %v8252_v37  ;;  %v1521_v38 = vor.u32 %v1520_v42, %v1519_v31  ;;  %vm1524_vm12 = vcmp.lt.s32.totalorder %v10751_v8, 3  ;;  %v10537_v53 = vxor.u32 2147483648, %v8252_v37  ;;  %v1761_v14 = vshll.u32 %v8248_v1, 30 }
 0x1a9   :  { %vm1525_vm10 = vcmp.lt.s32.totalorder %v10751_v8, 4  ;;  %v1530_v23 = vsel %vm1522_vm9, %v1509_v22, %v1512_v47  ;;  %v4383_v5 = vsel %vm4381_vm14, %v10536_v52, %v8252_v37  ;;  %v1674_v51 = vand.u32 2147483647, %v1673_v56 }
 0x1aa   :  { %v1676_v33 = vcvt.s32.f32 %v1669_v50  ;;  %v1531_v42 = vsel %vm1525_vm10, %v1518_v36, 920167782  ;;  %v4380_v31 = vsel %vm4378_vm2, %v8246_v18, %v10537_v53  ;;  %v8273_v54 = vsub.s32 %v1758_v20, %v1761_v14 }
 0x1ab   :  { %vm1523_vm0 = vcmp.lt.s32.totalorder %v10751_v8, 2  ;;  %v1532_v34 = vsel %vm1524_vm12, %v1515_v45, %v1531_v42  ;;  %v4384_v9 = vsel %vm4377_vm3, %v4380_v31, %v4383_v5  ;;  %v1527_v17 = vsel %vm1525_vm10, %v1515_v45, 2102212464 }
 0x1ac   :  { %v1677_v50 = vmul.f32 %v1676_v33, %v1674_v51  ;;  %v1534_v29 = vsel %vm1522_vm9, %v1512_v47, %v1515_v45  ;;  %v4385_v3 = vsel %vm10546_vm5, nan, %v4384_v9  ;;  %v1764_v20 = vsub.s32 0, %v8273_v54 }
 0x1ad   :  { %v1533_v56 = vsel %vm1523_vm0, %v1530_v23, %v1532_v34  ;;  %v1535_v14 = vsel %vm1525_vm10, %v1521_v38, 1326507024  ;;  %5252 = vmatpush1.msra.mxu0 %v4385_v3  ;;  %v10753_v28 = vand.u32 2147483647, %v10725_v21  ;;  %v1538_v45 = vshll.u32 %v1498_v62, 8 }
 0x1ae   :  { %v1678_v5 = vxor.u32 2147483648, %v1677_v50  ;;  %v1536_v51 = vsel %vm1524_vm12, %v1518_v36, %v1535_v14  ;;  %v10754_v33 = vsub.s32 4, %v8124_v19  ;;  %v6102_v23 = vmin.u32 %v1764_v20, %v8273_v54 }
 0x1af   :  { %vm1595_vm8 = vcmp.le.f32.partialorder %v10753_v28, 0.7853982  ;;  %v1526_v38 = vsel %vm1522_vm9, %v8217_v2, %v1509_v22  ;;  %v1528_v31 = vsel %vm1524_vm12, %v1512_v47, %v1527_v17  ;;  %v1537_v36 = vsel %vm1523_vm0, %v1534_v29, %v1536_v51 }
 0x1b0   :  { %v1681_v42 = vsel %vm1596_vm6, %v10754_v33, %v8124_v19  ;;  %v1679_v34 = vsel %vm1596_vm6, %v1678_v5, %v1677_v50  ;;  %v8310_v62 = vmul.u32.u64.low %v1538_v45, %v1533_v56  ;;  %v8311_v9 = vmul.u32.u64.high %v1538_v45, %v1533_v56, %v8310_v62 }
 0x1b1   :  { %v1682_v19 = vsel %vm1595_vm8, %v10725_v21, %v1679_v34  ;;  %v1766_v3 = vclz %v6102_v23  ;;  %v8315_v20 = vmul.u32.u64.low %v1538_v45, %v1537_v36  ;;  %v8316_v14 = vmul.u32.u64.high %v1538_v45, %v1537_v36, %v8315_v20 }
 0x1b2   :  { %v8319_v2 = vadd.s32 1, %v8064_v15  ;;  %v8321_v22 = vsel %vm1595_vm8, 0, %v1681_v42  ;;  %6518 = vcosq.f32 %v1682_v19  ;;  %v1529_v47 = vsel %vm1523_vm0, %v1526_v38, %v1528_v31 }
 0x1b3   :  { %10755 = vst [vmem:[#allocation34_spill] sm:$0xff] %v8321_v22  ;;  %v10756_v50 = vand.u32 2139095040, %v10736_v0  ;;  %v10757_v29 = vand.u32 2139095040, %v10746_v61  ;;  %6520 = vsinq.f32 %v1682_v19  ;;  %v6103_v28 = vadd.s32 4294967294, %v1766_v3 }
 0x1b4   :  { %v8332_v5 = vsub.s32 32, %v8199_v10  ;;  %v10758_v15 = vand.u32 2139095040, %v10747_v55  ;;  %v1784_v33 = vsub.s32 4, %v8248_v1  ;;  %v1548_v8 = vadd.s32 1, %v8311_v9 }
 0x1b5   :  { %v558_v17 = vshrl.u32 %v10756_v50, 23  ;;  %v8329_v56 = vshrl.u32 %v10757_v29, 23  ;;  %v8341_v42 = vand.u32 3, %v8321_v22  ;;  %vm6104_vm14 = vcmp.lt.s32.totalorder %v6103_v28, 0 }
 0x1b6   :  { %v8336_v51 = vshrl.u32 %v10758_v15, 23  ;;  %v1545_v23 = vmul.u32 %v1538_v45, %v1529_v47  ;;  %vm1547_vm2 = vc.u32 %v8316_v14, %v8310_v62  ;;  %vm1700_vm3 = vcmp.lt.s32.totalorder %v10735_v32, 0 }
 0x1b7   :  { %v1769_v38 = vsel %vm6104_vm14, 0, %v6103_v28  ;;  %v1549_v31 = vsel %vm1547_vm2, %v1548_v8, %v8311_v9  ;;  %v10538_v34 = vand.u32 2147483647, %v6807_v26  ;;  %v1754_v36 = vadd.s32 %v8187_v43, %v8185_v35 }
 0x1b8   :  { %v1770_v19 = vsub.s32 32, %v1769_v38  ;;  %v1774_v3 = vsub.s32 4294967266, %v1769_v38  ;;  %v1550_v20 = vadd.s32 %v1549_v31, %v1545_v23  ;;  %v8350_v50 = vadd.s32 4294967169, %v558_v17 }
 0x1b9   :  { %v1771_v45 = vshll.u32 %v8273_v54, %v1769_v38  ;;  %v8356_v47 = vsel %vm1700_vm3, %v1784_v33, %v8248_v1  ;;  %v1306_v9 = vshrl.u32 %v10664_v39, %v7925_v41  ;;  %vm4175_vm6 = vcmp.eq.s32.totalorder %v8341_v42, 2 }
 0x1ba   :  { %v1772_v29 = vshrl.u32 %v1754_v36, %v1770_v19  ;;  %v1775_v28 = vadd.s32 127, %v1774_v3  ;;  %v1551_v35 = vadd.s32 536870912, %v1550_v20  ;;  %v1309_v43 = vshrl.u32 %v10668_v48, %v7925_v41 }
 0x1bb   :  { %vm4172_vm9 = vcmp.eq.s32.totalorder %v8341_v42, 0  ;;  %v1289_v54 = vand.u32 8388607, %v10538_v34  ;;  %v1300_v1 = vshrl.u32 %v10666_v7, %v7925_v41  ;;  %v1303_v17 = vshrl.u32 %v10667_v30, %v7925_v41 }
 0x1bc   :  { %v1308_v15 = vshll.u32 %v10664_v39, %v7796_v57  ;;  %vm4171_vm12 = vcmp.lt.s32.totalorder %v8341_v42, 2  ;;  %v1773_v33 = vor.u32 %v1772_v29, %v1771_v45  ;;  %v1776_v8 = vshll.u32 %v1775_v28, 23 }
 0x1bd   :  { %v8373_v23 = vshrl.u32 %v1551_v35, 30  ;;  %v1305_v38 = vshll.u32 %v10667_v30, %v7796_v57  ;;  %vm10550_vm10 = vweird.f32 %v10725_v21  ;;  %v1299_v31 = vshll.u32 %v10665_v4, %v7796_v57 }
 0x1be   :  { %v1302_v36 = vshll.u32 %v10666_v7, %v7796_v57  ;;  %v1310_v19 = vor.u32 %v1309_v43, %v1308_v15  ;;  %v1312_v3 = vshrl.u32 %v10669_v60, %v7925_v41  ;;  %v10759_v45 = vand.u32 2147483647, %v10735_v32 }
 0x1bf   :  { %v1777_v28 = vor.u32 4788187, %v1776_v8  ;;  %v1553_v35 = vshll.u32 %v8373_v23, 30  ;;  %v1298_v52 = vshrl.u32 %v10665_v4, %v7925_v41  ;;  %v1307_v53 = vor.u32 %v1306_v9, %v1305_v38  ;;  %v8395_v15 = vpop.eup %6518 }
 0x1c0   :  { %vm8386_vm0 = vcmp.le.f32.partialorder %v10759_v45, 0.7853982  ;;  %v1290_v34 = vor.u32 8388608, %v1289_v54  ;;  %v1301_v46 = vor.u32 %v1300_v1, %v1299_v31  ;;  %v1304_v18 = vor.u32 %v1303_v17, %v1302_v36  ;;  %10762 = vst [vmem:[#allocation31_spill] sm:$0xff] %v8395_v15  ;;  %v8400_v8 = vpop.eup %6520 }
 0x1c1   :  { %v1311_v43 = vshll.u32 %v10668_v48, %v7796_v57  ;;  %v1778_v37 = vand.u32 2147483647, %v1777_v28  ;;  %v1780_v45 = vcvt.s32.f32 %v1773_v33  ;;  %v8397_v22 = vsub.s32 %v1550_v20, %v1553_v35  ;;  %10763 = vst [vmem:[#allocation32_spill] sm:$0xff] %v8400_v8 }
 0x1c2   :  { %vm1317_vm8 = vcmp.lt.s32.totalorder %v7790_v13, 4  ;;  %v10547_v0 = vxor.u32 2147483648, %v8395_v15  ;;  %vm1314_vm14 = vcmp.lt.s32.totalorder %v7790_v13, 1  ;;  %v10548_v57 = vxor.u32 2147483648, %v8400_v8 }
 0x1c3   :  { %v1313_v41 = vor.u32 %v1312_v3, %v1311_v43  ;;  %v1323_v9 = vsel %vm1317_vm8, %v1310_v19, 920167782  ;;  %v1781_v54 = vmul.f32 %v1780_v45, %v1778_v37  ;;  %v1556_v1 = vsub.s32 0, %v8397_v22 }
 0x1c4   :  { %v1319_v20 = vsel %vm1317_vm8, %v1307_v53, 2102212464  ;;  %v4177_v17 = vsel %vm4175_vm6, %v10547_v0, %v8400_v8  ;;  %vm1315_vm2 = vcmp.lt.s32.totalorder %v7790_v13, 2  ;;  %vm1316_vm5 = vcmp.lt.s32.totalorder %v7790_v13, 3 }
 0x1c5   :  { %v1322_v33 = vsel %vm1314_vm14, %v1301_v46, %v1304_v18  ;;  %v4174_v37 = vsel %vm4172_vm9, %v8395_v15, %v10548_v57  ;;  %v1782_v38 = vxor.u32 2147483648, %v1781_v54  ;;  %v6094_v31 = vmin.u32 %v1556_v1, %v8397_v22 }
 0x1c6   :  { %v1324_v36 = vsel %vm1316_vm5, %v1307_v53, %v1323_v9  ;;  %v4178_v3 = vsel %vm4171_vm12, %v4174_v37, %v4177_v17  ;;  %v1318_v28 = vsel %vm1314_vm14, %v1298_v52, %v1301_v46  ;;  %v1320_v35 = vsel %vm1316_vm5, %v1304_v18, %v1319_v20 }
 0x1c7   :  { %v1326_v43 = vsel %vm1314_vm14, %v1304_v18, %v1307_v53  ;;  %v4179_v45 = vsel %vm10550_vm10, nan, %v4178_v3  ;;  %v1783_v1 = vsel %vm1700_vm3, %v1782_v38, %v1781_v54  ;;  %v1558_v0 = vclz %v6094_v31 }
 0x1c8   :  { %v1327_v42 = vsel %vm1317_vm8, %v1313_v41, 1326507024  ;;  %5253 = vmatprep.subr.mxu0 %v4179_v45  ;;  %v1786_v46 = vsel %vm8386_vm0, %v10735_v32, %v1783_v1  ;;  %v1325_v52 = vsel %vm1315_vm2, %v1322_v33, %v1324_v36  ;;  %v1330_v53 = vshll.u32 %v1290_v34, 8 }
 0x1c9   :  { %v1328_v18 = vsel %vm1316_vm5, %v1310_v19, %v1327_v42  ;;  %v8451_v9 = vsel %vm8386_vm0, 0, %v8356_v47  ;;  %6522 = vcosq.f32 %v1786_v46  ;;  %v6095_v54 = vadd.s32 4294967294, %v1558_v0 }
 0x1ca   :  { %v1329_v41 = vsel %vm1315_vm2, %v1326_v43, %v1328_v18  ;;  %6524 = vsinq.f32 %v1786_v46  ;;  %v1576_v20 = vsub.s32 4, %v8373_v23  ;;  %v1321_v34 = vsel %vm1315_vm2, %v1318_v28, %v1320_v35 }
 0x1cb   :  { %v8456_v17 = vmul.u32.u64.low %v1330_v53, %v1329_v41  ;;  %v8457_v37 = vmul.u32.u64.high %v1330_v53, %v1329_v41, %v8456_v17  ;;  %vm6096_vm3 = vcmp.lt.s32.totalorder %v6095_v54, 0  ;;  %v8466_v47 = vadd.s32 4294967169, %v8329_v56 }
 0x1cc   :  { %v8461_v19 = vmul.u32.u64.low %v1330_v53, %v1325_v52  ;;  %v8462_v33 = vmul.u32.u64.high %v1330_v53, %v1325_v52, %v8461_v19  ;;  %v8469_v0 = vand.u32 3, %v8451_v9  ;;  %v1561_v29 = vsel %vm6096_vm3, 0, %v6095_v54 }
 0x1cd   :  { %v10549_v38 = vand.u32 2147483647, %v6809_v27  ;;  %vm1492_vm5 = vcmp.lt.s32.totalorder %v10744_v6, 0  ;;  %v1546_v31 = vadd.s32 %v8310_v62, %v8316_v14  ;;  %v1562_v13 = vsub.s32 32, %v1561_v29 }
 0x1ce   :  { %v1566_v36 = vsub.s32 4294967266, %v1561_v29  ;;  %v10764_v3 = vand.u32 2147483647, %v10744_v6  ;;  %v1577_v56 = vsel %vm1492_vm5, %v1576_v20, %v8373_v23  ;;  %v1337_v35 = vmul.u32 %v1330_v53, %v1321_v34 }
 0x1cf   :  { %vm1339_vm9 = vc.u32 %v8457_v37, %v8461_v19  ;;  %v1563_v43 = vshll.u32 %v8397_v22, %v1561_v29  ;;  %v1564_v45 = vshrl.u32 %v1546_v31, %v1562_v13  ;;  %v1340_v14 = vadd.s32 1, %v8462_v33 }
 0x1d0   :  { %vm8477_vm6 = vcmp.le.f32.partialorder %v10764_v3, 0.7853982  ;;  %v1567_v62 = vadd.s32 127, %v1566_v36  ;;  %vm4278_vm12 = vcmp.eq.s32.totalorder %v8469_v0, 2  ;;  %v8491_v1 = vand.u32 8388607, %v10549_v38 }
 0x1d1   :  { %v1403_v42 = vshll.u32 %v10665_v4, %v7800_v25  ;;  %v1404_v23 = vshrl.u32 %v10666_v7, %v7932_v24  ;;  %v1407_v46 = vshrl.u32 %v10667_v30, %v7932_v24  ;;  %vm4275_vm0 = vcmp.eq.s32.totalorder %v8469_v0, 0 }
 0x1d2   :  { %v1565_v22 = vor.u32 %v1564_v45, %v1563_v43  ;;  %v1568_v52 = vshll.u32 %v1567_v62, 23  ;;  %v1341_v18 = vsel %vm1339_vm9, %v1340_v14, %v8462_v33  ;;  %v1410_v53 = vshrl.u32 %v10664_v39, %v7932_v24 }
 0x1d3   :  { %vm1085_vm8 = vcmp.gt.s32.totalorder %v8319_v2, 0  ;;  %vm4274_vm14 = vcmp.lt.s32.totalorder %v8469_v0, 2  ;;  %v1342_v54 = vadd.s32 %v1341_v18, %v1337_v35  ;;  %v1406_v41 = vshll.u32 %v10666_v7, %v7800_v25 }
 0x1d4   :  { %v1412_v20 = vshll.u32 %v10664_v39, %v7800_v25  ;;  %v1413_v17 = vshrl.u32 %v10668_v48, %v7932_v24  ;;  %vm10598_vm2 = vweird.f32 %v10735_v32  ;;  %v1569_v34 = vor.u32 4788187, %v1568_v52 }
 0x1d5   :  { %v8514_v33 = vsel %vm8477_vm6, 0, %v1577_v56  ;;  %v1409_v29 = vshll.u32 %v10667_v30, %v7800_v25  ;;  %v1416_v31 = vshrl.u32 %v10669_v60, %v7932_v24  ;;  %v1343_v13 = vadd.s32 536870912, %v1342_v54 }
 0x1d6   :  { %v1405_v36 = vor.u32 %v1404_v23, %v1403_v42  ;;  %v1408_v3 = vor.u32 %v1407_v46, %v1406_v41  ;;  %v1414_v35 = vor.u32 %v1413_v17, %v1412_v20  ;;  %v1570_v43 = vand.u32 2147483647, %v1569_v34  ;;  %v8522_v52 = vpop.eup %6522 }
 0x1d7   :  { %v1572_v45 = vcvt.s32.f32 %v1565_v22  ;;  %v1411_v62 = vor.u32 %v1410_v53, %v1409_v29  ;;  %v1415_v14 = vshll.u32 %v10668_v48, %v7800_v25  ;;  %10767 = vst [vmem:[#allocation52_spill] sm:$0xff] %v8522_v52  ;;  %v1344_v56 = vshrl.u32 %v1343_v13, 30  ;;  %v8528_v38 = vpop.eup %6524 }
 0x1d8   :  { %v1394_v18 = vor.u32 8388608, %v8491_v1  ;;  %v1402_v57 = vshrl.u32 %v10665_v4, %v7932_v24  ;;  %vm1421_vm3 = vcmp.lt.s32.totalorder %v7798_v49, 4  ;;  %v10552_v42 = vxor.u32 2147483648, %v8522_v52 }
 0x1d9   :  { %v1573_v23 = vmul.f32 %v1572_v45, %v1570_v43  ;;  %v1417_v46 = vor.u32 %v1416_v31, %v1415_v14  ;;  %v1427_v22 = vsel %vm1421_vm3, %v1414_v35, 920167782  ;;  %v10553_v25 = vxor.u32 2147483648, %v8528_v38 }
 0x1da   :  { %v1345_v53 = vshll.u32 %v1344_v56, 30  ;;  %vm1418_vm9 = vcmp.lt.s32.totalorder %v7798_v49, 1  ;;  %vm1420_vm10 = vcmp.lt.s32.totalorder %v7798_v49, 3  ;;  %v4280_v24 = vsel %vm4278_vm12, %v10552_v42, %v8528_v38 }
 0x1db   :  { %v1574_v1 = vxor.u32 2147483648, %v1573_v23  ;;  %v1426_v41 = vsel %vm1418_vm9, %v1405_v36, %v1408_v3  ;;  %v1428_v20 = vsel %vm1420_vm10, %v1411_v62, %v1427_v22  ;;  %v4277_v17 = vsel %vm4275_vm0, %v8522_v52, %v10553_v25 }
 0x1dc   :  { %v8550_v34 = vsub.s32 %v1342_v54, %v1345_v53  ;;  %vm1419_vm11 = vcmp.lt.s32.totalorder %v7798_v49, 2  ;;  %v1423_v29 = vsel %vm1421_vm3, %v1411_v62, 2102212464  ;;  %v4281_v31 = vsel %vm4274_vm14, %v4277_v17, %v4280_v24 }
 0x1dd   :  { %v1575_v13 = vsel %vm1492_vm5, %v1574_v1, %v1573_v23  ;;  %v1430_v43 = vsel %vm1418_vm9, %v1408_v3, %v1411_v62  ;;  %v1431_v45 = vsel %vm1421_vm3, %v1417_v46, 1326507024  ;;  %v4282_v54 = vsel %vm10598_vm2, nan, %v4281_v31 }
 0x1de   :  { %v1578_v14 = vsel %vm8477_vm6, %v10744_v6, %v1575_v13  ;;  %v1348_v22 = vsub.s32 0, %v8550_v34  ;;  %v1429_v0 = vsel %vm1419_vm11, %v1426_v41, %v1428_v20  ;;  %v1086_v23 = vsel %vm1085_vm8, %v8319_v2, 0  ;;  %6306 = vmatprep.subr.mxu1 %v4282_v54 }
 0x1df   :  { %6526 = vcosq.f32 %v1578_v14  ;;  %v1432_v62 = vsel %vm1420_vm10, %v1414_v35, %v1431_v45  ;;  %v1434_v46 = vshll.u32 %v1394_v18, 8  ;;  %6307 = vmatpush3.msra.mxu1 %v4282_v54  ;;  %v1422_v53 = vsel %vm1418_vm9, %v1402_v57, %v1405_v36  ;;  %v10768_v54 = vld [vmem:[#allocation11_spill] sm:$0xff] }
 0x1e0   :  { %6528 = vsinq.f32 %v1578_v14  ;;  %v6086_v28 = vmin.u32 %v1348_v22, %v8550_v34  ;;  %v1424_v24 = vsel %vm1420_vm10, %v1408_v3, %v1423_v29  ;;  %v8582_v1 = vand.u32 3, %v8514_v33 }
 0x1e1   :  { %v1433_v2 = vsel %vm1419_vm11, %v1430_v43, %v1432_v62  ;;  %v8586_v41 = vmul.u32.u64.low %v1434_v46, %v1429_v0  ;;  %v8587_v20 = vmul.u32.u64.high %v1434_v46, %v1429_v0, %v8586_v41  ;;  %v1368_v18 = vsub.s32 4, %v1344_v56 }
 0x1e2   :  { %v1350_v35 = vclz %v6086_v28  ;;  %v8590_v17 = vmul.u32.u64.low %v1434_v46, %v1433_v2  ;;  %v8591_v31 = vmul.u32.u64.high %v1434_v46, %v1433_v2, %v8590_v17  ;;  %v8594_v57 = vsub.s32 32, %v8203_v16 }
 0x1e3   :  { %v8596_v36 = vshrl.u32 %v1086_v23, 5  ;;  %v8599_v3 = vadd.s32 4294967169, %v8336_v51  ;;  %v1425_v29 = vsel %vm1419_vm11, %v1422_v53, %v1424_v24  ;;  %v8603_v13 = vand.u32 31, %v1086_v23 }
 0x1e4   :  { %v8606_v43 = vadd.s32 1, %v8350_v50  ;;  %v6087_v45 = vadd.s32 4294967294, %v1350_v35  ;;  %v10554_v14 = vand.u32 2147483647, %v10768_v54  ;;  %v8610_v22 = vadd.s32 1, %v8466_v47 }
 0x1e5   :  { %vm1284_vm10 = vcmp.lt.s32.totalorder %v6807_v26, 0  ;;  %v1338_v51 = vadd.s32 %v8461_v19, %v8457_v37  ;;  %v1444_v0 = vadd.s32 1, %v8587_v20  ;;  %vm4072_vm11 = vcmp.eq.s32.totalorder %v8582_v1, 2 }
 0x1e6   :  { %vm6088_vm5 = vcmp.lt.s32.totalorder %v6087_v45, 0  ;;  %v8619_v49 = vsel %vm1284_vm10, %v1368_v18, %v1344_v56  ;;  %v1441_v50 = vmul.u32 %v1434_v46, %v1425_v29  ;;  %vm1443_vm6 = vc.u32 %v8591_v31, %v8586_v41 }
 0x1e7   :  { %vm4069_vm12 = vcmp.eq.s32.totalorder %v8582_v1, 0  ;;  %v1353_v47 = vsel %vm6088_vm5, 0, %v6087_v45  ;;  %v1445_v23 = vsel %vm1443_vm6, %v1444_v0, %v8587_v20  ;;  %v1195_v37 = vshll.u32 %v10665_v4, %v7403_v44 }
 0x1e8   :  { %v1196_v19 = vshrl.u32 %v10666_v7, %v7646_v12  ;;  %vm4068_vm0 = vcmp.lt.s32.totalorder %v8582_v1, 2  ;;  %v1354_v62 = vsub.s32 32, %v1353_v47  ;;  %v1358_v56 = vsub.s32 4294967266, %v1353_v47 }
 0x1e9   :  { %v1446_v28 = vadd.s32 %v1445_v23, %v1441_v50  ;;  %v1185_v46 = vand.u32 8388607, %v10554_v14  ;;  %vm10566_vm8 = vweird.f32 %v10744_v6  ;;  %v1355_v53 = vshll.u32 %v8550_v34, %v1353_v47 }
 0x1ea   :  { %v1198_v24 = vshll.u32 %v10666_v7, %v7403_v44  ;;  %v1199_v2 = vshrl.u32 %v10667_v30, %v7646_v12  ;;  %v1205_v20 = vshrl.u32 %v10668_v48, %v7646_v12  ;;  %v1356_v35 = vshrl.u32 %v1338_v51, %v1354_v62 }
 0x1eb   :  { %v1359_v18 = vadd.s32 127, %v1358_v56  ;;  %v1447_v17 = vadd.s32 536870912, %v1446_v28  ;;  %v1202_v29 = vshrl.u32 %v10664_v39, %v7646_v12  ;;  %v1197_v45 = vor.u32 %v1196_v19, %v1195_v37 }
 0x1ec   :  { %v1201_v0 = vshll.u32 %v10667_v30, %v7403_v44  ;;  %v1204_v34 = vshll.u32 %v10664_v39, %v7403_v44  ;;  %v1208_v50 = vshrl.u32 %v10669_v60, %v7646_v12  ;;  %v8648_v47 = vpop.eup %6526  ;;  %v10769_v23 = vand.u32 2147483647, %v6807_v26 }
 0x1ed   :  { %v1357_v62 = vor.u32 %v1356_v35, %v1355_v53  ;;  %v1360_v56 = vshll.u32 %v1359_v18, 23  ;;  %v1448_v37 = vshrl.u32 %v1447_v17, 30  ;;  %v1186_v19 = vor.u32 8388608, %v1185_v46  ;;  %v8656_v42 = vpop.eup %6528 }
 0x1ee   :  { %vm8652_vm14 = vcmp.le.f32.partialorder %v10769_v23, 0.7853982  ;;  %v10563_v25 = vxor.u32 2147483648, %v8648_v47  ;;  %v1200_v14 = vor.u32 %v1199_v2, %v1198_v24  ;;  %v1206_v21 = vor.u32 %v1205_v20, %v1204_v34 }
 0x1ef   :  { %v1207_v32 = vshll.u32 %v10668_v48, %v7403_v44  ;;  %v10564_v15 = vxor.u32 2147483648, %v8656_v42  ;;  %v1361_v8 = vor.u32 4788187, %v1360_v56  ;;  %v1449_v23 = vshll.u32 %v1448_v37, 30 }
 0x1f0   :  { %v1203_v52 = vor.u32 %v1202_v29, %v1201_v0  ;;  %v4074_v46 = vsel %vm4072_vm11, %v10563_v25, %v8656_v42  ;;  %vm1210_vm3 = vcmp.lt.s32.totalorder %v7394_v59, 1  ;;  %vm1213_vm9 = vcmp.lt.s32.totalorder %v7394_v59, 4 }
 0x1f1   :  { %v1209_v53 = vor.u32 %v1208_v50, %v1207_v32  ;;  %v4071_v44 = vsel %vm4069_vm12, %v8648_v47, %v10564_v15  ;;  %v1362_v24 = vand.u32 2147483647, %v1361_v8  ;;  %v1364_v2 = vcvt.s32.f32 %v1357_v62 }
 0x1f2   :  { %v8674_v20 = vsub.s32 %v1446_v28, %v1449_v23  ;;  %v4075_v35 = vsel %vm4068_vm0, %v4071_v44, %v4074_v46  ;;  %vm1211_vm11 = vcmp.lt.s32.totalorder %v7394_v59, 2  ;;  %vm1212_vm5 = vcmp.lt.s32.totalorder %v7394_v59, 3 }
 0x1f3   :  { %v1219_v32 = vsel %vm1213_vm9, %v1206_v21, 920167782  ;;  %v4076_v18 = vsel %vm10566_vm8, nan, %v4075_v35  ;;  %v1365_v17 = vmul.f32 %v1364_v2, %v1362_v24  ;;  %v1472_v8 = vsub.s32 4, %v1448_v37 }
 0x1f4   :  { %v1452_v29 = vsub.s32 0, %v8674_v20  ;;  %5254 = vmatpush1.msra.mxu0 %v4076_v18  ;;  %v1218_v28 = vsel %vm1210_vm3, %v1197_v45, %v1200_v14  ;;  %v1220_v1 = vsel %vm1212_vm5, %v1203_v52, %v1219_v32  ;;  %v1222_v0 = vsel %vm1210_vm3, %v1200_v14, %v1203_v52 }
 0x1f5   :  { %v1223_v34 = vsel %vm1213_vm9, %v1209_v53, 1326507024  ;;  %v1366_v50 = vxor.u32 2147483648, %v1365_v17  ;;  %v1215_v56 = vsel %vm1213_vm9, %v1203_v52, 2102212464  ;;  %v8701_v46 = vsel %vm8652_vm14, 0, %v8619_v49 }
 0x1f6   :  { %v6090_v62 = vmin.u32 %v1452_v29, %v8674_v20  ;;  %v1224_v23 = vsel %vm1212_vm5, %v1206_v21, %v1223_v34  ;;  %vm1388_vm6 = vcmp.lt.s32.totalorder %v6809_v27, 0  ;;  %v1194_v44 = vshrl.u32 %v10665_v4, %v7646_v12 }
 0x1f7   :  { %v1225_v53 = vsel %vm1211_vm11, %v1222_v0, %v1224_v23  ;;  %v1367_v24 = vsel %vm1284_vm10, %v1366_v50, %v1365_v17  ;;  %v1221_v21 = vsel %vm1211_vm11, %v1218_v28, %v1220_v1  ;;  %v1226_v2 = vshll.u32 %v1186_v19, 8 }
 0x1f8   :  { %v1454_v52 = vclz %v6090_v62  ;;  %v1370_v49 = vsel %vm8652_vm14, %v6807_v26, %v1367_v24  ;;  %v1473_v35 = vsel %vm1388_vm6, %v1472_v8, %v1448_v37  ;;  %v1214_v12 = vsel %vm1210_vm3, %v1194_v44, %v1197_v45  ;;  %v10772_v8 = vld [vmem:[#allocation23_spill] sm:$0xff] }
 0x1f9   :  { %v1216_v32 = vsel %vm1212_vm5, %v1200_v14, %v1215_v56  ;;  %6530 = vcosq.f32 %v1370_v49  ;;  %v8721_v17 = vmul.u32.u64.low %v1226_v2, %v1225_v53  ;;  %v8722_v29 = vmul.u32.u64.high %v1226_v2, %v1225_v53, %v8721_v17 }
 0x1fa   :  { %v6091_v18 = vadd.s32 4294967294, %v1454_v52  ;;  %6532 = vsinq.f32 %v1370_v49  ;;  %v8724_v19 = vmul.u32.u64.low %v1226_v2, %v1221_v21  ;;  %v8725_v28 = vmul.u32.u64.high %v1226_v2, %v1221_v21, %v8724_v19 }
 0x1fb   :  { %v10565_v51 = vand.u32 2147483647, %v10705_v63  ;;  %v8730_v37 = vadd.s32 1, %v8599_v3  ;;  %v1217_v14 = vsel %vm1211_vm11, %v1214_v12, %v1216_v32  ;;  %v8736_v1 = vsub.s32 32, %v8603_v13 }
 0x1fc   :  { %vm6092_vm10 = vcmp.lt.s32.totalorder %v6091_v18, 0  ;;  %v8739_v0 = vand.u32 3, %v8701_v46  ;;  %v10773_v34 = vand.u32 2147483647, %v6809_v27  ;;  %v1442_v62 = vadd.s32 %v8586_v41, %v8591_v31 }
 0x1fd   :  { %v1457_v3 = vsel %vm6092_vm10, 0, %v6091_v18  ;;  %v1233_v44 = vmul.u32 %v1226_v2, %v1217_v14  ;;  %vm1235_vm0 = vc.u32 %v8722_v29, %v8724_v19  ;;  %v1236_v53 = vadd.s32 1, %v8725_v28 }
 0x1fe   :  { %vm8743_vm12 = vcmp.le.f32.partialorder %v10773_v34, 0.7853982  ;;  %v1458_v56 = vsub.s32 32, %v1457_v3  ;;  %v1462_v23 = vsub.s32 4294967266, %v1457_v3  ;;  %v8758_v24 = vand.u32 8388607, %v10565_v51 }
 0x1ff   :  { %v8751_v59 = vsel %vm8743_vm12, 0, %v1473_v35  ;;  %v1459_v52 = vshll.u32 %v8674_v20, %v1457_v3  ;;  %v988_v31 = vshrl.u32 %v10666_v7, %v8594_v57  ;;  %vm3866_vm14 = vcmp.eq.s32.totalorder %v8739_v0, 2 }
 0x200   :  { %v1460_v21 = vshrl.u32 %v1442_v62, %v1458_v56  ;;  %v1463_v41 = vadd.s32 127, %v1462_v23  ;;  %v1237_v2 = vsel %vm1235_vm0, %v1236_v53, %v8725_v28  ;;  %v991_v49 = vshrl.u32 %v10667_v30, %v8594_v57 }
 0x201   :  { %v994_v35 = vshrl.u32 %v10664_v39, %v8594_v57  ;;  %v997_v12 = vshrl.u32 %v10668_v48, %v8594_v57  ;;  %vm3863_vm3 = vcmp.eq.s32.totalorder %v8739_v0, 0  ;;  %v1238_v18 = vadd.s32 %v1237_v2, %v1233_v44 }
 0x202   :  { %v1461_v20 = vor.u32 %v1460_v21, %v1459_v52  ;;  %v1464_v32 = vshll.u32 %v1463_v41, 23  ;;  %v996_v17 = vshll.u32 %v10664_v39, %v8203_v16  ;;  %vm3862_vm9 = vcmp.lt.s32.totalorder %v8739_v0, 2 }
 0x203   :  { %v990_v28 = vshll.u32 %v10666_v7, %v8203_v16  ;;  %v993_v14 = vshll.u32 %v10667_v30, %v8203_v16  ;;  %v999_v34 = vshll.u32 %v10668_v48, %v8203_v16  ;;  %v1000_v3 = vshrl.u32 %v10669_v60, %v8594_v57 }
 0x204   :  { %vm565_vm11 = vcmp.gt.s32.totalorder %v8606_v43, 0  ;;  %vm10580_vm5 = vweird.f32 %v6807_v26  ;;  %v1465_v62 = vor.u32 4788187, %v1464_v32  ;;  %v1239_v56 = vadd.s32 536870912, %v1238_v18 }
 0x205   :  { %v986_v23 = vshrl.u32 %v10665_v4, %v8594_v57  ;;  %v998_v44 = vor.u32 %v997_v12, %v996_v17  ;;  %v987_v53 = vshll.u32 %v10665_v4, %v8203_v16  ;;  %v992_v52 = vor.u32 %v991_v49, %v990_v28 }
 0x206   :  { %v995_v21 = vor.u32 %v994_v35, %v993_v14  ;;  %v1001_v41 = vor.u32 %v1000_v3, %v999_v34  ;;  %v1466_v2 = vand.u32 2147483647, %v1465_v62  ;;  %v1468_v25 = vcvt.s32.f32 %v1461_v20  ;;  %v8790_v51 = vpop.eup %6530 }
 0x207   :  { %v1240_v15 = vshrl.u32 %v1239_v56, 30  ;;  %vm1005_vm10 = vcmp.lt.s32.totalorder %v8201_v40, 4  ;;  %10776 = vst [vmem:[#allocation23_spill] sm:$0xff] %v8790_v51  ;;  %v978_v32 = vor.u32 8388608, %v8758_v24  ;;  %v989_v45 = vor.u32 %v988_v31, %v987_v53  ;;  %v8794_v12 = vpop.eup %6532 }
 0x208   :  { %vm1002_vm0 = vcmp.lt.s32.totalorder %v8201_v40, 1  ;;  %v1015_v57 = vsel %vm1005_vm10, %v1001_v41, 1326507024  ;;  %10777 = vst [vmem:[#allocation53_spill] sm:$0xff] %v8794_v12  ;;  %v10567_v16 = vxor.u32 2147483648, %v8790_v51  ;;  %v1469_v49 = vmul.f32 %v1468_v25, %v1466_v2 }
 0x209   :  { %v1241_v35 = vshll.u32 %v1240_v15, 30  ;;  %v1011_v17 = vsel %vm1005_vm10, %v998_v44, 920167782  ;;  %v10568_v20 = vxor.u32 2147483648, %v8794_v12  ;;  %vm1004_vm8 = vcmp.lt.s32.totalorder %v8201_v40, 3 }
 0x20a   :  { %v1007_v28 = vsel %vm1005_vm10, %v995_v21, 2102212464  ;;  %v1014_v14 = vsel %vm1002_vm0, %v992_v52, %v995_v21  ;;  %v3868_v24 = vsel %vm3866_vm14, %v10567_v16, %v8794_v12  ;;  %v1470_v31 = vxor.u32 2147483648, %v1469_v49 }
 0x20b   :  { %v8806_v34 = vsub.s32 %v1238_v18, %v1241_v35  ;;  %v1016_v25 = vsel %vm1004_vm8, %v998_v44, %v1015_v57  ;;  %v3865_v3 = vsel %vm3863_vm3, %v8790_v51, %v10568_v20  ;;  %vm1003_vm10 = vcmp.lt.s32.totalorder %v8201_v40, 2 }
 0x20c   :  { %v1010_v62 = vsel %vm1002_vm0, %v989_v45, %v992_v52  ;;  %v1012_v56 = vsel %vm1004_vm8, %v995_v21, %v1011_v17  ;;  %v3869_v18 = vsel %vm3862_vm9, %v3865_v3, %v3868_v24  ;;  %v1471_v44 = vsel %vm1388_vm6, %v1470_v31, %v1469_v49 }
 0x20d   :  { %v1244_v53 = vsub.s32 0, %v8806_v34  ;;  %v1006_v41 = vsel %vm1002_vm0, %v986_v23, %v989_v45  ;;  %v3870_v2 = vsel %vm10580_vm5, nan, %v3869_v18  ;;  %v1474_v57 = vsel %vm8743_vm12, %v6809_v27, %v1471_v44  ;;  %v10779_v18 = vld [vmem:[#allocation24_spill] sm:$0xff] }
 0x20e   :  { %v1008_v21 = vsel %vm1004_vm8, %v992_v52, %v1007_v28  ;;  %v1017_v0 = vsel %vm1003_vm10, %v1014_v14, %v1016_v25  ;;  %5255 = vmatprep.subr.mxu0 %v3870_v2  ;;  %6534 = vcosq.f32 %v1474_v57  ;;  %v1013_v45 = vsel %vm1003_vm10, %v1010_v62, %v1012_v56 }
 0x20f   :  { %v6082_v49 = vmin.u32 %v1244_v53, %v8806_v34  ;;  %v1018_v23 = vshll.u32 %v978_v32, 8  ;;  %v8842_v35 = vsel %vm565_vm11, %v8606_v43, 0  ;;  %vm669_vm6 = vcmp.gt.s32.totalorder %v8610_v22, 0  ;;  %v10780_v53 = vld [vmem:[#allocation25_spill] sm:$0xff] }
 0x210   :  { %6536 = vsinq.f32 %v1474_v57  ;;  %v1264_v50 = vsub.s32 4, %v1240_v15  ;;  %v10569_v14 = vand.u32 2147483647, %v10715_v11  ;;  %v8850_v24 = vand.u32 3, %v8751_v59 }
 0x211   :  { %v1246_v52 = vclz %v6082_v49  ;;  %v8845_v17 = vmul.u32.u64.low %v1018_v23, %v1017_v0  ;;  %v8846_v28 = vmul.u32.u64.high %v1018_v23, %v1017_v0, %v8845_v17  ;;  %v1009_v32 = vsel %vm1003_vm10, %v1006_v41, %v1008_v21 }
 0x212   :  { %v8854_v31 = vmul.u32.u64.low %v1018_v23, %v1013_v45  ;;  %v8855_v25 = vmul.u32.u64.high %v1018_v23, %v1013_v45, %v8854_v31  ;;  %v8859_v43 = vsel %vm669_vm6, %v8610_v22, 0  ;;  %v10778_v3 = vand.u32 2139095040, %v10772_v8 }
 0x213   :  { %vm1180_vm8 = vcmp.lt.s32.totalorder %v10768_v54, 0  ;;  %v6083_v56 = vadd.s32 4294967294, %v1246_v52  ;;  %v1234_v40 = vadd.s32 %v8724_v19, %v8722_v29  ;;  %v1025_v22 = vmul.u32 %v1018_v23, %v1009_v32 }
 0x214   :  { %v8863_v62 = vshrl.u32 %v10778_v3, 23  ;;  %v8872_v41 = vsel %vm1180_vm8, %v1264_v50, %v1240_v15  ;;  %vm1027_vm14 = vc.u32 %v8846_v28, %v8854_v31  ;;  %v8878_v57 = vand.u32 8388607, %v10569_v14 }
 0x215   :  { %vm6084_vm12 = vcmp.lt.s32.totalorder %v6083_v56, 0  ;;  %vm3969_vm3 = vcmp.eq.s32.totalorder %v8850_v24, 2  ;;  %v1028_v0 = vadd.s32 1, %v8855_v25  ;;  %v1091_v29 = vshll.u32 %v10665_v4, %v8603_v13 }
 0x216   :  { %v1249_v21 = vsel %vm6084_vm12, 0, %v6083_v56  ;;  %v1092_v15 = vshrl.u32 %v10666_v7, %v8736_v1  ;;  %vm3966_vm9 = vcmp.eq.s32.totalorder %v8850_v24, 0  ;;  %v1094_v45 = vshll.u32 %v10666_v7, %v8603_v13 }
 0x217   :  { %v1250_v19 = vsub.s32 32, %v1249_v21  ;;  %v1254_v49 = vsub.s32 4294967266, %v1249_v21  ;;  %v1095_v23 = vshrl.u32 %v10667_v30, %v8736_v1  ;;  %vm3965_vm11 = vcmp.lt.s32.totalorder %v8850_v24, 2 }
 0x218   :  { %v1029_v50 = vsel %vm1027_vm14, %v1028_v0, %v8855_v25  ;;  %v1098_v52 = vshrl.u32 %v10664_v39, %v8736_v1  ;;  %v1100_v17 = vshll.u32 %v10664_v39, %v8603_v13  ;;  %v1101_v32 = vshrl.u32 %v10668_v48, %v8736_v1 }
 0x219   :  { %vm10581_vm0 = vweird.f32 %v6809_v27  ;;  %v1251_v3 = vshll.u32 %v8806_v34, %v1249_v21  ;;  %v1252_v56 = vshrl.u32 %v1234_v40, %v1250_v19  ;;  %v1255_v16 = vadd.s32 127, %v1254_v49  ;;  %v10790_v27 = vld [vmem:[#allocation51_spill] sm:$0xff] }
 0x21a   :  { %v1030_v20 = vadd.s32 %v1029_v50, %v1025_v22  ;;  %v1097_v14 = vshll.u32 %v10667_v30, %v8603_v13  ;;  %v1102_v25 = vor.u32 %v1101_v32, %v1100_v17  ;;  %v1103_v0 = vshll.u32 %v10668_v48, %v8603_v13 }
 0x21b   :  { %v1104_v2 = vshrl.u32 %v10669_v60, %v8736_v1  ;;  %v1253_v44 = vor.u32 %v1252_v56, %v1251_v3  ;;  %v1256_v26 = vshll.u32 %v1255_v16, 23  ;;  %v1082_v51 = vor.u32 8388608, %v8878_v57  ;;  %v8908_v12 = vpop.eup %6534 }
 0x21c   :  { %v1031_v6 = vadd.s32 536870912, %v1030_v20  ;;  %10781 = vst [vmem:[#allocation25_spill] sm:$0xff] %v8908_v12  ;;  %v1093_v34 = vor.u32 %v1092_v15, %v1091_v29  ;;  %v1096_v40 = vor.u32 %v1095_v23, %v1094_v45  ;;  %v1099_v22 = vor.u32 %v1098_v52, %v1097_v14 }
 0x21d   :  { %v1105_v21 = vor.u32 %v1104_v2, %v1103_v0  ;;  %v8910_v19 = vpop.eup %6536  ;;  %v10576_v49 = vxor.u32 2147483648, %v8908_v12  ;;  %v1257_v50 = vor.u32 4788187, %v1256_v26  ;;  %vm1109_vm10 = vcmp.lt.s32.totalorder %v8596_v36, 4 }
 0x21e   :  { %v1032_v13 = vshrl.u32 %v1031_v6, 30  ;;  %vm773_vm6 = vcmp.gt.s32.totalorder %v8730_v37, 0  ;;  %v10577_v16 = vxor.u32 2147483648, %v8910_v19  ;;  %vm1106_vm12 = vcmp.lt.s32.totalorder %v8596_v36, 1 }
 0x21f   :  { %vm1108_vm14 = vcmp.lt.s32.totalorder %v8596_v36, 3  ;;  %v1115_v14 = vsel %vm1109_vm10, %v1102_v25, 920167782  ;;  %v3971_v26 = vsel %vm3969_vm3, %v10576_v49, %v8910_v19  ;;  %v1258_v6 = vand.u32 2147483647, %v1257_v50 }
 0x220   :  { %v1260_v2 = vcvt.s32.f32 %v1253_v44  ;;  %v1033_v57 = vshll.u32 %v1032_v13, 30  ;;  %v3968_v29 = vsel %vm3966_vm9, %v8908_v12, %v10577_v16  ;;  %v1114_v15 = vsel %vm1106_vm12, %v1093_v34, %v1096_v40 }
 0x221   :  { %v1118_v45 = vsel %vm1106_vm12, %v1096_v40, %v1099_v22  ;;  %v1119_v23 = vsel %vm1109_vm10, %v1105_v21, 1326507024  ;;  %v3972_v52 = vsel %vm3965_vm11, %v3968_v29, %v3971_v26  ;;  %v1116_v32 = vsel %vm1108_vm14, %v1099_v22, %v1115_v14 }
 0x222   :  { %v1261_v44 = vmul.f32 %v1260_v2, %v1258_v6  ;;  %v8938_v17 = vsub.s32 %v1030_v20, %v1033_v57  ;;  %v3973_v3 = vsel %vm10581_vm0, nan, %v3972_v52  ;;  %v10782_v56 = vand.u32 2147483647, %v10768_v54 }
 0x223   :  { %v1090_v21 = vshrl.u32 %v10665_v4, %v8736_v1  ;;  %vm1107_vm9 = vcmp.lt.s32.totalorder %v8596_v36, 2  ;;  %6308 = vmatprep.subr.mxu1 %v3973_v3  ;;  %v1111_v50 = vsel %vm1109_vm10, %v1099_v22, 2102212464  ;;  %v1120_v14 = vsel %vm1108_vm14, %v1102_v25, %v1119_v23 }
 0x224   :  { %vm8946_vm3 = vcmp.le.f32.partialorder %v10782_v56, 0.7853982  ;;  %v1262_v20 = vxor.u32 2147483648, %v1261_v44  ;;  %v1036_v24 = vsub.s32 0, %v8938_v17  ;;  %6309 = vmatpush3.msra.mxu1 %v3973_v3  ;;  %v1117_v1 = vsel %vm1107_vm9, %v1114_v15, %v1116_v32 }
 0x225   :  { %v8961_v26 = vsel %vm8946_vm3, 0, %v8872_v41  ;;  %v1121_v6 = vsel %vm1107_vm9, %v1118_v45, %v1120_v14  ;;  %v1122_v2 = vshll.u32 %v1082_v51, 8  ;;  %v1056_v29 = vsub.s32 4, %v1032_v13 }
 0x226   :  { %v1263_v57 = vsel %vm1180_vm8, %v1262_v20, %v1261_v44  ;;  %v6074_v22 = vmin.u32 %v1036_v24, %v8938_v17  ;;  %v1110_v25 = vsel %vm1106_vm12, %v1090_v21, %v1093_v34  ;;  %v1112_v15 = vsel %vm1108_vm14, %v1096_v40, %v1111_v50 }
 0x227   :  { %v1266_v41 = vsel %vm8946_vm3, %v10768_v54, %v1263_v57  ;;  %v8977_v23 = vmul.u32.u64.low %v1122_v2, %v1121_v6  ;;  %v8978_v52 = vmul.u32.u64.high %v1122_v2, %v1121_v6, %v8977_v23  ;;  %v8985_v32 = vand.u32 31, %v8842_v35 }
 0x228   :  { %6538 = vcosq.f32 %v1266_v41  ;;  %v1038_v51 = vclz %v6074_v22  ;;  %v8980_v45 = vmul.u32.u64.low %v1122_v2, %v1117_v1  ;;  %v8981_v44 = vmul.u32.u64.high %v1122_v2, %v1117_v1, %v8980_v45 }
 0x229   :  { %v8988_v34 = vand.u32 31, %v8859_v43  ;;  %6540 = vsinq.f32 %v1266_v41  ;;  %v10578_v3 = vand.u32 2147483647, %v6827_v58  ;;  %v8994_v40 = vsel %vm773_vm6, %v8730_v37, 0 }
 0x22a   :  { %v10785_v56 = vand.u32 2139095040, %v10779_v18  ;;  %v6075_v21 = vadd.s32 4294967294, %v1038_v51  ;;  %v1113_v20 = vsel %vm1107_vm9, %v1110_v25, %v1112_v15  ;;  %v10786_v24 = vand.u32 2139095040, %v10780_v53 }
 0x22b   :  { %v9007_v14 = vand.u32 3, %v8961_v26  ;;  %vm972_vm8 = vcmp.lt.s32.totalorder %v10705_v63, 0  ;;  %vm1131_vm11 = vc.u32 %v8978_v52, %v8980_v45  ;;  %v1026_v37 = vadd.s32 %v8854_v31, %v8846_v28 }
 0x22c   :  { %v8998_v0 = vshrl.u32 %v10785_v56, 23  ;;  %v9004_v50 = vshrl.u32 %v10786_v24, 23  ;;  %vm6076_vm10 = vcmp.lt.s32.totalorder %v6075_v21, 0  ;;  %v9016_v36 = vsel %vm972_vm8, %v1056_v29, %v1032_v13 }
 0x22d   :  { %v1132_v1 = vadd.s32 1, %v8981_v44  ;;  %v1041_v6 = vsel %vm6076_vm10, 0, %v6075_v21  ;;  %v1129_v57 = vmul.u32 %v1122_v2, %v1113_v20  ;;  %v9021_v22 = vand.u32 8388607, %v10578_v3 }
 0x22e   :  { %v882_v25 = vshrl.u32 %v10665_v4, %v8332_v5  ;;  %v1042_v41 = vsub.s32 32, %v1041_v6  ;;  %v1046_v15 = vsub.s32 4294967266, %v1041_v6  ;;  %v884_v31 = vshrl.u32 %v10666_v7, %v8332_v5 }
 0x22f   :  { %v1133_v28 = vsel %vm1131_vm11, %v1132_v1, %v8981_v44  ;;  %vm3763_vm6 = vcmp.eq.s32.totalorder %v9007_v14, 2  ;;  %v1043_v13 = vshll.u32 %v8938_v17, %v1041_v6  ;;  %v887_v2 = vshrl.u32 %v10667_v30, %v8332_v5 }
 0x230   :  { %v1134_v29 = vadd.s32 %v1133_v28, %v1129_v57  ;;  %v890_v23 = vshrl.u32 %v10664_v39, %v8332_v5  ;;  %vm3760_vm12 = vcmp.eq.s32.totalorder %v9007_v14, 0  ;;  %v1044_v51 = vshrl.u32 %v1026_v37, %v1042_v41 }
 0x231   :  { %v1047_v56 = vadd.s32 127, %v1046_v15  ;;  %v892_v44 = vshll.u32 %v10664_v39, %v8199_v10  ;;  %v893_v21 = vshrl.u32 %v10668_v48, %v8332_v5  ;;  %vm3759_vm14 = vcmp.lt.s32.totalorder %v9007_v14, 2 }
 0x232   :  { %v1135_v17 = vadd.s32 536870912, %v1134_v29  ;;  %v883_v20 = vshll.u32 %v10665_v4, %v8199_v10  ;;  %v889_v24 = vshll.u32 %v10667_v30, %v8199_v10  ;;  %v896_v1 = vshrl.u32 %v10669_v60, %v8332_v5 }
 0x233   :  { %vm10597_vm3 = vweird.f32 %v10768_v54  ;;  %v1045_v37 = vor.u32 %v1044_v51, %v1043_v13  ;;  %v1048_v6 = vshll.u32 %v1047_v56, 23  ;;  %v886_v57 = vshll.u32 %v10666_v7, %v8199_v10 }
 0x234   :  { %v894_v41 = vor.u32 %v893_v21, %v892_v44  ;;  %v9049_v15 = vshrl.u32 %v1135_v17, 30  ;;  %v874_v28 = vor.u32 8388608, %v9021_v22  ;;  %v891_v49 = vor.u32 %v890_v23, %v889_v24 }
 0x235   :  { %v895_v16 = vshll.u32 %v10668_v48, %v8199_v10  ;;  %v10787_v3 = vand.u32 2147483647, %v10705_v63  ;;  %v1049_v13 = vor.u32 4788187, %v1048_v6  ;;  %v885_v51 = vor.u32 %v884_v31, %v883_v20  ;;  %v9061_v44 = vpop.eup %6538 }
 0x236   :  { %v888_v56 = vor.u32 %v887_v2, %v886_v57  ;;  %vm901_vm11 = vcmp.lt.s32.totalorder %v10790_v27, 4  ;;  %10791 = vst [vmem:[#allocation51_spill] sm:$0xff] %v9061_v44  ;;  %v1137_v21 = vshll.u32 %v9049_v15, 30  ;;  %vm898_vm10 = vcmp.lt.s32.totalorder %v10790_v27, 1  ;;  %v9067_v23 = vpop.eup %6540 }
 0x237   :  { %vm9056_vm9 = vcmp.le.f32.partialorder %v10787_v3, 0.7853982  ;;  %v897_v22 = vor.u32 %v896_v1, %v895_v16  ;;  %v907_v10 = vsel %vm901_vm11, %v894_v41, 920167782  ;;  %10792 = vst [vmem:[#allocation54_spill] sm:$0xff] %v9067_v23  ;;  %v10582_v3 = vxor.u32 2147483648, %v9061_v44 }
 0x238   :  { %v1050_v17 = vand.u32 2147483647, %v1049_v13  ;;  %v1052_v24 = vcvt.s32.f32 %v1045_v37  ;;  %vm899_vm5 = vcmp.lt.s32.totalorder %v10790_v27, 2  ;;  %v10583_v31 = vxor.u32 2147483648, %v9067_v23 }
 0x239   :  { %v9072_v2 = vsub.s32 %v1134_v29, %v1137_v21  ;;  %vm900_vm0 = vcmp.lt.s32.totalorder %v10790_v27, 3  ;;  %v903_v16 = vsel %vm901_vm11, %v891_v49, 2102212464  ;;  %v3765_v20 = vsel %vm3763_vm6, %v10582_v3, %v9067_v23 }
 0x23a   :  { %v1053_v1 = vmul.f32 %v1052_v24, %v1050_v17  ;;  %v906_v37 = vsel %vm898_vm10, %v885_v51, %v888_v56  ;;  %v908_v6 = vsel %vm900_vm0, %v891_v49, %v907_v10  ;;  %v3762_v29 = vsel %vm3760_vm12, %v9061_v44, %v10583_v31 }
 0x23b   :  { %v1140_v57 = vsub.s32 0, %v9072_v2  ;;  %v910_v13 = vsel %vm898_vm10, %v888_v56, %v891_v49  ;;  %v911_v21 = vsel %vm901_vm11, %v897_v22, 1326507024  ;;  %v3766_v17 = vsel %vm3759_vm14, %v3762_v29, %v3765_v20 }
 0x23c   :  { %v1054_v24 = vxor.u32 2147483648, %v1053_v1  ;;  %v902_v10 = vsel %vm898_vm10, %v882_v25, %v885_v51  ;;  %v912_v3 = vsel %vm900_vm0, %v894_v41, %v911_v21  ;;  %v3767_v31 = vsel %vm10597_vm3, nan, %v3766_v17 }
 0x23d   :  { %v6078_v44 = vmin.u32 %v1140_v57, %v9072_v2  ;;  %v909_v49 = vsel %vm899_vm5, %v906_v37, %v908_v6  ;;  %v914_v23 = vshll.u32 %v874_v28, 8  ;;  %5256 = vmatpush1.msra.mxu0 %v3767_v31  ;;  %v1160_v22 = vsub.s32 4, %v9049_v15 }
 0x23e   :  { %v1055_v14 = vsel %vm972_vm8, %v1054_v24, %v1053_v1  ;;  %v904_v25 = vsel %vm900_vm0, %v888_v56, %v903_v16  ;;  %v913_v41 = vsel %vm899_vm5, %v910_v13, %v912_v3  ;;  %v9123_v28 = vsel %vm9056_vm9, 0, %v9016_v36 }
 0x23f   :  { %v1058_v51 = vsel %vm9056_vm9, %v10705_v63, %v1055_v14  ;;  %v1142_v20 = vclz %v6078_v44  ;;  %v9117_v29 = vmul.u32.u64.low %v914_v23, %v913_v41  ;;  %v9118_v37 = vmul.u32.u64.high %v914_v23, %v913_v41, %v9117_v29  ;;  %10793 = vst [vmem:[#allocation55_spill] sm:$0xff] %v9123_v28 }
 0x240   :  { %6542 = vcosq.f32 %v1058_v51  ;;  %v9125_v31 = vmul.u32.u64.low %v914_v23, %v909_v49  ;;  %v9126_v1 = vmul.u32.u64.high %v914_v23, %v909_v49, %v9125_v31  ;;  %v9130_v56 = vshrl.u32 %v8859_v43, 5 }
 0x241   :  { %v673_v3 = vsub.s32 32, %v8988_v34  ;;  %6544 = vsinq.f32 %v1058_v51  ;;  %v6079_v44 = vadd.s32 4294967294, %v1142_v20  ;;  %v9134_v16 = vand.u32 31, %v8994_v40 }
 0x242   :  { %v9137_v6 = vadd.s32 4294967169, %v8998_v0  ;;  %vm1076_vm0 = vcmp.lt.s32.totalorder %v10715_v11, 0  ;;  %v905_v36 = vsel %vm899_vm5, %v902_v10, %v904_v25  ;;  %v9143_v5 = vand.u32 3, %v9123_v28 }
 0x243   :  { %vm6080_vm8 = vcmp.lt.s32.totalorder %v6079_v44, 0  ;;  %v1161_v43 = vsel %vm1076_vm0, %v1160_v22, %v9049_v15  ;;  %vm923_vm6 = vc.u32 %v9118_v37, %v9125_v31  ;;  %v9151_v57 = vadd.s32 4294967169, %v9004_v50 }
 0x244   :  { %v10794_v0 = vand.u32 2147483647, %v10715_v11  ;;  %v1145_v27 = vsel %vm6080_vm8, 0, %v6079_v44  ;;  %v924_v21 = vadd.s32 1, %v9126_v1  ;;  %v1130_v17 = vadd.s32 %v8980_v45, %v8978_v52 }
 0x245   :  { %v1146_v24 = vsub.s32 32, %v1145_v27  ;;  %v1150_v15 = vsub.s32 4294967266, %v1145_v27  ;;  %v921_v10 = vmul.u32 %v914_v23, %v905_v36  ;;  %v1147_v49 = vshll.u32 %v9072_v2, %v1145_v27 }
 0x246   :  { %vm9155_vm12 = vcmp.le.f32.partialorder %v10794_v0, 0.7853982  ;;  %v925_v14 = vsel %vm923_vm6, %v924_v21, %v9126_v1  ;;  %v10595_v22 = vand.u32 2147483647, %v10746_v61  ;;  %vm3557_vm5 = vcmp.eq.s32.totalorder %v9143_v5, 2 }
 0x247   :  { %v9165_v50 = vsel %vm9155_vm12, 0, %v1161_v43  ;;  %v1148_v25 = vshrl.u32 %v1130_v17, %v1146_v24  ;;  %v1151_v41 = vadd.s32 127, %v1150_v15  ;;  %v926_v51 = vadd.s32 %v925_v14, %v921_v10 }
 0x248   :  { %v679_v52 = vshrl.u32 %v10667_v30, %v673_v3  ;;  %vm3554_vm14 = vcmp.eq.s32.totalorder %v9143_v5, 0  ;;  %v682_v45 = vshrl.u32 %v10664_v39, %v673_v3  ;;  %v684_v23 = vshll.u32 %v10664_v39, %v8988_v34 }
 0x249   :  { %v685_v2 = vshrl.u32 %v10668_v48, %v673_v3  ;;  %v687_v20 = vshll.u32 %v10668_v48, %v8988_v34  ;;  %vm3553_vm9 = vcmp.lt.s32.totalorder %v9143_v5, 2  ;;  %v1149_v29 = vor.u32 %v1148_v25, %v1147_v49 }
 0x24a   :  { %v1152_v1 = vshll.u32 %v1151_v41, 23  ;;  %v927_v44 = vadd.s32 536870912, %v926_v51  ;;  %v688_v36 = vshrl.u32 %v10669_v60, %v673_v3  ;;  %vm10596_vm11 = vweird.f32 %v10705_v63 }
 0x24b   :  { %v676_v43 = vshrl.u32 %v10666_v7, %v673_v3  ;;  %v678_v0 = vshll.u32 %v10666_v7, %v8988_v34  ;;  %v681_v27 = vshll.u32 %v10667_v30, %v8988_v34  ;;  %v686_v21 = vor.u32 %v685_v2, %v684_v23 }
 0x24c   :  { %v1153_v17 = vor.u32 4788187, %v1152_v1  ;;  %v9186_v24 = vshrl.u32 %v927_v44, 30  ;;  %v674_v15 = vshrl.u32 %v10665_v4, %v673_v3  ;;  %v689_v10 = vor.u32 %v688_v36, %v687_v20 }
 0x24d   :  { %v665_v49 = vand.u32 8388607, %v10595_v22  ;;  %v675_v14 = vshll.u32 %v10665_v4, %v8988_v34  ;;  %v680_v25 = vor.u32 %v679_v52, %v678_v0  ;;  %v683_v41 = vor.u32 %v682_v45, %v681_v27  ;;  %v9193_v54 = vpop.eup %6542 }
 0x24e   :  { %10797 = vst [vmem:[#allocation56_spill] sm:$0xff] %v9193_v54  ;;  %v1154_v28 = vand.u32 2147483647, %v1153_v17  ;;  %v1156_v12 = vcvt.s32.f32 %v1149_v29  ;;  %v929_v23 = vshll.u32 %v9186_v24, 30  ;;  %vm693_vm10 = vcmp.lt.s32.totalorder %v9130_v56, 4  ;;  %v9197_v2 = vpop.eup %6544 }
 0x24f   :  { %10798 = vst [vmem:[#allocation57_spill] sm:$0xff] %v9197_v2  ;;  %v10592_v3 = vxor.u32 2147483648, %v9193_v54  ;;  %v677_v20 = vor.u32 %v676_v43, %v675_v14  ;;  %vm690_vm8 = vcmp.lt.s32.totalorder %v9130_v56, 1  ;;  %v699_v34 = vsel %vm693_vm10, %v686_v21, 920167782 }
 0x250   :  { %v10593_v52 = vxor.u32 2147483648, %v9197_v2  ;;  %v1157_v45 = vmul.f32 %v1156_v12, %v1154_v28  ;;  %v9204_v1 = vsub.s32 %v926_v51, %v929_v23  ;;  %v703_v29 = vsel %vm693_vm10, %v689_v10, 1326507024 }
 0x251   :  { %v3559_v44 = vsel %vm3557_vm5, %v10592_v3, %v9197_v2  ;;  %v666_v36 = vor.u32 8388608, %v665_v49  ;;  %vm692_vm6 = vcmp.lt.s32.totalorder %v9130_v56, 3  ;;  %v702_v43 = vsel %vm690_vm8, %v680_v25, %v683_v41 }
 0x252   :  { %v3556_v12 = vsel %vm3554_vm14, %v9193_v54, %v10593_v52  ;;  %v1158_v28 = vxor.u32 2147483648, %v1157_v45  ;;  %v932_v51 = vsub.s32 0, %v9204_v1  ;;  %v695_v0 = vsel %vm693_vm10, %v683_v41, 2102212464 }
 0x253   :  { %v3560_v27 = vsel %vm3553_vm9, %v3556_v12, %v3559_v44  ;;  %v698_v17 = vsel %vm690_vm8, %v677_v20, %v680_v25  ;;  %v700_v10 = vsel %vm692_vm6, %v683_v41, %v699_v34  ;;  %v704_v49 = vsel %vm692_vm6, %v686_v21, %v703_v29 }
 0x254   :  { %v3561_v14 = vsel %vm10596_vm11, nan, %v3560_v27  ;;  %v1159_v23 = vsel %vm1076_vm0, %v1158_v28, %v1157_v45  ;;  %v6070_v3 = vmin.u32 %v932_v51, %v9204_v1  ;;  %vm691_vm5 = vcmp.lt.s32.totalorder %v9130_v56, 2 }
 0x255   :  { %5257 = vmatprep.subr.mxu0 %v3561_v14  ;;  %v1162_v5 = vsel %vm9155_vm12, %v10715_v11, %v1159_v23  ;;  %v694_v41 = vsel %vm690_vm8, %v674_v15, %v677_v20  ;;  %v696_v21 = vsel %vm692_vm6, %v680_v25, %v695_v0  ;;  %v705_v34 = vsel %vm691_vm5, %v702_v43, %v704_v49 }
 0x256   :  { %6546 = vcosq.f32 %v1162_v5  ;;  %v934_v29 = vclz %v6070_v3  ;;  %v701_v44 = vsel %vm691_vm5, %v698_v17, %v700_v10  ;;  %v706_v45 = vshll.u32 %v666_v36, 8 }
 0x257   :  { %v777_v12 = vsub.s32 32, %v9134_v16  ;;  %v9247_v28 = vadd.s32 4294967169, %v8863_v62  ;;  %6548 = vsinq.f32 %v1162_v5  ;;  %v10594_v13 = vand.u32 2147483647, %v10747_v55 }
 0x258   :  { %v6071_v51 = vadd.s32 4294967294, %v934_v29  ;;  %v697_v27 = vsel %vm691_vm5, %v694_v41, %v696_v21  ;;  %v9250_v14 = vmul.u32.u64.low %v706_v45, %v705_v34  ;;  %v9251_v15 = vmul.u32.u64.high %v706_v45, %v705_v34, %v9250_v14 }
 0x259   :  { %v9254_v56 = vshrl.u32 %v8994_v40, 5  ;;  %v9257_v25 = vand.u32 3, %v9165_v50  ;;  %v9259_v3 = vmul.u32.u64.low %v706_v45, %v701_v44  ;;  %v9260_v20 = vmul.u32.u64.high %v706_v45, %v701_v44, %v9259_v3 }
 0x25a   :  { %v9264_v62 = vadd.s32 1, %v9137_v6  ;;  %v9267_v36 = vadd.s32 1, %v9151_v57  ;;  %v922_v43 = vadd.s32 %v9125_v31, %v9118_v37  ;;  %vm6072_vm0 = vcmp.lt.s32.totalorder %v6071_v51, 0 }
 0x25b   :  { %v937_v0 = vsel %vm6072_vm0, 0, %v6071_v51  ;;  %v713_v17 = vmul.u32 %v706_v45, %v697_v27  ;;  %v9274_v10 = vand.u32 8388607, %v10594_v13  ;;  %v779_v6 = vshll.u32 %v10665_v4, %v9134_v16 }
 0x25c   :  { %v938_v49 = vsub.s32 32, %v937_v0  ;;  %v942_v23 = vsub.s32 4294967266, %v937_v0  ;;  %v780_v57 = vshrl.u32 %v10666_v7, %v777_v12  ;;  %vm3660_vm12 = vcmp.eq.s32.totalorder %v9257_v25, 2 }
 0x25d   :  { %v939_v37 = vshll.u32 %v9204_v1, %v937_v0  ;;  %vm715_vm14 = vc.u32 %v9251_v15, %v9259_v3  ;;  %v716_v31 = vadd.s32 1, %v9260_v20  ;;  %v783_v5 = vshrl.u32 %v10667_v30, %v777_v12 }
 0x25e   :  { %vm3657_vm9 = vcmp.eq.s32.totalorder %v9257_v25, 0  ;;  %v940_v41 = vshrl.u32 %v922_v43, %v938_v49  ;;  %v943_v21 = vadd.s32 127, %v942_v23  ;;  %v786_v34 = vshrl.u32 %v10664_v39, %v777_v12 }
 0x25f   :  { %v788_v29 = vshll.u32 %v10664_v39, %v9134_v16  ;;  %vm3656_vm10 = vcmp.lt.s32.totalorder %v9257_v25, 2  ;;  %v717_v1 = vsel %vm715_vm14, %v716_v31, %v9260_v20  ;;  %v789_v44 = vshrl.u32 %v10668_v48, %v777_v12 }
 0x260   :  { %v791_v45 = vshll.u32 %v10668_v48, %v9134_v16  ;;  %v792_v51 = vshrl.u32 %v10669_v60, %v777_v12  ;;  %vm357_vm8 = vcmp.gt.s32.totalorder %v9264_v62, 0  ;;  %vm1166_vm6 = vweird.f32 %v10715_v11 }
 0x261   :  { %vm868_vm5 = vcmp.lt.s32.totalorder %v6827_v58, 0  ;;  %v941_v27 = vor.u32 %v940_v41, %v939_v37  ;;  %v944_v14 = vshll.u32 %v943_v21, 23  ;;  %v718_v43 = vadd.s32 %v717_v1, %v713_v17 }
 0x262   :  { %v782_v0 = vshll.u32 %v10666_v7, %v9134_v16  ;;  %v778_v20 = vshrl.u32 %v10665_v4, %v777_v12  ;;  %v785_v49 = vshll.u32 %v10667_v30, %v9134_v16  ;;  %v790_v23 = vor.u32 %v789_v44, %v788_v29 }
 0x263   :  { %v793_v31 = vor.u32 %v792_v51, %v791_v45  ;;  %v10799_v52 = vand.u32 2147483647, %v6827_v58  ;;  %v945_v22 = vor.u32 4788187, %v944_v14  ;;  %v719_v37 = vadd.s32 536870912, %v718_v43  ;;  %v9309_v21 = vpop.eup %6546 }
 0x264   :  { %v781_v41 = vor.u32 %v780_v57, %v779_v6  ;;  %v784_v17 = vor.u32 %v783_v5, %v782_v0  ;;  %v948_v1 = vcvt.s32.f32 %v941_v27  ;;  %v770_v12 = vor.u32 8388608, %v9274_v10  ;;  %v9313_v16 = vpop.eup %6548 }
 0x265   :  { %vm9305_vm0 = vcmp.le.f32.partialorder %v10799_v52, 0.7853982  ;;  %v787_v40 = vor.u32 %v786_v34, %v785_v49  ;;  %vm794_vm14 = vcmp.lt.s32.totalorder %v9254_v56, 1  ;;  %v10599_v29 = vxor.u32 2147483648, %v9309_v21 }
 0x266   :  { %v946_v52 = vand.u32 2147483647, %v945_v22  ;;  %v720_v44 = vshrl.u32 %v719_v37, 30  ;;  %vm797_vm11 = vcmp.lt.s32.totalorder %v9254_v56, 4  ;;  %vm461_vm3 = vcmp.gt.s32.totalorder %v9267_v36, 0 }
 0x267   :  { %v10600_v6 = vxor.u32 2147483648, %v9313_v16  ;;  %vm796_vm2 = vcmp.lt.s32.totalorder %v9254_v56, 3  ;;  %v803_v57 = vsel %vm797_vm11, %v790_v23, 920167782  ;;  %v807_v5 = vsel %vm797_vm11, %v793_v31, 1326507024 }
 0x268   :  { %v3662_v10 = vsel %vm3660_vm12, %v10599_v29, %v9313_v16  ;;  %v949_v34 = vmul.f32 %v948_v1, %v946_v52  ;;  %v721_v45 = vshll.u32 %v720_v44, 30  ;;  %v802_v22 = vsel %vm794_vm14, %v781_v41, %v784_v17 }
 0x269   :  { %v3659_v51 = vsel %vm3657_vm9, %v9309_v21, %v10600_v6  ;;  %v799_v27 = vsel %vm797_vm11, %v787_v40, 2102212464  ;;  %v806_v14 = vsel %vm794_vm14, %v784_v17, %v787_v40  ;;  %v808_v0 = vsel %vm796_vm2, %v790_v23, %v807_v5 }
 0x26a   :  { %v3663_v49 = vsel %vm3656_vm10, %v3659_v51, %v3662_v10  ;;  %v950_v31 = vxor.u32 2147483648, %v949_v34  ;;  %v9338_v37 = vsub.s32 %v718_v43, %v721_v45  ;;  %v804_v1 = vsel %vm796_vm2, %v787_v40, %v803_v57 }
 0x26b   :  { %v3664_v52 = vsel %vm1166_vm6, nan, %v3663_v49  ;;  %v10802_v29 = vsub.s32 4, %v9186_v24  ;;  %vm795_vm11 = vcmp.lt.s32.totalorder %v9254_v56, 2  ;;  %v798_v25 = vsel %vm794_vm14, %v778_v20, %v781_v41 }
 0x26c   :  { %6310 = vmatprep.subr.mxu1 %v3664_v52  ;;  %v951_v43 = vsel %vm868_vm5, %v950_v31, %v949_v34  ;;  %v724_v40 = vsub.s32 0, %v9338_v37  ;;  %v800_v23 = vsel %vm796_vm2, %v784_v17, %v799_v27  ;;  %v809_v57 = vsel %vm795_vm11, %v806_v14, %v808_v0 }
 0x26d   :  { %v953_v6 = vsel %vm868_vm5, %v10802_v29, %v9186_v24  ;;  %v9362_v24 = vsel %vm357_vm8, %v9264_v62, 0  ;;  %v954_v20 = vsel %vm9305_vm0, %v6827_v58, %v951_v43  ;;  %6311 = vmatpush3.msra.mxu1 %v3664_v52  ;;  %v805_v41 = vsel %vm795_vm11, %v802_v22, %v804_v1 }
 0x26e   :  { %v810_v29 = vshll.u32 %v770_v12, 8  ;;  %v9371_v17 = vsel %vm9305_vm0, 0, %v953_v6  ;;  %6550 = vcosq.f32 %v954_v20  ;;  %v6062_v5 = vmin.u32 %v724_v40, %v9338_v37  ;;  %v10803_v12 = vld [vmem:[#allocation20_spill] sm:$0xff] }
 0x26f   :  { %v744_v10 = vsub.s32 4, %v720_v44  ;;  %6552 = vsinq.f32 %v954_v20  ;;  %v801_v62 = vsel %vm795_vm11, %v798_v25, %v800_v23  ;;  %v10601_v13 = vand.u32 2147483647, %v10803_v12 }
 0x270   :  { %v9376_v34 = vmul.u32.u64.low %v810_v29, %v809_v57  ;;  %v9377_v45 = vmul.u32.u64.high %v810_v29, %v809_v57, %v9376_v34  ;;  %v726_v51 = vclz %v6062_v5  ;;  %v9385_v6 = vshrl.u32 %v8842_v35, 5 }
 0x271   :  { %v9379_v27 = vmul.u32.u64.low %v810_v29, %v805_v41  ;;  %v9380_v14 = vmul.u32.u64.high %v810_v29, %v805_v41, %v9379_v27  ;;  %v569_v22 = vsub.s32 32, %v8985_v32  ;;  %v9389_v0 = vadd.s32 1, %v9247_v28 }
 0x272   :  { %v9392_v56 = vand.u32 3, %v9371_v17  ;;  %v9395_v49 = vand.u32 31, %v9362_v24  ;;  %v9400_v31 = vsel %vm461_vm3, %v9267_v36, 0  ;;  %vm660_vm2 = vcmp.lt.s32.totalorder %v10746_v61, 0 }
 0x273   :  { %v6063_v35 = vadd.s32 4294967294, %v726_v51  ;;  %v714_v1 = vadd.s32 %v9259_v3, %v9251_v15  ;;  %v9407_v28 = vsel %vm660_vm2, %v744_v10, %v720_v44  ;;  %v817_v52 = vmul.u32 %v810_v29, %v801_v62 }
 0x274   :  { %vm819_vm12 = vc.u32 %v9377_v45, %v9379_v27  ;;  %v820_v25 = vadd.s32 1, %v9380_v14  ;;  %v9414_v36 = vand.u32 8388607, %v10601_v13  ;;  %v571_v43 = vshll.u32 %v10665_v4, %v8985_v32 }
 0x275   :  { %vm6064_vm9 = vcmp.lt.s32.totalorder %v6063_v35, 0  ;;  %vm3454_vm3 = vcmp.eq.s32.totalorder %v9392_v56, 2  ;;  %v572_v3 = vshrl.u32 %v10666_v7, %v569_v22  ;;  %v575_v44 = vshrl.u32 %v10667_v30, %v569_v22 }
 0x276   :  { %v729_v15 = vsel %vm6064_vm9, 0, %v6063_v35  ;;  %v581_v40 = vshrl.u32 %v10668_v48, %v569_v22  ;;  %vm3451_vm10 = vcmp.eq.s32.totalorder %v9392_v56, 0  ;;  %v821_v20 = vsel %vm819_vm12, %v820_v25, %v9380_v14 }
 0x277   :  { %v730_v23 = vsub.s32 32, %v729_v15  ;;  %v734_v57 = vsub.s32 4294967266, %v729_v15  ;;  %v580_v41 = vshll.u32 %v10664_v39, %v8985_v32  ;;  %vm3450_vm8 = vcmp.lt.s32.totalorder %v9392_v56, 2 }
 0x278   :  { %v731_v29 = vshll.u32 %v9338_v37, %v729_v15  ;;  %v822_v5 = vadd.s32 %v821_v20, %v817_v52  ;;  %v574_v10 = vshll.u32 %v10666_v7, %v8985_v32  ;;  %v578_v62 = vshrl.u32 %v10664_v39, %v569_v22 }
 0x279   :  { %vm10615_vm5 = vweird.f32 %v6827_v58  ;;  %v732_v34 = vshrl.u32 %v714_v1, %v730_v23  ;;  %v735_v51 = vadd.s32 127, %v734_v57  ;;  %v582_v35 = vor.u32 %v581_v40, %v580_v41 }
 0x27a   :  { %v584_v14 = vshrl.u32 %v10669_v60, %v569_v22  ;;  %v823_v25 = vadd.s32 536870912, %v822_v5  ;;  %v570_v13 = vshrl.u32 %v10665_v4, %v569_v22  ;;  %v573_v63 = vor.u32 %v572_v3, %v571_v43 }
 0x27b   :  { %v577_v37 = vshll.u32 %v10667_v30, %v8985_v32  ;;  %v10804_v52 = vand.u32 2147483647, %v10746_v61  ;;  %v733_v20 = vor.u32 %v732_v34, %v731_v29  ;;  %v736_v54 = vshll.u32 %v735_v51, 23  ;;  %v9444_v23 = vpop.eup %6550 }
 0x27c   :  { %v576_v1 = vor.u32 %v575_v44, %v574_v10  ;;  %v583_v40 = vshll.u32 %v10668_v48, %v8985_v32  ;;  %10807 = vst [vmem:[#allocation58_spill] sm:$0xff] %v9444_v23  ;;  %vm253_vm14 = vcmp.gt.s32.totalorder %v9389_v0, 0  ;;  %v824_v22 = vshrl.u32 %v823_v25, 30  ;;  %v9449_v57 = vpop.eup %6552 }
 0x27d   :  { %vm9438_vm0 = vcmp.le.f32.partialorder %v10804_v52, 0.7853982  ;;  %v562_v43 = vor.u32 8388608, %v9414_v36  ;;  %v579_v3 = vor.u32 %v578_v62, %v577_v37  ;;  %vm589_vm11 = vcmp.lt.s32.totalorder %v9385_v6, 4  ;;  %10808 = vst [vmem:[#allocation59_spill] sm:$0xff] %v9449_v57 }
 0x27e   :  { %v10605_v41 = vxor.u32 2147483648, %v9444_v23  ;;  %v737_v29 = vor.u32 4788187, %v736_v54  ;;  %v585_v34 = vor.u32 %v584_v14, %v583_v40  ;;  %v595_v44 = vsel %vm589_vm11, %v582_v35, 920167782 }
 0x27f   :  { %v10606_v32 = vxor.u32 2147483648, %v9449_v57  ;;  %v825_v10 = vshll.u32 %v824_v22, 30  ;;  %vm586_vm12 = vcmp.lt.s32.totalorder %v9385_v6, 1  ;;  %vm588_vm9 = vcmp.lt.s32.totalorder %v9385_v6, 3 }
 0x280   :  { %v3456_v36 = vsel %vm3454_vm3, %v10605_v41, %v9449_v57  ;;  %v738_v62 = vand.u32 2147483647, %v737_v29  ;;  %v740_v51 = vcvt.s32.f32 %v733_v20  ;;  %v594_v54 = vsel %vm586_vm12, %v573_v63, %v576_v1 }
 0x281   :  { %v3453_v14 = vsel %vm3451_vm10, %v9444_v23, %v10606_v32  ;;  %v9469_v25 = vsub.s32 %v822_v5, %v825_v10  ;;  %v596_v37 = vsel %vm588_vm9, %v579_v3, %v595_v44  ;;  %v598_v52 = vsel %vm586_vm12, %v576_v1, %v579_v3 }
 0x282   :  { %v3457_v20 = vsel %vm3450_vm8, %v3453_v14, %v3456_v36  ;;  %v741_v40 = vmul.f32 %v740_v51, %v738_v62  ;;  %v591_v29 = vsel %vm589_vm11, %v579_v3, 2102212464  ;;  %v599_v41 = vsel %vm589_vm11, %v585_v34, 1326507024 }
 0x283   :  { %v3458_v5 = vsel %vm10615_vm5, nan, %v3457_v20  ;;  %v828_v10 = vsub.s32 0, %v9469_v25  ;;  %vm587_vm3 = vcmp.lt.s32.totalorder %v9385_v6, 2  ;;  %v600_v44 = vsel %vm588_vm9, %v582_v35, %v599_v41 }
 0x284   :  { %5258 = vmatpush1.msra.mxu0 %v3458_v5  ;;  %v742_v56 = vxor.u32 2147483648, %v741_v40  ;;  %v597_v36 = vsel %vm587_vm3, %v594_v54, %v596_v37  ;;  %v601_v3 = vsel %vm587_vm3, %v598_v52, %v600_v44  ;;  %v602_v62 = vshll.u32 %v562_v43, 8 }
 0x285   :  { %v9494_v34 = vsel %vm9438_vm0, 0, %v9407_v28  ;;  %v6066_v51 = vmin.u32 %v828_v10, %v9469_v25  ;;  %v590_v14 = vsel %vm586_vm12, %v570_v13, %v573_v63  ;;  %v592_v35 = vsel %vm588_vm9, %v576_v1, %v591_v29 }
 0x286   :  { %v743_v41 = vsel %vm660_vm2, %v742_v56, %v741_v40  ;;  %v848_v54 = vsub.s32 4, %v824_v22  ;;  %v9503_v37 = vmul.u32.u64.low %v602_v62, %v601_v3  ;;  %v9504_v52 = vmul.u32.u64.high %v602_v62, %v601_v3, %v9503_v37 }
 0x287   :  { %v746_v28 = vsel %vm9438_vm0, %v10746_v61, %v743_v41  ;;  %v830_v43 = vclz %v6066_v51  ;;  %v9509_v20 = vmul.u32.u64.low %v602_v62, %v597_v36  ;;  %v9510_v5 = vmul.u32.u64.high %v602_v62, %v597_v36, %v9509_v20 }
 0x288   :  { %v9516_v63 = vsel %vm253_vm14, %v9389_v0, 0  ;;  %v9519_v13 = vshrl.u32 %v9362_v24, 5  ;;  %v9522_v1 = vand.u32 31, %v9400_v31  ;;  %6554 = vcosq.f32 %v746_v28 }
 0x289   :  { %v361_v15 = vsub.s32 32, %v9395_v49  ;;  %6556 = vsinq.f32 %v746_v28  ;;  %v6067_v40 = vadd.s32 4294967294, %v830_v43  ;;  %v593_v29 = vsel %vm587_vm3, %v590_v14, %v592_v35 }
 0x28a   :  { %v9528_v10 = vand.u32 3, %v9494_v34  ;;  %v10809_v0 = vand.u32 2147483647, %v10747_v55  ;;  %vm764_vm10 = vcmp.lt.s32.totalorder %v10747_v55, 0  ;;  %vm611_vm8 = vc.u32 %v9504_v52, %v9509_v20 }
 0x28b   :  { %v818_v24 = vadd.s32 %v9379_v27, %v9377_v45  ;;  %vm6068_vm0 = vcmp.lt.s32.totalorder %v6067_v40, 0  ;;  %v849_v6 = vsel %vm764_vm10, %v848_v54, %v824_v22  ;;  %v612_v56 = vadd.s32 1, %v9510_v5 }
 0x28c   :  { %vm9532_vm2 = vcmp.le.f32.partialorder %v10809_v0, 0.7853982  ;;  %v833_v36 = vsel %vm6068_vm0, 0, %v6067_v40  ;;  %v609_v3 = vmul.u32 %v602_v62, %v593_v29  ;;  %v10607_v51 = vand.u32 2147483647, %v10779_v18 }
 0x28d   :  { %v363_v14 = vshll.u32 %v10665_v4, %v9395_v49  ;;  %v834_v35 = vsub.s32 32, %v833_v36  ;;  %v838_v41 = vsub.s32 4294967266, %v833_v36  ;;  %v613_v37 = vsel %vm611_vm8, %v612_v56, %v9510_v5 }
 0x28e   :  { %v364_v28 = vshrl.u32 %v10666_v7, %v361_v15  ;;  %v835_v45 = vshll.u32 %v9469_v25, %v833_v36  ;;  %v614_v27 = vadd.s32 %v613_v37, %v609_v3  ;;  %v367_v22 = vshrl.u32 %v10667_v30, %v361_v15 }
 0x28f   :  { %v370_v54 = vshrl.u32 %v10664_v39, %v361_v15  ;;  %v836_v43 = vshrl.u32 %v818_v24, %v834_v35  ;;  %v839_v62 = vadd.s32 127, %v838_v41  ;;  %v372_v40 = vshll.u32 %v10664_v39, %v9395_v49 }
 0x290   :  { %v373_v29 = vshrl.u32 %v10668_v48, %v361_v15  ;;  %vm3245_vm14 = vcmp.eq.s32.totalorder %v9528_v10, 0  ;;  %v615_v0 = vadd.s32 536870912, %v614_v27  ;;  %v353_v5 = vand.u32 8388607, %v10607_v51 }
 0x291   :  { %v366_v25 = vshll.u32 %v10666_v7, %v9395_v49  ;;  %v369_v56 = vshll.u32 %v10667_v30, %v9395_v49  ;;  %vm3244_vm11 = vcmp.lt.s32.totalorder %v9528_v10, 2  ;;  %v837_v24 = vor.u32 %v836_v43, %v835_v45 }
 0x292   :  { %v840_v36 = vshll.u32 %v839_v62, 23  ;;  %v374_v3 = vor.u32 %v373_v29, %v372_v40  ;;  %v376_v35 = vshrl.u32 %v10669_v60, %v361_v15  ;;  %vm10622_vm12 = vweird.f32 %v10746_v61 }
 0x293   :  { %vm3248_vm9 = vcmp.eq.s32.totalorder %v9528_v10, 2  ;;  %v9568_v41 = vsel %vm9532_vm2, 0, %v849_v6  ;;  %v616_v37 = vshrl.u32 %v615_v0, 30  ;;  %v365_v32 = vor.u32 %v364_v28, %v363_v14 }
 0x294   :  { %v841_v51 = vor.u32 4788187, %v840_v36  ;;  %v368_v58 = vor.u32 %v367_v22, %v366_v25  ;;  %v371_v23 = vor.u32 %v370_v54, %v369_v56  ;;  %v375_v45 = vshll.u32 %v10668_v48, %v9395_v49 }
 0x295   :  { %v617_v43 = vshll.u32 %v616_v37, 30  ;;  %v354_v62 = vor.u32 8388608, %v353_v5  ;;  %v362_v40 = vshrl.u32 %v10665_v4, %v361_v15  ;;  %vm381_vm3 = vcmp.lt.s32.totalorder %v9519_v13, 4  ;;  %v9574_v29 = vpop.eup %6554 }
 0x296   :  { %v842_v57 = vand.u32 2147483647, %v841_v51  ;;  %v844_v2 = vcvt.s32.f32 %v837_v24  ;;  %v377_v6 = vor.u32 %v376_v35, %v375_v45  ;;  %v387_v14 = vsel %vm381_vm3, %v374_v3, 920167782  ;;  %v9578_v28 = vpop.eup %6556 }
 0x297   :  { %v10616_v22 = vxor.u32 2147483648, %v9574_v29  ;;  %v9581_v54 = vsub.s32 %v614_v27, %v617_v43  ;;  %vm378_vm8 = vcmp.lt.s32.totalorder %v9519_v13, 1  ;;  %vm380_vm0 = vcmp.lt.s32.totalorder %v9519_v13, 3 }
 0x298   :  { %v10617_v49 = vxor.u32 2147483648, %v9578_v28  ;;  %v845_v15 = vmul.f32 %v844_v2, %v842_v57  ;;  %v386_v0 = vsel %vm378_vm8, %v365_v32, %v368_v58  ;;  %v388_v51 = vsel %vm380_vm0, %v371_v23, %v387_v14 }
 0x299   :  { %v3250_v5 = vsel %vm3248_vm9, %v10616_v22, %v9578_v28  ;;  %v620_v27 = vsub.s32 0, %v9581_v54  ;;  %vm379_vm5 = vcmp.lt.s32.totalorder %v9519_v13, 2  ;;  %v382_v25 = vsel %vm378_vm8, %v362_v40, %v365_v32 }
 0x29a   :  { %v3247_v2 = vsel %vm3245_vm14, %v9574_v29, %v10617_v49  ;;  %v846_v57 = vxor.u32 2147483648, %v845_v15  ;;  %v390_v56 = vsel %vm378_vm8, %v368_v58, %v371_v23  ;;  %v391_v24 = vsel %vm381_vm3, %v377_v6, 1326507024 }
 0x29b   :  { %v3251_v36 = vsel %vm3244_vm11, %v3247_v2, %v3250_v5  ;;  %v6058_v35 = vmin.u32 %v620_v27, %v9581_v54  ;;  %v383_v45 = vsel %vm381_vm3, %v371_v23, 2102212464  ;;  %v389_v32 = vsel %vm379_vm5, %v386_v0, %v388_v51 }
 0x29c   :  { %v3252_v43 = vsel %vm10622_vm12, nan, %v3251_v36  ;;  %v847_v40 = vsel %vm764_vm10, %v846_v57, %v845_v15  ;;  %v392_v6 = vsel %vm380_vm0, %v374_v3, %v391_v24  ;;  %v394_v14 = vshll.u32 %v354_v62, 8 }
 0x29d   :  { %5259 = vmatprep.subr.mxu0 %v3252_v43  ;;  %v850_v10 = vsel %vm9532_vm2, %v10747_v55, %v847_v40  ;;  %v622_v5 = vclz %v6058_v35  ;;  %v640_v23 = vsub.s32 4, %v616_v37  ;;  %v393_v0 = vsel %vm379_vm5, %v390_v56, %v392_v6 }
 0x29e   :  { %6558 = vcosq.f32 %v850_v10  ;;  %v384_v51 = vsel %vm380_vm0, %v368_v58, %v383_v45  ;;  %v9622_v27 = vmul.u32.u64.low %v394_v14, %v393_v0  ;;  %v9623_v15 = vmul.u32.u64.high %v394_v14, %v393_v0, %v9622_v27 }
 0x29f   :  { %6560 = vsinq.f32 %v850_v10  ;;  %v6059_v3 = vadd.s32 4294967294, %v622_v5  ;;  %v9625_v62 = vmul.u32.u64.low %v394_v14, %v389_v32  ;;  %v9626_v2 = vmul.u32.u64.high %v394_v14, %v389_v32, %v9625_v62 }
 0x2a0   :  { %v9630_v44 = vand.u32 31, %v9516_v63  ;;  %v465_v57 = vsub.s32 32, %v9522_v1  ;;  %vm556_vm2 = vcmp.lt.s32.totalorder %v10803_v12, 0  ;;  %v9635_v56 = vand.u32 3, %v9568_v41 }
 0x2a1   :  { %vm6060_vm10 = vcmp.lt.s32.totalorder %v6059_v3, 0  ;;  %v641_v58 = vsel %vm556_vm2, %v640_v23, %v616_v37  ;;  %v385_v24 = vsel %vm379_vm5, %v382_v25, %v384_v51  ;;  %v9642_v36 = vshrl.u32 %v9400_v31, 5 }
 0x2a2   :  { %v10812_v35 = vand.u32 2147483647, %v10803_v12  ;;  %v625_v32 = vsel %vm6060_vm10, 0, %v6059_v3  ;;  %vm403_vm11 = vc.u32 %v9623_v15, %v9625_v62  ;;  %v610_v43 = vadd.s32 %v9509_v20, %v9504_v52 }
 0x2a3   :  { %v626_v37 = vsub.s32 32, %v625_v32  ;;  %v630_v40 = vsub.s32 4294967266, %v625_v32  ;;  %v404_v13 = vadd.s32 1, %v9626_v2  ;;  %v401_v25 = vmul.u32 %v394_v14, %v385_v24 }
 0x2a4   :  { %vm9646_vm14 = vcmp.le.f32.partialorder %v10812_v35, 0.7853982  ;;  %v10618_v6 = vand.u32 2147483647, %v10780_v53  ;;  %v468_v10 = vshrl.u32 %v10666_v7, %v465_v57  ;;  %vm3351_vm5 = vcmp.eq.s32.totalorder %v9635_v56, 2 }
 0x2a5   :  { %v9657_v31 = vsel %vm9646_vm14, 0, %v641_v58  ;;  %v627_v5 = vshll.u32 %v9581_v54, %v625_v32  ;;  %v628_v23 = vshrl.u32 %v610_v43, %v626_v37  ;;  %v631_v0 = vadd.s32 127, %v630_v40  ;;  %v5593_v37 = vld [vmem:[%s10410_s4 + $0x10] sm:$0xff] }
 0x2a6   :  { %v405_v52 = vsel %vm403_vm11, %v404_v13, %v9626_v2  ;;  %vm3348_vm9 = vcmp.eq.s32.totalorder %v9635_v56, 0  ;;  %v474_v51 = vshrl.u32 %v10664_v39, %v465_v57  ;;  %v476_v14 = vshll.u32 %v10664_v39, %v9522_v1  ;;  %5607 = vperm.xlu0 %6481, %v5593_v37  }
 0x2a7   :  { %v406_v20 = vadd.s32 %v405_v52, %v401_v25  ;;  %v477_v27 = vshrl.u32 %v10668_v48, %v465_v57  ;;  %vm3347_vm3 = vcmp.lt.s32.totalorder %v9635_v56, 2  ;;  %v629_v3 = vor.u32 %v628_v23, %v627_v5 }
 0x2a8   :  { %v632_v58 = vshll.u32 %v631_v0, 23  ;;  %v467_v54 = vshll.u32 %v10665_v4, %v9522_v1  ;;  %v471_v24 = vshrl.u32 %v10667_v30, %v465_v57  ;;  %vm10623_vm8 = vweird.f32 %v10747_v55 }
 0x2a9   :  { %v407_v2 = vadd.s32 536870912, %v406_v20  ;;  %v473_v35 = vshll.u32 %v10667_v30, %v9522_v1  ;;  %v478_v32 = vor.u32 %v477_v27, %v476_v14  ;;  %v480_v43 = vshrl.u32 %v10669_v60, %v465_v57  ;;  %v5646_v27 = vld [vmem:[%s10411_s6 + $0x18] sm:$0xff] }
 0x2aa   :  { %v633_v40 = vor.u32 4788187, %v632_v58  ;;  %v457_v13 = vand.u32 8388607, %v10618_v6  ;;  %v466_v25 = vshrl.u32 %v10665_v4, %v465_v57  ;;  %v470_v5 = vshll.u32 %v10666_v7, %v9522_v1  ;;  %5664 = vperm.xlu0 %6481, %v5646_v27  }
 0x2ab   :  { %v9685_v23 = vshrl.u32 %v407_v2, 30  ;;  %v469_v0 = vor.u32 %v468_v10, %v467_v54  ;;  %v475_v52 = vor.u32 %v474_v51, %v473_v35  ;;  %v479_v14 = vshll.u32 %v10668_v48, %v9522_v1  ;;  %v9692_v58 = vpop.eup %6558 }
 0x2ac   :  { %v634_v22 = vand.u32 2147483647, %v633_v40  ;;  %v636_v49 = vcvt.s32.f32 %v629_v3  ;;  %v472_v57 = vor.u32 %v471_v24, %v470_v5  ;;  %vm485_vm0 = vcmp.lt.s32.totalorder %v9642_v36, 4  ;;  %v9695_v6 = vpop.eup %6560 }
 0x2ad   :  { %v10619_v2 = vxor.u32 2147483648, %v9692_v58  ;;  %v409_v10 = vshll.u32 %v9685_v23, 30  ;;  %v481_v51 = vor.u32 %v480_v43, %v479_v14  ;;  %v491_v1 = vsel %vm485_vm0, %v478_v32, 920167782 }
 0x2ae   :  { %v10620_v54 = vxor.u32 2147483648, %v9695_v6  ;;  %v637_v35 = vmul.f32 %v636_v49, %v634_v22  ;;  %v458_v37 = vor.u32 8388608, %v457_v13  ;;  %vm482_vm10 = vcmp.lt.s32.totalorder %v9642_v36, 1  ;;  %v5644_v22 = vld [vmem:[%s10411_s6 + $0x8] sm:$0xff] }
 0x2af   :  { %v3353_v3 = vsel %vm3351_vm5, %v10619_v2, %v9695_v6  ;;  %v9708_v24 = vsub.s32 %v406_v20, %v409_v10  ;;  %vm484_vm11 = vcmp.lt.s32.totalorder %v9642_v36, 3  ;;  %v487_v43 = vsel %vm485_vm0, %v475_v52, 2102212464  ;;  %5654 = vperm.xlu0 %6481, %v5644_v22  }
 0x2b0   :  { %v3350_v49 = vsel %vm3348_vm9, %v9692_v58, %v10620_v54  ;;  %v638_v40 = vxor.u32 2147483648, %v637_v35  ;;  %v490_v20 = vsel %vm482_vm10, %v469_v0, %v472_v57  ;;  %v492_v13 = vsel %vm484_vm11, %v475_v52, %v491_v1 }
 0x2b1   :  { %v3354_v5 = vsel %vm3347_vm3, %v3350_v49, %v3353_v3  ;;  %v412_v14 = vsub.s32 0, %v9708_v24  ;;  %v494_v27 = vsel %vm482_vm10, %v472_v57, %v475_v52  ;;  %v495_v10 = vsel %vm485_vm0, %v481_v51, 1326507024 }
 0x2b2   :  { %v3355_v2 = vsel %vm10623_vm8, nan, %v3354_v5  ;;  %v639_v54 = vsel %vm556_vm2, %v638_v40, %v637_v35  ;;  %vm483_vm5 = vcmp.lt.s32.totalorder %v9642_v36, 2  ;;  %v496_v56 = vsel %vm484_vm11, %v478_v32, %v495_v10  ;;  %v5867_v35 = vld [vmem:[%s10413_s8] sm:$0x3] }
 0x2b3   :  { %6312 = vmatprep.subr.mxu1 %v3355_v2  ;;  %v642_v52 = vsel %vm9646_vm14, %v10803_v12, %v639_v54  ;;  %v6050_v1 = vmin.u32 %v412_v14, %v9708_v24  ;;  %v493_v51 = vsel %vm483_vm5, %v490_v20, %v492_v13  ;;  %v498_v3 = vshll.u32 %v458_v37, 8  ;;  %5870 = vperm.xlu0 %6481, %v5867_v35  }
 0x2b4   :  { %6562 = vcosq.f32 %v642_v52  ;;  %6313 = vmatpush3.msra.mxu1 %v3355_v2  ;;  %v486_v32 = vsel %vm482_vm10, %v466_v25, %v469_v0  ;;  %v488_v22 = vsel %vm484_vm11, %v472_v57, %v487_v43  ;;  %v497_v45 = vsel %vm483_vm5, %v494_v27, %v496_v56 }
 0x2b5   :  { %6564 = vsinq.f32 %v642_v52  ;;  %v414_v54 = vclz %v6050_v1  ;;  %v9754_v49 = vmul.u32.u64.low %v498_v3, %v497_v45  ;;  %v9755_v40 = vmul.u32.u64.high %v498_v3, %v497_v45, %v9754_v49 }
 0x2b6   :  { %v9757_v37 = vmul.u32.u64.low %v498_v3, %v493_v51  ;;  %v9758_v20 = vmul.u32.u64.high %v498_v3, %v493_v51, %v9757_v37  ;;  %v9762_v2 = vand.u32 3, %v9657_v31  ;;  %v257_v0 = vsub.s32 32, %v9630_v44 }
 0x2b7   :  { %v6051_v25 = vadd.s32 4294967294, %v414_v54  ;;  %v489_v57 = vsel %vm483_vm5, %v486_v32, %v488_v22  ;;  %v9770_v43 = vshrl.u32 %v9516_v63, 5  ;;  %v402_v13 = vadd.s32 %v9625_v62, %v9623_v15 }
 0x2b8   :  { %vm507_vm14 = vc.u32 %v9755_v40, %v9757_v37  ;;  %v508_v14 = vadd.s32 1, %v9758_v20  ;;  %vm3145_vm9 = vcmp.eq.s32.totalorder %v9762_v2, 2  ;;  %v505_v56 = vmul.u32 %v498_v3, %v489_v57 }
 0x2b9   :  { %vm6052_vm2 = vcmp.lt.s32.totalorder %v6051_v25, 0  ;;  %v10629_v36 = vand.u32 2147483647, %v10772_v8  ;;  %vm3142_vm3 = vcmp.eq.s32.totalorder %v9762_v2, 0  ;;  %v260_v1 = vshrl.u32 %v10666_v7, %v257_v0 }
 0x2ba   :  { %v417_v5 = vsel %vm6052_vm2, 0, %v6051_v25  ;;  %v509_v63 = vsel %vm507_vm14, %v508_v14, %v9758_v20  ;;  %v263_v15 = vshrl.u32 %v10667_v30, %v257_v0  ;;  %vm3141_vm0 = vcmp.lt.s32.totalorder %v9762_v2, 2 }
 0x2bb   :  { %v418_v27 = vsub.s32 32, %v417_v5  ;;  %v422_v10 = vsub.s32 4294967266, %v417_v5  ;;  %v419_v52 = vshll.u32 %v9708_v24, %v417_v5  ;;  %v510_v35 = vadd.s32 %v509_v63, %v505_v56 }
 0x2bc   :  { %v269_v32 = vshrl.u32 %v10668_v48, %v257_v0  ;;  %vm10621_vm10 = vweird.f32 %v10803_v12  ;;  %v432_v3 = vsub.s32 4, %v9685_v23  ;;  %v259_v24 = vshll.u32 %v10665_v4, %v9630_v44  ;;  %v10863_v12 = vld [vmem:[#allocation26_spill] sm:$0xff] }
 0x2bd   :  { %v420_v62 = vshrl.u32 %v402_v13, %v418_v27  ;;  %v423_v51 = vadd.s32 127, %v422_v10  ;;  %v266_v22 = vshrl.u32 %v10664_v39, %v257_v0  ;;  %v268_v45 = vshll.u32 %v10664_v39, %v9630_v44 }
 0x2be   :  { %v511_v20 = vadd.s32 536870912, %v510_v35  ;;  %v262_v25 = vshll.u32 %v10666_v7, %v9630_v44  ;;  %vm348_vm11 = vcmp.lt.s32.totalorder %v10779_v18, 0  ;;  %v249_v57 = vand.u32 8388607, %v10629_v36 }
 0x2bf   :  { %v421_v54 = vor.u32 %v420_v62, %v419_v52  ;;  %v424_v49 = vshll.u32 %v423_v51, 23  ;;  %v265_v13 = vshll.u32 %v10667_v30, %v9630_v44  ;;  %v270_v5 = vor.u32 %v269_v32, %v268_v45 }
 0x2c0   :  { %v272_v14 = vshrl.u32 %v10669_v60, %v257_v0  ;;  %v10815_v39 = vand.u32 2147483647, %v10779_v18  ;;  %v9807_v56 = vshrl.u32 %v511_v20, 30  ;;  %v261_v52 = vor.u32 %v260_v1, %v259_v24 }
 0x2c1   :  { %v9799_v27 = vpop.eup %6562  ;;  %v425_v7 = vor.u32 4788187, %v424_v49  ;;  %v264_v63 = vor.u32 %v263_v15, %v262_v25  ;;  %v267_v51 = vor.u32 %v266_v22, %v265_v13  ;;  %v271_v60 = vshll.u32 %v10668_v48, %v9630_v44 }
 0x2c2   :  { %vm9803_vm5 = vcmp.le.f32.partialorder %v10815_v39, 0.7853982  ;;  %v9809_v62 = vpop.eup %6564  ;;  %v10624_v30 = vxor.u32 2147483648, %v9799_v27  ;;  %vm277_vm2 = vcmp.lt.s32.totalorder %v9770_v43, 4  ;;  %v428_v39 = vcvt.s32.f32 %v421_v54 }
 0x2c3   :  { %v10625_v32 = vxor.u32 2147483648, %v9809_v62  ;;  %v426_v45 = vand.u32 2147483647, %v425_v7  ;;  %v513_v49 = vshll.u32 %v9807_v56, 30  ;;  %v258_v15 = vshrl.u32 %v10665_v4, %v257_v0 }
 0x2c4   :  { %v3147_v1 = vsel %vm3145_vm9, %v10624_v30, %v9809_v62  ;;  %v273_v24 = vor.u32 %v272_v14, %v271_v60  ;;  %v283_v48 = vsel %vm277_vm2, %v270_v5, 920167782  ;;  %vm274_vm14 = vcmp.lt.s32.totalorder %v9770_v43, 1 }
 0x2c5   :  { %v3144_v44 = vsel %vm3142_vm3, %v9799_v27, %v10625_v32  ;;  %v429_v22 = vmul.f32 %v428_v39, %v426_v45  ;;  %v9830_v54 = vsub.s32 %v510_v35, %v513_v49  ;;  %v250_v25 = vor.u32 8388608, %v249_v57 }
 0x2c6   :  { %v3148_v20 = vsel %vm3141_vm0, %v3144_v44, %v3147_v1  ;;  %vm276_vm9 = vcmp.lt.s32.totalorder %v9770_v43, 3  ;;  %v282_v4 = vsel %vm274_vm14, %v261_v52, %v264_v63  ;;  %vm275_vm3 = vcmp.lt.s32.totalorder %v9770_v43, 2  ;;  %v9859_v1 = vld [vmem:[%s10414_s3] sm:$0xff] }
 0x2c7   :  { %v3149_v0 = vsel %vm10621_vm10, nan, %v3148_v20  ;;  %v430_v13 = vxor.u32 2147483648, %v429_v22  ;;  %v516_v14 = vsub.s32 0, %v9830_v54  ;;  %v284_v35 = vsel %vm276_vm9, %v267_v51, %v283_v48 }
 0x2c8   :  { %5260 = vmatpush1.msra.mxu0 %v3149_v0  ;;  %v286_v2 = vsel %vm274_vm14, %v264_v63, %v267_v51  ;;  %v287_v57 = vsel %vm277_vm2, %v273_v24, 1326507024  ;;  %v278_v45 = vsel %vm274_vm14, %v258_v15, %v261_v52  ;;  %v279_v39 = vsel %vm277_vm2, %v267_v51, 2102212464 }
 0x2c9   :  { %v431_v7 = vsel %vm348_vm11, %v430_v13, %v429_v22  ;;  %v6054_v60 = vmin.u32 %v516_v14, %v9830_v54  ;;  %v10627_v49 = vmov 0.0   ;;  %v285_v48 = vsel %vm275_vm3, %v282_v4, %v284_v35  ;;  %v10818_v14 = vld [vmem:[#allocation37_spill] sm:$0xff] }
 0x2ca   :  { %5295 = vmatprep.mubr.f32.mxu0 %v10627_v49  ;;  %v434_v24 = vsel %vm9803_vm5, %v10779_v18, %v431_v7  ;;  %v288_v52 = vsel %vm276_vm9, %v270_v5, %v287_v57  ;;  %v290_v15 = vshll.u32 %v250_v25, 8  ;;  %vm5218_vm0 = vcmask 523264  }
 0x2cb   :  { %6566 = vcosq.f32 %v434_v24  ;;  %v518_v51 = vclz %v6054_v60  ;;  %v289_v44 = vsel %vm275_vm3, %v286_v2, %v288_v52  ;;  %v280_v22 = vsel %vm276_vm9, %v264_v63, %v279_v39  ;;  %6316 = vmatprep.mubr.msk.f32.mxu1 %vm5218_vm0, %v9859_v1 }
 0x2cc   :  { %6568 = vsinq.f32 %v434_v24  ;;  %v9872_v20 = vmul.u32.u64.low %v290_v15, %v289_v44  ;;  %v9873_v0 = vmul.u32.u64.high %v290_v15, %v289_v44, %v9872_v20  ;;  %v433_v5 = vsel %vm348_vm11, %v432_v3, %v9685_v23  ;;  %v10819_v24 = vld [vmem:[#allocation30_spill] sm:$0xff] }
 0x2cd   :  { %v6055_v25 = vadd.s32 4294967294, %v518_v51  ;;  %v9882_v4 = vmul.u32.u64.low %v290_v15, %v285_v48  ;;  %v9883_v13 = vmul.u32.u64.high %v290_v15, %v285_v48, %v9882_v4  ;;  %v2623_v35 = vadd.s32 3, %v10818_v14 }
 0x2ce   :  { %v281_v63 = vsel %vm275_vm3, %v278_v45, %v280_v22  ;;  %v9891_v2 = vsel %vm9803_vm5, 0, %v433_v5  ;;  %v536_v7 = vsub.s32 4, %v9807_v56  ;;  %v506_v23 = vadd.s32 %v9757_v37, %v9755_v40  ;;  %v10820_v45 = vld [vmem:[#allocation36_spill] sm:$0xff] }
 0x2cf   :  { %vm6056_vm2 = vcmp.lt.s32.totalorder %v6055_v25, 0  ;;  %vm299_vm11 = vc.u32 %v9873_v0, %v9882_v4  ;;  %v300_v39 = vadd.s32 1, %v9883_v13  ;;  %v9900_v43 = vadd.s32 3, %v10819_v24 }
 0x2d0   :  { %v521_v57 = vsel %vm6056_vm2, 0, %v6055_v25  ;;  %v9903_v10 = vadd.s32 3, %v10820_v45  ;;  %vm452_vm5 = vcmp.lt.s32.totalorder %v10780_v53, 0  ;;  %v297_v48 = vmul.u32 %v290_v15, %v281_v63 }
 0x2d1   :  { %v522_v3 = vsub.s32 32, %v521_v57  ;;  %v526_v60 = vsub.s32 4294967266, %v521_v57  ;;  %v523_v52 = vshll.u32 %v9830_v54, %v521_v57  ;;  %v301_v22 = vsel %vm299_vm11, %v300_v39, %v9883_v13 }
 0x2d2   :  { %v9909_v40 = vadd.s32 3, %v8514_v33  ;;  %v2934_v37 = vand.u32 3, %v9891_v2  ;;  %v537_v20 = vsel %vm452_vm5, %v536_v7, %v9807_v56  ;;  %v302_v5 = vadd.s32 %v301_v22, %v297_v48  ;;  %v10824_v56 = vld [vmem:[#allocation40_spill] sm:$0xff] }
 0x2d3   :  { %v524_v51 = vshrl.u32 %v506_v23, %v522_v3  ;;  %v527_v44 = vadd.s32 127, %v526_v60  ;;  %v9916_v25 = vadd.s32 3, %v8961_v26  ;;  %v9919_v15 = vadd.s32 3, %v9371_v17  ;;  %v10825_v48 = vld [vmem:[#allocation44_spill] sm:$0xff] }
 0x2d4   :  { %v9922_v13 = vadd.s32 3, %v9657_v31  ;;  %v10821_v33 = vand.u32 2147483647, %v10780_v53  ;;  %v303_v57 = vadd.s32 536870912, %v302_v5  ;;  %v2727_v7 = vadd.s32 3, %v10824_v56 }
 0x2d5   :  { %v525_v54 = vor.u32 %v524_v51, %v523_v52  ;;  %v528_v14 = vshll.u32 %v527_v44, 23  ;;  %vm438_vm9 = vweird.f32 %v10779_v18  ;;  %v2624_v23 = vand.u32 3, %v2623_v35 }
 0x2d6   :  { %vm9926_vm14 = vcmp.le.f32.partialorder %v10821_v33, 0.7853982  ;;  %vm2935_vm3 = vcmp.lt.s32.totalorder %v2934_v37, 2  ;;  %vm2936_vm2 = vcmp.eq.s32.totalorder %v2934_v37, 0  ;;  %vm2939_vm11 = vcmp.eq.s32.totalorder %v2934_v37, 2 }
 0x2d7   :  { %v529_v26 = vor.u32 4788187, %v528_v14  ;;  %v9934_v17 = vsel %vm9926_vm14, 0, %v537_v20  ;;  %v304_v31 = vshrl.u32 %v303_v57, 30  ;;  %v532_v45 = vcvt.s32.f32 %v525_v54  ;;  %v10826_v57 = vld [vmem:[#allocation39_spill] sm:$0xff] }
 0x2d8   :  { %v9936_v3 = vpop.eup %6566  ;;  %v2311_v52 = vadd.s32 3, %v10825_v48  ;;  %v9944_v44 = vand.u32 3, %v9934_v17  ;;  %v2728_v22 = vand.u32 3, %v2727_v7  ;;  %vm244_vm10 = vcmp.lt.s32.totalorder %v10772_v8, 0 }
 0x2d9   :  { %v9938_v60 = vpop.eup %6568  ;;  %v10626_v39 = vxor.u32 2147483648, %v9936_v3  ;;  %v530_v24 = vand.u32 2147483647, %v529_v26  ;;  %v305_v35 = vshll.u32 %v304_v31, 30  ;;  %vm2626_vm12 = vcmp.eq.s32.totalorder %v2624_v23, 0  ;;  %v10828_v26 = vld [vmem:[#allocation38_spill] sm:$0xff] }
 0x2da   :  { %v10630_v51 = vxor.u32 2147483648, %v9938_v60  ;;  %vm2629_vm8 = vcmp.eq.s32.totalorder %v2624_v23, 2  ;;  %v10827_v56 = vxor.u32 2147483648, %v10826_v57  ;;  %v10829_v48 = vxor.u32 2147483648, %v10828_v26 }
 0x2db   :  { %v2941_v20 = vsel %vm2939_vm11, %v10626_v39, %v9938_v60  ;;  %v533_v14 = vmul.f32 %v532_v45, %v530_v24  ;;  %v9954_v33 = vsub.s32 %v302_v5, %v305_v35  ;;  %v2312_v32 = vand.u32 3, %v2311_v52  ;;  %v10830_v39 = vld [vmem:[#allocation45_spill] sm:$0xff] }
 0x2dc   :  { %v2938_v54 = vsel %vm2936_vm2, %v9936_v3, %v10630_v51  ;;  %v2628_v7 = vsel %vm2626_vm12, %v10828_v26, %v10827_v56  ;;  %v2631_v30 = vsel %vm2629_vm8, %v10829_v48, %v10826_v57  ;;  %v2415_v49 = vadd.s32 3, %v10830_v39  ;;  %v10846_v51 = vld [vmem:[#allocation28_spill] sm:$0xff] }
 0x2dd   :  { %v2942_v24 = vsel %vm2935_vm3, %v2938_v54, %v2941_v20  ;;  %v534_v45 = vxor.u32 2147483648, %v533_v14  ;;  %v10831_v5 = vand.u32 2147483647, %v10772_v8  ;;  %v308_v56 = vsub.s32 0, %v9954_v33  ;;  %v10834_v20 = vld [vmem:[#allocation42_spill] sm:$0xff]  ;;  %v10836_v54 = vld [vmem:[#allocation41_spill] sm:$0xff] }
 0x2de   :  { %v2943_v36 = vsel %vm438_vm9, nan, %v2942_v24  ;;  %vm2625_vm12 = vcmp.lt.s32.totalorder %v2624_v23, 2  ;;  %vm2730_vm11 = vcmp.eq.s32.totalorder %v2728_v22, 0  ;;  %v10835_v39 = vxor.u32 2147483648, %v10834_v20 }
 0x2df   :  { %vm9968_vm2 = vcmp.le.f32.partialorder %v10831_v5, 0.7853982  ;;  %5261 = vmatprep.subr.mxu0 %v2943_v36  ;;  %v535_v37 = vsel %vm452_vm5, %v534_v45, %v533_v14  ;;  %v2632_v52 = vsel %vm2625_vm12, %v2628_v7, %v2631_v30  ;;  %vm2733_vm8 = vcmp.eq.s32.totalorder %v2728_v22, 2  ;;  %v10838_v7 = vld [vmem:[#allocation47_spill] sm:$0xff]  ;;  %v10840_v5 = vld [vmem:[#allocation46_spill] sm:$0xff] }
 0x2e0   :  { %v2732_v57 = vsel %vm2730_vm11, %v10836_v54, %v10835_v39  ;;  %v538_v26 = vsel %vm9926_vm14, %v10780_v53, %v535_v37  ;;  %v6046_v48 = vmin.u32 %v308_v56, %v9954_v33  ;;  %v328_v24 = vsub.s32 4, %v304_v31 }
 0x2e1   :  { %v10837_v23 = vxor.u32 2147483648, %v10836_v54  ;;  %6570 = vcosq.f32 %v538_v26  ;;  %vm2314_vm3 = vcmp.eq.s32.totalorder %v2312_v32, 0  ;;  %vm2317_vm5 = vcmp.eq.s32.totalorder %v2312_v32, 2 }
 0x2e2   :  { %v2416_v30 = vand.u32 3, %v2415_v49  ;;  %6572 = vsinq.f32 %v538_v26  ;;  %v310_v14 = vclz %v6046_v48  ;;  %v10839_v45 = vxor.u32 2147483648, %v10838_v7 }
 0x2e3   :  { %v2735_v36 = vsel %vm2733_vm8, %v10837_v23, %v10834_v20  ;;  %v10841_v63 = vxor.u32 2147483648, %v10840_v5  ;;  %v298_v56 = vadd.s32 %v9882_v4, %v9873_v0  ;;  %v9995_v20 = vsel %vm2622_vm7, nan, %v2632_v52  ;;  %v10844_v0 = vld [vmem:[#allocation48_spill] sm:$0xff] }
 0x2e4   :  { %v2316_v39 = vsel %vm2314_vm3, %v10840_v5, %v10839_v45  ;;  %vm2729_vm14 = vcmp.lt.s32.totalorder %v2728_v22, 2  ;;  %v2208_v49 = vand.u32 3, %v9900_v43  ;;  %v6047_v54 = vadd.s32 4294967294, %v310_v14  ;;  %v10848_v14 = vld [vmem:[#allocation33_spill] sm:$0xff] }
 0x2e5   :  { %v2319_v37 = vsel %vm2317_vm5, %v10841_v63, %v10838_v7  ;;  %v329_v26 = vsel %vm244_vm10, %v328_v24, %v304_v31  ;;  %v2736_v48 = vsel %vm2729_vm14, %v2732_v57, %v2735_v36  ;;  %vm2313_vm12 = vcmp.lt.s32.totalorder %v2312_v32, 2  ;;  %v10843_v7 = vld [vmem:[#allocation27_spill] sm:$0xff]  ;;  %v10849_v24 = vld [vmem:[#allocation29_spill] sm:$0xff] }
 0x2e6   :  { %v2320_v23 = vsel %vm2313_vm12, %v2316_v39, %v2319_v37  ;;  %vm2418_vm11 = vcmp.eq.s32.totalorder %v2416_v30, 0  ;;  %vm2421_vm8 = vcmp.eq.s32.totalorder %v2416_v30, 2  ;;  %v1999_v45 = vadd.s32 3, %v10843_v7  ;;  %v10851_v39 = vld [vmem:[#allocation19_spill] sm:$0xff] }
 0x2e7   :  { %vm6048_vm3 = vcmp.lt.s32.totalorder %v6047_v54, 0  ;;  %v10845_v4 = vxor.u32 2147483648, %v10844_v0  ;;  %v10847_v22 = vxor.u32 2147483648, %v10846_v51  ;;  %v2103_v5 = vadd.s32 3, %v10848_v14 }
 0x2e8   :  { %v313_v63 = vsel %vm6048_vm3, 0, %v6047_v54  ;;  %v331_v32 = vsel %vm9968_vm2, 0, %v329_v26  ;;  %vm2417_vm7 = vcmp.lt.s32.totalorder %v2416_v30, 2  ;;  %vm2210_vm5 = vcmp.eq.s32.totalorder %v2208_v49, 0 }
 0x2e9   :  { %v2420_v52 = vsel %vm2418_vm11, %v10846_v51, %v10845_v4  ;;  %v2423_v43 = vsel %vm2421_vm8, %v10847_v22, %v10844_v0  ;;  %vm3042_vm14 = vcmp.eq.s32.totalorder %v9944_v44, 2  ;;  %v314_v31 = vsub.s32 32, %v313_v63 }
 0x2ea   :  { %v318_v57 = vsub.s32 4294967266, %v313_v63  ;;  %v10850_v36 = vxor.u32 2147483648, %v10849_v24  ;;  %vm2213_vm12 = vcmp.eq.s32.totalorder %v2208_v49, 2  ;;  %vm3039_vm11 = vcmp.eq.s32.totalorder %v9944_v44, 0 }
 0x2eb   :  { %v2424_v7 = vsel %vm2417_vm7, %v2420_v52, %v2423_v43  ;;  %v10852_v54 = vxor.u32 2147483648, %v10851_v39  ;;  %v2000_v4 = vand.u32 3, %v1999_v45  ;;  %v10019_v30 = vand.u32 3, %v9903_v10 }
 0x2ec   :  { %v2212_v37 = vsel %vm2210_vm5, %v10851_v39, %v10850_v36  ;;  %vm3038_vm8 = vcmp.lt.s32.totalorder %v9944_v44, 2  ;;  %v315_v26 = vshll.u32 %v9954_v33, %v313_v63  ;;  %v316_v51 = vshrl.u32 %v298_v56, %v314_v31 }
 0x2ed   :  { %v2215_v0 = vsel %vm2213_vm12, %v10852_v54, %v10849_v24  ;;  %v319_v22 = vadd.s32 127, %v318_v57  ;;  %v2104_v14 = vand.u32 3, %v2103_v5  ;;  %vm542_vm3 = vweird.f32 %v10780_v53 }
 0x2ee   :  { %v2737_v52 = vsel %vm2726_vm1, nan, %v2736_v48  ;;  %v10028_v39 = vsel %vm2310_vm15, nan, %v2320_v23  ;;  %vm2209_vm7 = vcmp.lt.s32.totalorder %v2208_v49, 2  ;;  %v1791_v10 = vadd.s32 3, %v8451_v9  ;;  %v10856_v48 = vld [vmem:[#allocation34_spill] sm:$0xff]  ;;  %v10045_v49 = vpop.eup %6570 }
 0x2ef   :  { %v317_v45 = vor.u32 %v316_v51, %v315_v26  ;;  %v320_v24 = vshll.u32 %v319_v22, 23  ;;  %v10031_v54 = vadd.s32 3, %v331_v32  ;;  %v10033_v33 = vand.u32 3, %v331_v32  ;;  %v10048_v32 = vpop.eup %6572 }
 0x2f0   :  { %v10037_v5 = vsel %vm2414_vm13, nan, %v2424_v7  ;;  %v10039_v63 = vsel %vm2209_vm7, %v2212_v37, %v2215_v0  ;;  %v1687_v31 = vadd.s32 3, %v10856_v48  ;;  %v10043_v23 = vand.u32 3, %v9909_v40  ;;  %v10857_v7 = vld [vmem:[#allocation50_spill] sm:$0xff]  ;;  %v10859_v37 = vld [vmem:[#allocation49_spill] sm:$0xff]  ;;  %v10861_v48 = vld [vmem:[#allocation35_spill] sm:$0xff] }
 0x2f1   :  { %v321_v9 = vor.u32 4788187, %v320_v24  ;;  %vm2002_vm1 = vcmp.eq.s32.totalorder %v2000_v4, 0  ;;  %vm2106_vm15 = vcmp.eq.s32.totalorder %v2104_v14, 0  ;;  %vm1898_vm5 = vcmp.eq.s32.totalorder %v10019_v30, 0 }
 0x2f2   :  { %v10633_v57 = vxor.u32 2147483648, %v10045_v49  ;;  %v10858_v26 = vxor.u32 2147483648, %v10857_v7  ;;  %vm2109_vm13 = vcmp.eq.s32.totalorder %v2104_v14, 2  ;;  %v1792_v51 = vand.u32 3, %v1791_v10 }
 0x2f3   :  { %v10634_v40 = vxor.u32 2147483648, %v10048_v32  ;;  %v322_v22 = vand.u32 2147483647, %v321_v9  ;;  %v324_v36 = vcvt.s32.f32 %v317_v45  ;;  %v10860_v43 = vxor.u32 2147483648, %v10859_v37 }
 0x2f4   :  { %v2108_v0 = vsel %vm2106_vm15, %v10859_v37, %v10858_v26  ;;  %v3044_v56 = vsel %vm3042_vm14, %v10633_v57, %v10048_v32  ;;  %v10862_v18 = vxor.u32 2147483648, %v10861_v48  ;;  %vm2005_vm12 = vcmp.eq.s32.totalorder %v2000_v4, 2 }
 0x2f5   :  { %v2111_v24 = vsel %vm2109_vm13, %v10860_v43, %v10857_v7  ;;  %v10066_v10 = vand.u32 3, %v1687_v31  ;;  %v3041_v45 = vsel %vm3039_vm11, %v10045_v49, %v10634_v40  ;;  %v325_v9 = vmul.f32 %v324_v36, %v322_v22  ;;  %v10083_v40 = vld [vmem:[%s10414_s3 + $0x8] sm:$0xff] }
 0x2f6   :  { %v2004_v26 = vsel %vm2002_vm1, %v10863_v12, %v10862_v18  ;;  %v10864_v7 = vxor.u32 2147483648, %v10863_v12  ;;  %vm2105_vm7 = vcmp.lt.s32.totalorder %v2104_v14, 2  ;;  %v3045_v43 = vsel %vm3038_vm8, %v3041_v45, %v3044_v56  ;;  %v10866_v12 = vld [vmem:[#allocation52_spill] sm:$0xff]  ;;  %v10870_v56 = vld [vmem:[#allocation21_spill] sm:$0xff] }
 0x2f7   :  { %v2112_v57 = vsel %vm2105_vm7, %v2108_v0, %v2111_v24  ;;  %vm1794_vm14 = vcmp.eq.s32.totalorder %v1792_v51, 0  ;;  %vm1797_vm1 = vcmp.eq.s32.totalorder %v1792_v51, 2  ;;  %v3046_v18 = vsel %vm542_vm3, nan, %v3045_v43  ;;  %v10868_v0 = vld [vmem:[#allocation22_spill] sm:$0xff] }
 0x2f8   :  { %v2007_v37 = vsel %vm2005_vm12, %v10864_v7, %v10861_v48  ;;  %v326_v31 = vxor.u32 2147483648, %v325_v9  ;;  %v10865_v22 = vxor.u32 2147483648, %v8528_v38  ;;  %v10867_v44 = vxor.u32 2147483648, %v10866_v12  ;;  %6314 = vmatprep.subr.mxu1 %v3046_v18 }
 0x2f9   :  { %vm2001_vm11 = vcmp.lt.s32.totalorder %v2000_v4, 2  ;;  %v10869_v24 = vxor.u32 2147483648, %v10868_v0  ;;  %vm1901_vm8 = vcmp.eq.s32.totalorder %v10019_v30, 2  ;;  %v1479_v45 = vadd.s32 3, %v8751_v59  ;;  %6315 = vmatpush3.msra.mxu1 %v3046_v18 }
 0x2fa   :  { %v1796_v36 = vsel %vm1794_vm14, %v10866_v12, %v10865_v22  ;;  %v1799_v14 = vsel %vm1797_vm1, %v10867_v44, %v8528_v38  ;;  %v327_v7 = vsel %vm244_vm10, %v326_v31, %v325_v9  ;;  %v2008_v43 = vsel %vm2001_vm11, %v2004_v26, %v2007_v37  ;;  %6322 = vmatprep.subr.mxu1 %v2737_v52  ;;  %v10113_v26 = vld [vmem:[%s10414_s3 + $0x10] sm:$0xff] }
 0x2fb   :  { %v1900_v48 = vsel %vm1898_vm5, %v10870_v56, %v10869_v24  ;;  %v10871_v38 = vxor.u32 2147483648, %v10870_v56  ;;  %vm1793_vm15 = vcmp.lt.s32.totalorder %v1792_v51, 2  ;;  %v330_v4 = vsel %vm9968_vm2, %v10772_v8, %v327_v7  ;;  %6317 = vmatmul.mubr.msk.f32.vlgmr.msra.gmra.mxu1 %vm5218_vm0, %v10083_v40  ;;  %v10873_v51 = vld [vmem:[#allocation32_spill] sm:$0xff] }
 0x2fc   :  { %v2113_v59 = vsel %vm2102_vm4, nan, %v2112_v57  ;;  %v1800_v44 = vsel %vm1793_vm15, %v1796_v36, %v1799_v14  ;;  %v1480_v9 = vand.u32 3, %v1479_v45  ;;  %6574 = vcosq.f32 %v330_v4  ;;  %6323 = vmatpush3.msra.mxu1 %v2737_v52  ;;  %6319 = vmatprep.mubr.msk.f32.mxu1 %vm5218_vm0, %v10113_v26  ;;  %v10123_v57 = vld [vmem:[%s10414_s3 + $0x18] sm:$0xff]  ;;  %v10875_v52 = vld [vmem:[#allocation31_spill] sm:$0xff]  ;;  %v10877_v14 = vld [vmem:[#allocation10_spill] sm:$0xff] }
 0x2fd   :  { %v1903_v22 = vsel %vm1901_vm8, %v10871_v38, %v10868_v0  ;;  %vm1690_vm10 = vcmp.eq.s32.totalorder %v10066_v10, 0  ;;  %vm1693_vm2 = vcmp.eq.s32.totalorder %v10066_v10, 2  ;;  %v1375_v35 = vadd.s32 3, %v8701_v46  ;;  %6324 = vmatprep.subr.mxu1 %v10037_v5  ;;  %v10136_v46 = vld [vmem:[%s10415_s2] sm:$0xff] }
 0x2fe   :  { %6576 = vsinq.f32 %v330_v4  ;;  %v10874_v37 = vxor.u32 2147483648, %v10873_v51  ;;  %v10876_v31 = vxor.u32 2147483648, %v10875_v52  ;;  %vm1586_vm4 = vcmp.eq.s32.totalorder %v10043_v23, 0  ;;  %6325 = vmatpush3.msra.mxu1 %v10037_v5  ;;  %v10882_v4 = vld [vmem:[#allocation25_spill] sm:$0xff] }
 0x2ff   :  { %vm10878_vm5 = vweird.f32 %v10877_v14  ;;  %v10879_v24 = vxor.u32 2147483648, %v8656_v42  ;;  %vm1589_vm13 = vcmp.eq.s32.totalorder %v10043_v23, 2  ;;  %vm1482_vm12 = vcmp.eq.s32.totalorder %v1480_v9, 0  ;;  %6326 = vmatprep.subr.mxu1 %v2113_v59  ;;  %6320 = vmatmul.mubr.msk.f32.gmra.mxu1 %vm5218_vm0, %v10123_v57 }
 0x300   :  { %v1692_v18 = vsel %vm1690_vm10, %v10875_v52, %v10874_v37  ;;  %v1695_v36 = vsel %vm1693_vm2, %v10876_v31, %v10873_v51  ;;  %v1801_v0 = vsel %vm10878_vm5, nan, %v1800_v44  ;;  %v10880_v45 = vxor.u32 2147483648, %v8648_v47  ;;  %6327 = vmatpush3.msra.mxu1 %v2113_v59  ;;  %6338 = vmatprep.mubr.msk.f32.mxu1 %vm5218_vm0, %v10136_v46 }
 0x301   :  { %v1588_v56 = vsel %vm1586_vm4, %v8648_v47, %v10879_v24  ;;  %v10881_v38 = vxor.u32 2147483648, %v8910_v19  ;;  %vm1485_vm7 = vcmp.eq.s32.totalorder %v1480_v9, 2  ;;  %v1167_v5 = vadd.s32 3, %v9165_v50  ;;  %v10886_v50 = vld [vmem:[#allocation6_spill] sm:$0xff]  ;;  %6328 = vmatprep.subr.mxu1 %v1801_v0 }
 0x302   :  { %v1591_v7 = vsel %vm1589_vm13, %v10880_v45, %v8656_v42  ;;  %v1376_v44 = vand.u32 3, %v1375_v35  ;;  %vm1481_vm14 = vcmp.lt.s32.totalorder %v1480_v9, 2  ;;  %v10883_v51 = vxor.u32 2147483648, %v10882_v4  ;;  %v10884_v42 = vld [vmem:[#allocation3_spill] sm:$0xff]  ;;  %6329 = vmatpush3.msra.mxu1 %v1801_v0 }
 0x303   :  { %v1484_v12 = vsel %vm1482_vm12, %v10882_v4, %v10881_v38  ;;  %v1272_v47 = vand.u32 3, %v9916_v25  ;;  %vm10885_vm1 = vweird.f32 %v10884_v42  ;;  %vm10887_vm11 = vweird.f32 %v10886_v50  ;;  %v10899_v4 = vld [vmem:[#allocation54_spill] sm:$0xff] }
 0x304   :  { %v1487_v37 = vsel %vm1485_vm7, %v10883_v51, %v8910_v19  ;;  %v10163_v52 = vsel %vm10885_vm1, nan, %v10039_v63  ;;  %v10167_v31 = vsel %vm10887_vm11, nan, %v2008_v43  ;;  %vm1897_vm8 = vcmp.lt.s32.totalorder %v10019_v30, 2  ;;  %v10888_v19 = vld [vmem:[#allocation14_spill] sm:$0xff]  ;;  %v10890_v43 = vld [vmem:[#allocation55_spill] sm:$0xff] }
 0x305   :  { %v1488_v59 = vsel %vm1481_vm14, %v1484_v12, %v1487_v37  ;;  %v1904_v9 = vsel %vm1897_vm8, %v1900_v48, %v1903_v22  ;;  %vm1689_vm15 = vcmp.lt.s32.totalorder %v10066_v10, 2  ;;  %vm1585_vm10 = vcmp.lt.s32.totalorder %v10043_v23, 2  ;;  %v10891_v23 = vld [vmem:[#allocation53_spill] sm:$0xff]  ;;  %v10893_v48 = vld [vmem:[#allocation23_spill] sm:$0xff] }
 0x306   :  { %vm10889_vm2 = vweird.f32 %v10888_v19  ;;  %vm2836_vm4 = vcmp.eq.s32.totalorder %v10033_v33, 2  ;;  %v1696_v63 = vsel %vm1689_vm15, %v1692_v18, %v1695_v36  ;;  %v1592_v35 = vsel %vm1585_vm10, %v1588_v56, %v1591_v7  ;;  %v10897_v7 = vld [vmem:[#allocation5_spill] sm:$0xff] }
 0x307   :  { %v1489_v25 = vsel %vm10889_vm2, nan, %v1488_v59  ;;  %v1063_v14 = vadd.s32 3, %v10890_v43  ;;  %v1168_v24 = vand.u32 3, %v1167_v5  ;;  %vm2833_vm5 = vcmp.eq.s32.totalorder %v10033_v33, 0  ;;  %v10901_v5 = vld [vmem:[#allocation51_spill] sm:$0xff]  ;;  %v10903_v59 = vld [vmem:[#allocation9_spill] sm:$0xff] }
 0x308   :  { %6330 = vmatprep.subr.mxu1 %v1489_v25  ;;  %vm1378_vm13 = vcmp.eq.s32.totalorder %v1376_v44, 0  ;;  %vm1274_vm12 = vcmp.eq.s32.totalorder %v1272_v47, 0  ;;  %vm1277_vm7 = vcmp.eq.s32.totalorder %v1272_v47, 2  ;;  %v855_v30 = vadd.s32 3, %v9568_v41 }
 0x309   :  { %6331 = vmatpush3.msra.mxu1 %v1489_v25  ;;  %vm2832_vm14 = vcmp.lt.s32.totalorder %v10033_v33, 2  ;;  %v10892_v10 = vxor.u32 2147483648, %v10891_v23  ;;  %vm1381_vm1 = vcmp.eq.s32.totalorder %v1376_v44, 2  ;;  %vm1170_vm11 = vcmp.eq.s32.totalorder %v1168_v24, 0  ;;  %v10905_v25 = vld [vmem:[#allocation8_spill] sm:$0xff] }
 0x30a   :  { %vm1173_vm8 = vcmp.eq.s32.totalorder %v1168_v24, 2  ;;  %vm334_vm15 = vweird.f32 %v10772_v8  ;;  %v10894_v18 = vxor.u32 2147483648, %v10893_v48  ;;  %vm1169_vm10 = vcmp.lt.s32.totalorder %v1168_v24, 2  ;;  %v10370_v8 = vld [vmem:[%s10416_s5] sm:$0xff] }
 0x30b   :  { %v1380_v22 = vsel %vm1378_vm13, %v10893_v48, %v10892_v10  ;;  %v10895_v0 = vxor.u32 2147483648, %v9313_v16  ;;  %v10896_v56 = vxor.u32 2147483648, %v9309_v21  ;;  %vm10898_vm2 = vweird.f32 %v10897_v7 }
 0x30c   :  { %v1383_v36 = vsel %vm1381_vm1, %v10894_v18, %v10891_v23  ;;  %v10194_v38 = vsel %vm10898_vm2, nan, %v1904_v9  ;;  %v10900_v12 = vxor.u32 2147483648, %v10899_v4  ;;  %v10902_v37 = vxor.u32 2147483648, %v10901_v5  ;;  %v10208_v9 = vpop.eup %6574  ;;  %v10909_v18 = vld [vmem:[#allocation13_spill] sm:$0xff] }
 0x30d   :  { %v1172_v41 = vsel %vm1170_vm11, %v9309_v21, %v10895_v0  ;;  %v1175_v45 = vsel %vm1173_vm8, %v10896_v56, %v9313_v16  ;;  %vm10904_vm13 = vweird.f32 %v10903_v59  ;;  %vm1377_vm1 = vcmp.lt.s32.totalorder %v1376_v44, 2  ;;  %v10216_v10 = vpop.eup %6576  ;;  %v10911_v56 = vld [vmem:[#allocation11_spill] sm:$0xff] }
 0x30e   :  { %v1276_v51 = vsel %vm1274_vm12, %v10901_v5, %v10900_v12  ;;  %v1279_v42 = vsel %vm1277_vm7, %v10902_v37, %v10899_v4  ;;  %v1176_v50 = vsel %vm1169_vm10, %v1172_v41, %v1175_v45  ;;  %v10204_v19 = vsel %vm10904_vm13, nan, %v1696_v63  ;;  %v10914_v12 = vld [vmem:[#allocation57_spill] sm:$0xff]  ;;  %v10918_v59 = vld [vmem:[#allocation43_spill] sm:$0xff] }
 0x30f   :  { %v1177_v21 = vsel %vm1166_vm6, nan, %v1176_v50  ;;  %v856_v16 = vand.u32 3, %v855_v30  ;;  %vm10906_vm11 = vweird.f32 %v10905_v25  ;;  %v1384_v24 = vsel %vm1377_vm1, %v1380_v22, %v1383_v36 }
 0x310   :  { %v10212_v43 = vsel %vm10906_vm11, nan, %v1592_v35  ;;  %vm1273_vm12 = vcmp.lt.s32.totalorder %v1272_v47, 2  ;;  %v10214_v23 = vand.u32 3, %v1063_v14  ;;  %6332 = vmatprep.subr.mxu1 %v1177_v21  ;;  %v342_v63 = vxor.u32 2147483648, %v10208_v9 }
 0x311   :  { %v1280_v44 = vsel %vm1273_vm12, %v1276_v51, %v1279_v42  ;;  %v10220_v11 = vand.u32 3, %v9919_v15  ;;  %6333 = vmatpush3.msra.mxu1 %v1177_v21  ;;  %v751_v30 = vadd.s32 3, %v9494_v34  ;;  %v339_v48 = vxor.u32 2147483648, %v10216_v10  ;;  %v10916_v51 = vld [vmem:[#allocation56_spill] sm:$0xff] }
 0x312   :  { %vm858_vm6 = vcmp.eq.s32.totalorder %v856_v16, 0  ;;  %vm861_vm7 = vcmp.eq.s32.totalorder %v856_v16, 2  ;;  %v439_v47 = vadd.s32 3, %v9891_v2  ;;  %v2838_v35 = vsel %vm2836_vm4, %v342_v63, %v10216_v10 }
 0x313   :  { %vm857_vm8 = vcmp.lt.s32.totalorder %v856_v16, 2  ;;  %v10907_v14 = vxor.u32 2147483648, %v9695_v6  ;;  %v10908_v34 = vxor.u32 2147483648, %v9692_v58  ;;  %v2835_v2 = vsel %vm2833_vm5, %v10208_v9, %v339_v48  ;;  %v10920_v16 = vld [vmem:[#allocation59_spill] sm:$0xff] }
 0x314   :  { %vm10910_vm10 = vweird.f32 %v10909_v18  ;;  %vm1066_vm4 = vcmp.eq.s32.totalorder %v10214_v23, 0  ;;  %v2839_v41 = vsel %vm2832_vm14, %v2835_v2, %v2838_v35  ;;  %vm10912_vm2 = vweird.f32 %v10911_v56 }
 0x315   :  { %v860_v15 = vsel %vm858_vm6, %v9692_v58, %v10907_v14  ;;  %v863_v22 = vsel %vm861_vm7, %v10908_v34, %v9695_v6  ;;  %v10243_v36 = vsel %vm10910_vm10, nan, %v1384_v24  ;;  %v10250_v58 = vsel %vm10912_vm2, nan, %v1280_v44  ;;  %v10922_v24 = vld [vmem:[#allocation58_spill] sm:$0xff] }
 0x316   :  { %v864_v0 = vsel %vm857_vm8, %v860_v15, %v863_v22  ;;  %vm1065_vm13 = vcmp.lt.s32.totalorder %v10214_v23, 2  ;;  %vm1069_vm1 = vcmp.eq.s32.totalorder %v10214_v23, 2  ;;  %vm10913_vm5 = vweird.f32 %v10747_v55 }
 0x317   :  { %v865_v6 = vsel %vm10913_vm5, nan, %v864_v0  ;;  %v2840_v45 = vsel %vm334_vm15, nan, %v2839_v41  ;;  %v752_v7 = vand.u32 3, %v751_v30  ;;  %v440_v4 = vand.u32 3, %v439_v47  ;;  %v10937_v0 = vld [vmem:[#allocation20_spill] sm:$0xff] }
 0x318   :  { %6334 = vmatprep.subr.mxu1 %v865_v6  ;;  %v543_v33 = vadd.s32 3, %v9934_v17  ;;  %5262 = vmatpush1.msra.mxu0 %v2840_v45  ;;  %v10915_v5 = vxor.u32 2147483648, %v10914_v12  ;;  %v10917_v42 = vxor.u32 2147483648, %v10916_v51  ;;  %vm962_vm14 = vcmp.eq.s32.totalorder %v10220_v11, 0 }
 0x319   :  { %v648_v55 = vand.u32 3, %v9922_v13  ;;  %6335 = vmatpush3.msra.mxu1 %v865_v6  ;;  %6237 = vmatmul.mubr.msk.f32.vlgmr.msra.gmra.mxu0 %vm5218_vm0, %v9859_v1  ;;  %vm965_vm11 = vcmp.eq.s32.totalorder %v10220_v11, 2  ;;  %vm442_vm12 = vcmp.eq.s32.totalorder %v440_v4, 0  ;;  %vm445_vm6 = vcmp.eq.s32.totalorder %v440_v4, 2 }
 0x31a   :  { %v1068_v37 = vsel %vm1066_vm4, %v10916_v51, %v10915_v5  ;;  %v1071_v50 = vsel %vm1069_vm1, %v10917_v42, %v10914_v12  ;;  %5433 = vmatprep.subr.mxu0 %v9995_v20  ;;  %v544_v17 = vand.u32 3, %v543_v33  ;;  %v10919_v21 = vmov 0.0   ;;  %v5613_v51 = vpop.permute.xlu1 %5612 }
 0x31b   :  { %5434 = vmatpush1.msra.mxu0 %v10918_v59  ;;  %5301 = vmatprep.mubr.f32.mxu0 %v10919_v21  ;;  %v10921_v25 = vxor.u32 2147483648, %v10920_v16  ;;  %vm441_vm7 = vcmp.lt.s32.totalorder %v440_v4, 2  ;;  %v10923_v13 = vxor.u32 2147483648, %v9938_v60  ;;  %v10924_v20 = vxor.u32 2147483648, %v9936_v3 }
 0x31c   :  { %5435 = vmatprep.subr.mxu0 %v10028_v39  ;;  %vm754_vm8 = vcmp.eq.s32.totalorder %v752_v7, 0  ;;  %vm546_vm10 = vcmp.eq.s32.totalorder %v544_v17, 0  ;;  %vm549_vm4 = vcmp.eq.s32.totalorder %v544_v17, 2  ;;  %vm545_vm2 = vcmp.lt.s32.totalorder %v544_v17, 2 }
 0x31d   :  { %v964_v44 = vsel %vm962_vm14, %v10922_v24, %v10921_v25  ;;  %v444_v1 = vsel %vm442_vm12, %v9936_v3, %v10923_v13  ;;  %v447_v30 = vsel %vm445_vm6, %v10924_v20, %v9938_v60  ;;  %5436 = vmatpush1.msra.mxu0 %v10163_v52  ;;  %v10925_v35 = vxor.u32 2147483648, %v10048_v32 }
 0x31e   :  { %v448_v47 = vsel %vm441_vm7, %v444_v1, %v447_v30  ;;  %v10926_v15 = vxor.u32 2147483648, %v10045_v49  ;;  %v336_v3 = vand.u32 3, %v10031_v54  ;;  %6238 = vmatmul.mubr.msk.f32.gmra.mxu0 %vm5218_vm0, %v10083_v40  ;;  %5437 = vmatprep.subr.mxu0 %v10167_v31  ;;  %v10927_v60 = vxor.u32 2147483648, %v10922_v24 }
 0x31f   :  { %v548_v14 = vsel %vm546_vm10, %v10045_v49, %v10925_v35  ;;  %v10928_v52 = vxor.u32 2147483648, %v9578_v28  ;;  %vm757_vm1 = vcmp.eq.s32.totalorder %v752_v7, 2  ;;  %5438 = vmatpush1.msra.mxu0 %v10194_v38  ;;  %5307 = vmatprep.mubr.f32.mxu0 %v10919_v21  ;;  %v10929_v54 = vxor.u32 2147483648, %v9574_v29 }
 0x320   :  { %v551_v34 = vsel %vm549_vm4, %v10926_v15, %v10048_v32  ;;  %v967_v39 = vsel %vm965_vm11, %v10927_v60, %v10920_v16  ;;  %vm650_vm5 = vcmp.eq.s32.totalorder %v648_v55, 0  ;;  %vm653_vm14 = vcmp.eq.s32.totalorder %v648_v55, 2  ;;  %5439 = vmatprep.subr.mxu0 %v10204_v19  ;;  %v5211_v19 = vld [vmem:[%s10415_s2 + $0x8] sm:$0xff]  ;;  %v5603_v16 = vpop.permute.xlu1 %5602 }
 0x321   :  { %v756_v22 = vsel %vm754_vm8, %v9574_v29, %v10928_v52  ;;  %v552_v49 = vsel %vm545_vm2, %v548_v14, %v551_v34  ;;  %v759_v32 = vsel %vm757_vm1, %v10929_v54, %v9578_v28  ;;  %v1072_v31 = vsel %vm1065_vm13, %v1068_v37, %v1071_v50  ;;  %5440 = vmatpush1.msra.mxu0 %v10212_v43  ;;  %v5212_v43 = vld [vmem:[%s10415_s2 + $0x10] sm:$0xff]  ;;  %v5608_v35 = vpop.permute.xlu0 %5607 }
 0x322   :  { %v553_v40 = vsel %vm542_vm3, nan, %v552_v49  ;;  %vm961_vm11 = vcmp.lt.s32.totalorder %v10220_v11, 2  ;;  %v10930_v38 = vxor.u32 2147483648, %v9809_v62  ;;  %v10931_v29 = vxor.u32 2147483648, %v9799_v27  ;;  %6239 = vmatmul.mubr.msk.f32.gmra.mxu0 %vm5218_vm0, %v10113_v26  ;;  %5441 = vmatprep.subr.mxu0 %v10243_v36  ;;  %v10932_v11 = vld [vmem:[#allocation18_spill] sm:$0xff]  ;;  %v10934_v36 = vld [vmem:[#allocation17_spill] sm:$0xff] }
 0x323   :  { %6336 = vmatprep.subr.mxu1 %v553_v40  ;;  %v968_v53 = vsel %vm961_vm11, %v964_v44, %v967_v39  ;;  %vm753_vm3 = vcmp.lt.s32.totalorder %v752_v7, 2  ;;  %vm338_vm12 = vcmp.eq.s32.totalorder %v336_v3, 0  ;;  %vm341_vm6 = vcmp.eq.s32.totalorder %v336_v3, 2  ;;  %5442 = vmatpush1.msra.mxu0 %v10250_v58 }
 0x324   :  { %v652_v2 = vsel %vm650_vm5, %v9799_v27, %v10930_v38  ;;  %v655_v28 = vsel %vm653_vm14, %v10931_v29, %v9809_v62  ;;  %6337 = vmatpush3.msra.mxu1 %v553_v40  ;;  %v760_v23 = vsel %vm753_vm3, %v756_v22, %v759_v32  ;;  %vm649_vm13 = vcmp.lt.s32.totalorder %v648_v55, 2  ;;  %5313 = vmatprep.mubr.f32.mxu0 %v10919_v21 }
 0x325   :  { %v340_v27 = vsel %vm338_vm12, %v10208_v9, %v339_v48  ;;  %v343_v62 = vsel %vm341_vm6, %v342_v63, %v10216_v10  ;;  %vm10933_vm7 = vweird.f32 %v10932_v11  ;;  %v656_v18 = vsel %vm649_vm13, %v652_v2, %v655_v28  ;;  %6339 = vmatmul.mubr.msk.f32.vlgmr.msra.gmra.mxu1 %vm5218_vm0, %v5211_v19  ;;  %v5213_v63 = vld [vmem:[%s10415_s2 + $0x18] sm:$0xff] }
 0x326   :  { %v1073_v26 = vsel %vm10933_vm7, nan, %v1072_v31  ;;  %vm10935_vm8 = vweird.f32 %v10934_v36  ;;  %vm337_vm10 = vcmp.lt.s32.totalorder %v336_v3, 2  ;;  %vm10936_vm4 = vweird.f32 %v10746_v61  ;;  %6341 = vmatprep.mubr.msk.f32.mxu1 %vm5218_vm0, %v5212_v43  ;;  %6240 = vmatmul.mubr.msk.f32.gmra.mxu0 %vm5218_vm0, %v10123_v57  ;;  %v5598_v3 = vpop.permute.xlu1 %5597 }
 0x327   :  { %5443 = vmatprep.subr.mxu0 %v1073_v26  ;;  %v969_v48 = vsel %vm10935_vm8, nan, %v968_v53  ;;  %v761_v9 = vsel %vm10936_vm4, nan, %v760_v23  ;;  %v344_v10 = vsel %vm337_vm10, %v340_v27, %v343_v62  ;;  %vm10938_vm2 = vweird.f32 %v10937_v0  ;;  %5481 = vmatprep.mubr.f32.mxu0 %v10919_v21  ;;  %v5641_v0 = vld [vmem:[%s10416_s5 + $0x10] sm:$0xff] }
 0x328   :  { %5444 = vmatpush1.msra.mxu0 %v969_v48  ;;  %v657_v41 = vsel %vm10938_vm2, nan, %v656_v18  ;;  %v449_v58 = vsel %vm438_vm9, nan, %v448_v47  ;;  %v345_v61 = vsel %vm334_vm15, nan, %v344_v10  ;;  %vm5667_vm9 = vcmask 261120  }
 0x329   :  { %5445 = vmatprep.subr.mxu0 %v761_v9  ;;  %6342 = vmatmul.mubr.msk.f32.gmra.mxu1 %vm5218_vm0, %v5213_v63 }
 0x32a   :  { %5446 = vmatpush1.msra.mxu0 %v657_v41  ;;  %5744 = vmatprep.mubr.f32.mxu1 %v10919_v21  ;;  %v5642_v41 = vld [vmem:[%s10416_s5 + $0x18] sm:$0xff] }
 0x32b   :  { %5447 = vmatprep.subr.mxu0 %v449_v58 }
 0x32c   :  { %5448 = vmatpush1.msra.mxu0 %v345_v61 }
 0x32d   :  { %6245 = vmatmul.mubr.msk.f32.vlgmr.msra.gmra.mxu0 %vm5218_vm0, %v10136_v46 }
 0x32e   :  { %5487 = vmatprep.mubr.f32.mxu0 %v10919_v21 }
 0x331   :  { %6246 = vmatmul.mubr.msk.f32.gmra.mxu0 %vm5218_vm0, %v5211_v19 }
 0x332   :  { %5493 = vmatprep.mubr.f32.mxu0 %v10919_v21 }
 0x335   :  { %6247 = vmatmul.mubr.msk.f32.gmra.mxu0 %vm5218_vm0, %v5212_v43 }
 0x336   :  { %5499 = vmatprep.mubr.f32.mxu0 %v10919_v21 }
 0x339   :  { %6248 = vmatmul.mubr.msk.f32.gmra.mxu0 %vm5218_vm0, %v5213_v63  ;;  %v5640_v63 = vld [vmem:[%s10416_s5 + $0x8] sm:$0xff]  ;;  %vm6641_vm0 = vmmov 0  }
 0x33a   :  { %6352 = vmatprep.mubr.msk.f32.mxu0 %vm5667_vm9, %v10370_v8 }
 0x3bb   :  { %v6318_v57 = vpop.f32.mrf.mxu1 }
 0x3bd   :  { %v5386_v46 = vpop.f32.mrf.mxu1 }
 0x3bf   :  { %v6321_v7 = vpop.f32.mrf.mxu1 }
 0x3c1   :  { %v5396_v12 = vpop.f32.mrf.mxu1 }
 0x3d9   :  { %v5297_v6 = vpop.f32.mrf.mxu0 }
 0x3db   :  { %v5299_v45 = vpop.f32.mrf.mxu0 }
 0x3de   :  { %v5303_v4 = vpop.f32.mrf.mxu0 }
 0x3e0   :  { %v5305_v33 = vpop.f32.mrf.mxu0 }
 0x3e2   :  { %v5309_v5 = vpop.f32.mrf.mxu0 }
 0x3e4   :  { %v5311_v37 = vpop.f32.mrf.mxu0 }
 0x3e5   :  { %v6340_v42 = vpop.f32.mrf.mxu1 }
 0x3e6   :  { %v5315_v50 = vpop.f32.mrf.mxu0  ;;  %v5578_v44 = vadd.f32 %v6340_v42, %v6318_v57 }
 0x3e7   :  { %v5572_v55 = vpop.f32.mrf.mxu1 }
 0x3e8   :  { %v5317_v17 = vpop.f32.mrf.mxu0  ;;  %v5573_v47 = vadd.f32 %v5572_v55, %v5386_v46  ;;  %v5620_v15 = vadd.f32 %v5603_v16, %v5578_v44 }
 0x3e9   :  { %v6343_v59 = vpop.f32.mrf.mxu1 }
 0x3ea   :  { %v5588_v25 = vadd.f32 %v6343_v59, %v6321_v7  ;;  %v5617_v60 = vadd.f32 %v5598_v3, %v5573_v47 }
 0x3eb   :  { %v5582_v13 = vpop.f32.mrf.mxu1 }
 0x3ec   :  { %v5626_v1 = vadd.f32 %v5613_v51, %v5588_v25  ;;  %v5583_v20 = vadd.f32 %v5582_v13, %v5396_v12 }
 0x3ed   :  { %v5483_v24 = vpop.f32.mrf.mxu0 }
 0x3ee   :  { %6578 = vtanh.f32 %v5626_v1  ;;  %v5623_v14 = vadd.f32 %v5608_v35, %v5583_v20  ;;  %v5484_v62 = vadd.f32 %v5483_v24, %v5297_v6 }
 0x3ef   :  { %v5485_v30 = vpop.f32.mrf.mxu0 }
 0x3f0   :  { %6580 = vtanh.f32 %v5623_v14  ;;  %v5486_v19 = vadd.f32 %v5485_v30, %v5299_v45  ;;  %v5615_v9 = vadd.f32 %v5598_v3, %v5484_v62 }
 0x3f1   :  { %v5489_v34 = vpop.f32.mrf.mxu0  ;;  %6582 = vtanh.f32 %v5620_v15 }
 0x3f2   :  { %6584 = vtanh.f32 %v5617_v60  ;;  %v5490_v28 = vadd.f32 %v5489_v34, %v5303_v4  ;;  %v5616_v48 = vadd.f32 %v5598_v3, %v5486_v19  ;;  %v5665_v4 = vpop.permute.xlu0 %5664 }
 0x3f3   :  { %v5491_v39 = vpop.f32.mrf.mxu0 }
 0x3f4   :  { %v5492_v38 = vadd.f32 %v5491_v39, %v5305_v33  ;;  %v5618_v18 = vadd.f32 %v5603_v16, %v5490_v28 }
 0x3f5   :  { %v5495_v52 = vpop.f32.mrf.mxu0 }
 0x3f6   :  { %v5496_v40 = vadd.f32 %v5495_v52, %v5309_v5  ;;  %v5619_v26 = vadd.f32 %v5603_v16, %v5492_v38 }
 0x3f7   :  { %v5497_v22 = vpop.f32.mrf.mxu0 }
 0x3f8   :  { %v5498_v54 = vadd.f32 %v5497_v22, %v5311_v37  ;;  %v5621_v43 = vadd.f32 %v5608_v35, %v5496_v40  ;;  %v5655_v37 = vpop.permute.xlu0 %5654 }
 0x3f9   :  { %v5501_v49 = vpop.f32.mrf.mxu0 }
 0x3fa   :  { %v5502_v32 = vadd.f32 %v5501_v49, %v5315_v50  ;;  %v5622_v23 = vadd.f32 %v5608_v35, %v5498_v54  ;;  %v5866_v35 = vld [vmem:[%s10417_s7] sm:$0x3] }
 0x3fb   :  { %v5503_v31 = vpop.f32.mrf.mxu0  ;;  %v6579_v29 = vpop.eup %6578 }
 0x3fc   :  { %v5504_v2 = vadd.f32 %v5503_v31, %v5317_v17  ;;  %v5624_v53 = vadd.f32 %v5613_v51, %v5502_v32  ;;  %6344 = vmatprep.subr.mxu0 %v6579_v29 }
 0x3fd   :  { %6345 = vmatpush3.msra.mxu0 %v6579_v29  ;;  %v6581_v11 = vpop.eup %6580 }
 0x3fe   :  { %v5625_v27 = vadd.f32 %v5613_v51, %v5504_v2  ;;  %6346 = vmatprep.subr.mxu0 %v6581_v11  ;;  %v6583_v36 = vpop.eup %6582 }
 0x3ff   :  { %6347 = vmatpush3.msra.mxu0 %v6581_v11  ;;  %v6585_v10 = vpop.eup %6584 }
 0x400   :  { %6586 = vtanh.f32 %v5625_v27  ;;  %6348 = vmatprep.subr.mxu0 %v6583_v36  ;;  %v5871_v27 = vpop.permute.xlu0 %5870 }
 0x401   :  { %6588 = vtanh.f32 %v5624_v53  ;;  %6349 = vmatpush3.msra.mxu0 %v6583_v36  ;;  %v6642_v36 = vmov 1983009808  }
 0x402   :  { %6590 = vtanh.f32 %v5622_v23  ;;  %6350 = vmatprep.subr.mxu0 %v6585_v10 }
 0x403   :  { %6592 = vtanh.f32 %v5621_v43  ;;  %6351 = vmatpush3.msra.mxu0 %v6585_v10 }
 0x404   :  { %6594 = vtanh.f32 %v5619_v26  ;;  %6353 = vmatmul.mubr.msk.f32.vlgmr.msra.gmra.mxu0 %vm5667_vm9, %v5640_v63 }
 0x405   :  { %6596 = vtanh.f32 %v5618_v18  ;;  %6355 = vmatprep.mubr.msk.f32.mxu0 %vm5667_vm9, %v5641_v0 }
 0x406   :  { %6598 = vtanh.f32 %v5616_v48  ;;  %v6025_v48 = vunpack.c.l.s4 %v6642_v36 }
 0x407   :  { %6600 = vtanh.f32 %v5615_v9 }
 0x408   :  { %6356 = vmatmul.mubr.msk.f32.gmra.mxu0 %vm5667_vm9, %v5642_v41  ;;  %v6026_v9 = vunpack.c.0.s8 %v6025_v48 }
 0x409   :  { %5940 = vmatprep.mubr.f32.mxu0 %v10919_v21 }
 0x40d   :  { %v6587_v56 = vpop.eup %6586 }
 0x40e   :  { %v6589_v58 = vpop.eup %6588  ;;  %5704 = vmatprep.subr.mxu1 %v6587_v56 }
 0x40f   :  { %v6591_v61 = vpop.eup %6590  ;;  %5705 = vmatpush1.msra.mxu1 %v6589_v58 }
 0x410   :  { %v6593_v57 = vpop.eup %6592  ;;  %5706 = vmatprep.subr.mxu1 %v6591_v61 }
 0x411   :  { %v6595_v46 = vpop.eup %6594  ;;  %5707 = vmatpush1.msra.mxu1 %v6593_v57 }
 0x412   :  { %v6597_v6 = vpop.eup %6596  ;;  %5708 = vmatprep.subr.mxu1 %v6595_v46 }
 0x413   :  { %v6599_v45 = vpop.eup %6598  ;;  %5709 = vmatpush1.msra.mxu1 %v6597_v6 }
 0x414   :  { %v6601_v7 = vpop.eup %6600  ;;  %5710 = vmatprep.subr.mxu1 %v6599_v45 }
 0x415   :  { %5711 = vmatpush1.msra.mxu1 %v6601_v7 }
 0x416   :  { %6253 = vmatmul.mubr.msk.f32.vlgmr.msra.gmra.mxu1 %vm5667_vm9, %v10370_v8  ;;  %6358 = vmatprep.subr.mxu1 %v10919_v21  ;;  %v5660_v8 = vpop.permute.xlu1 %5659 }
 0x417   :  { %5750 = vmatprep.mubr.f32.mxu1 %v10919_v21 }
 0x41a   :  { %6254 = vmatmul.mubr.msk.f32.gmra.mxu1 %vm5667_vm9, %v5640_v63  ;;  %v5650_v17 = vpop.permute.xlu1 %5649 }
 0x41b   :  { %5756 = vmatprep.mubr.f32.mxu1 %v10919_v21 }
 0x41e   :  { %6255 = vmatmul.mubr.msk.f32.gmra.mxu1 %vm5667_vm9, %v5641_v0  ;;  %v10940_v0 = vld [vmem:[#allocation2_spill] sm:$0xff] }
 0x41f   :  { %5762 = vmatprep.mubr.f32.mxu1 %v10919_v21 }
 0x422   :  { %6256 = vmatmul.mubr.msk.f32.gmra.mxu1 %vm5667_vm9, %v5642_v41  ;;  %v6029_v41 = vsub.s32 %v6026_v9, %v10940_v0 }
 0x423   :  { %6366 = vmatprep.mubr.msk.f32.mxu1 %vm6641_vm0, %v10919_v21 }
 0x4c4   :  { %v6354_v33 = vpop.f32.mrf.mxu0 }
 0x4c5   :  { %v5841_v50 = vadd.f32 %v6354_v33, %v5655_v37 }
 0x4c6   :  { %v5835_v12 = vpop.f32.mrf.mxu0 }
 0x4c7   :  { %v5836_v59 = vadd.f32 %v5835_v12, %v5650_v17 }
 0x4c8   :  { %v6357_v5 = vpop.f32.mrf.mxu0 }
 0x4c9   :  { %v5851_v51 = vadd.f32 %v6357_v5, %v5665_v4 }
 0x4ca   :  { %v5845_v42 = vpop.f32.mrf.mxu0 }
 0x4cb   :  { %6602 = vtanh.f32 %v5851_v51  ;;  %v5846_v55 = vadd.f32 %v5845_v42, %v5660_v8 }
 0x4cd   :  { %6604 = vtanh.f32 %v5846_v55 }
 0x4ce   :  { %6606 = vtanh.f32 %v5841_v50 }
 0x4cf   :  { %6608 = vtanh.f32 %v5836_v59 }
 0x4d6   :  { %v5746_v16 = vpop.f32.mrf.mxu1 }
 0x4d7   :  { %v5747_v32 = vadd.f32 %v5746_v16, %v5650_v17 }
 0x4d8   :  { %v5748_v25 = vpop.f32.mrf.mxu1  ;;  %v6603_v44 = vpop.eup %6602 }
 0x4d9   :  { %6359 = vmatpush3.msra.mxu1 %v6603_v44  ;;  %v5749_v54 = vadd.f32 %v5748_v25, %v5650_v17 }
 0x4da   :  { %v5752_v24 = vpop.f32.mrf.mxu1  ;;  %v6605_v1 = vpop.eup %6604  ;;  %6360 = vmatprep.subr.mxu1 %v10919_v21 }
 0x4db   :  { %6361 = vmatpush3.msra.mxu1 %v6605_v1  ;;  %v6607_v30 = vpop.eup %6606  ;;  %v5753_v49 = vadd.f32 %v5752_v24, %v5655_v37 }
 0x4dc   :  { %v5754_v13 = vpop.f32.mrf.mxu1  ;;  %6362 = vmatprep.subr.mxu1 %v10919_v21  ;;  %v6609_v14 = vpop.eup %6608 }
 0x4dd   :  { %6363 = vmatpush3.msra.mxu1 %v6607_v30  ;;  %v5755_v22 = vadd.f32 %v5754_v13, %v5655_v37 }
 0x4de   :  { %v5758_v20 = vpop.f32.mrf.mxu1  ;;  %6364 = vmatprep.subr.mxu1 %v10919_v21 }
 0x4df   :  { %6365 = vmatpush3.msra.mxu1 %v6609_v14  ;;  %v5759_v52 = vadd.f32 %v5758_v20, %v5660_v8 }
 0x4e0   :  { %v5760_v47 = vpop.f32.mrf.mxu1  ;;  %6367 = vmatmul.mubr.msk.f32.vlgmr.msra.gmra.mxu1 %vm5667_vm9, %v5866_v35 }
 0x4e1   :  { %v5761_v60 = vadd.f32 %v5760_v47, %v5660_v8 }
 0x4e2   :  { %v5764_v15 = vpop.f32.mrf.mxu1 }
 0x4e3   :  { %v5765_v34 = vadd.f32 %v5764_v15, %v5665_v4 }
 0x4e4   :  { %v5766_v3 = vpop.f32.mrf.mxu1 }
 0x4e5   :  { %v5767_v39 = vadd.f32 %v5766_v3, %v5665_v4 }
 0x4e7   :  { %6610 = vtanh.f32 %v5767_v39 }
 0x4e8   :  { %6612 = vtanh.f32 %v5765_v34 }
 0x4e9   :  { %6614 = vtanh.f32 %v5761_v60 }
 0x4ea   :  { %6616 = vtanh.f32 %v5759_v52 }
 0x4eb   :  { %6618 = vtanh.f32 %v5755_v22 }
 0x4ec   :  { %6620 = vtanh.f32 %v5753_v49 }
 0x4ed   :  { %6622 = vtanh.f32 %v5749_v54 }
 0x4ee   :  { %6624 = vtanh.f32 %v5747_v32 }
 0x4f4   :  { %v6611_v21 = vpop.eup %6610 }
 0x4f5   :  { %v6613_v40 = vpop.eup %6612  ;;  %5900 = vmatprep.subr.mxu0 %v6611_v21 }
 0x4f6   :  { %v6615_v31 = vpop.eup %6614  ;;  %5901 = vmatpush1.msra.mxu0 %v6613_v40 }
 0x4f7   :  { %v6617_v38 = vpop.eup %6616  ;;  %5902 = vmatprep.subr.mxu0 %v6615_v31 }
 0x4f8   :  { %v6619_v2 = vpop.eup %6618  ;;  %5903 = vmatpush1.msra.mxu0 %v6617_v38 }
 0x4f9   :  { %v6621_v29 = vpop.eup %6620  ;;  %5904 = vmatprep.subr.mxu0 %v6619_v2 }
 0x4fa   :  { %v6623_v28 = vpop.eup %6622  ;;  %5905 = vmatpush1.msra.mxu0 %v6621_v29 }
 0x4fb   :  { %v6625_v53 = vpop.eup %6624  ;;  %5906 = vmatprep.subr.mxu0 %v6623_v28 }
 0x4fc   :  { %5907 = vmatpush1.msra.mxu0 %v6625_v53 }
 0x4fd   :  { %6261 = vmatmul.mubr.msk.f32.vlgmr.msra.gmra.mxu0 %vm5667_vm9, %v5866_v35 }
 0x5a0   :  { %v6013_v19 = vpop.f32.mrf.mxu1 }
 0x5a1   :  { %v6014_v62 = vadd.f32 %v6013_v19, %v5871_v27 }
 0x5a2   :  { %v6368_v23 = vpop.f32.mrf.mxu1 }
 0x5a3   :  { %6626 = vtanh.f32 %v6014_v62 }
 0x5b0   :  { %v6627_v10 = vpop.eup %6626 }
 0x5b1   :  { %v6037_v61 = vrot.slane %v6627_v10, %v6029_v41 }
 0x5bd   :  { %v5942_v43 = vpop.f32.mrf.mxu0 }
 0x5be   :  { %v5943_v11 = vadd.f32 %v5942_v43, %v5871_v27 }
 0x5bf   :  { %v5944_v26 = vpop.f32.mrf.mxu0 }
 0x5c0   :  { %v5945_v18 = vadd.f32 %v5944_v26, %v5871_v27  ;;  %6628 = vtanh.f32 %v5943_v11 }
 0x5c2   :  { %6630 = vtanh.f32 %v5945_v18 }
 0x5cd   :  { %v6629_v63 = vpop.eup %6628 }
 0x5cf   :  { %v6631_v56 = vpop.eup %6630 }
 0x5d0   :  { %v6023_v58 = vcombine.low %v6629_v63, %v6631_v56 }
 0x5d2   :  { %v6030_v57 = vrot.slane %v6023_v58, %v6029_v41 }
 0x5d4   :  { %v6038_v46 = vcombine.low %v6030_v57, %v6037_v61 }
 0x5d6   :  { %6040 = vst [vmem:[%s10418_s9] sm:$0x3f] %v6038_v46 }

</bundles_post_ra>
